<compile_context>
chip_gen: v7x
topology: tpu7x:2x2x1
jax: 0.10.0
libtpu: 0.0.40
codegen_flags: <defaults>
</compile_context>

<pallas_src>
import jax
import jax.numpy as jnp
from jax.experimental import pallas as pl
from jax.experimental.pallas import tpu as pltpu


# fc1 tiling: 2 contiguous N shards of 256 ("parallel" axis for v7x's 2 TCs),
# K split into 4 tiles of 21632 ("arbitrary" reduction axis).
FC1_SHARDS = 2
FC1_TN = 256
FC1_TK = 21632          # 86528 / 4, multiple of 128
FC1_VMEM_LIMIT = 48 << 20


# ----------------------------------------------------------------------------
# Conv-as-matmul kernel (single block): y = relu(x @ w + b).
# All conv operands fit comfortably in VMEM, so grid = (1,).
# ----------------------------------------------------------------------------
def _matmul_bias_relu_kernel(x_ref, w_ref, b_ref, o_ref):
    y = jnp.dot(x_ref[...], w_ref[...], preferred_element_type=jnp.float32)
    o_ref[...] = jnp.maximum(y + b_ref[...], 0.0)


def matmul_bias_relu(x, w, b):
    M, K = x.shape
    K2, N = w.shape
    assert K == K2
    return pl.pallas_call(
        _matmul_bias_relu_kernel,
        out_shape=jax.ShapeDtypeStruct((M, N), jnp.float32),
        grid_spec=pltpu.PrefetchScalarGridSpec(
            num_scalar_prefetch=0,
            grid=(1,),
            in_specs=[
                pl.BlockSpec((M, K), lambda i: (0, 0)),
                pl.BlockSpec((K, N), lambda i: (0, 0)),
                pl.BlockSpec((1, N), lambda i: (0, 0)),
            ],
            out_specs=pl.BlockSpec((M, N), lambda i: (0, 0)),
        ),
        compiler_params=pltpu.CompilerParams(
            dimension_semantics=("arbitrary",),
        ),
    )(x, w, b.reshape(1, N))


# ----------------------------------------------------------------------------
# fc1 kernel: y = relu(x @ W1 + b1) with W1 stored bf16, shard-major
# (nj, K, tn).  Grid = (N shards [parallel], K tiles [arbitrary]).  The
# output block index is constant across the K axis, so o_ref stays resident
# in VMEM and doubles as the f32 accumulator.  Bias + ReLU on last K step.
# ----------------------------------------------------------------------------
def _fc1_kernel(x_ref, w_ref, b_ref, o_ref):
    k = pl.program_id(1)

    @pl.when(k == 0)
    def _():
        o_ref[...] = jnp.zeros_like(o_ref)

    # bf16 x bf16 MXU pass, f32 accumulate directly into the resident block.
    o_ref[...] += jnp.dot(x_ref[...], w_ref[0], preferred_element_type=jnp.float32)

    @pl.when(k == pl.num_programs(1) - 1)
    def _():
        o_ref[...] = jnp.maximum(o_ref[...] + b_ref[...], 0.0)


def fc1_matmul_relu(x_bf16, w_sharded, b, *, tk=FC1_TK,
                    vmem_limit_bytes=FC1_VMEM_LIMIT):
    """x_bf16: (M, K) bf16; w_sharded: (nj, K, tn) bf16; b: (nj*tn,) f32."""
    M, K = x_bf16.shape
    nj, K2, tn = w_sharded.shape
    assert K == K2 and K % tk == 0
    nk = K // tk
    N = nj * tn

    cost = pl.CostEstimate(
        flops=2 * M * K * N,
        transcendentals=0,
        # bf16 activations + bf16 weights + f32 output/bias.
        bytes_accessed=2 * M * K + 2 * K * N + 4 * M * N + 4 * N,
    )

    return pl.pallas_call(
        _fc1_kernel,
        out_shape=jax.ShapeDtypeStruct((M, N), jnp.float32),
        grid_spec=pltpu.PrefetchScalarGridSpec(
            num_scalar_prefetch=0,
            grid=(nj, nk),
            in_specs=[
                pl.BlockSpec((M, tk), lambda j, k: (0, k)),
                # shard-major weight: each (tk, tn) block is one contiguous DMA
                pl.BlockSpec((1, tk, tn), lambda j, k: (j, k, 0)),
                pl.BlockSpec((1, tn), lambda j, k: (0, j)),
            ],
            out_specs=pl.BlockSpec((M, tn), lambda j, k: (0, j)),
        ),
        compiler_params=pltpu.CompilerParams(
            dimension_semantics=("parallel", "arbitrary"),
            vmem_limit_bytes=vmem_limit_bytes,
        ),
        cost_estimate=cost,
    )(x_bf16, w_sharded, b.reshape(1, N))


# ----------------------------------------------------------------------------
# Fused fc2 + fc3 kernel: out = relu(x @ W2 + b2) @ W3p + b3p
# (W3/b3 are padded to a lane-dense N; wrapper slices back to num_classes.)
# ----------------------------------------------------------------------------
def _fc23_kernel(x_ref, w2_ref, b2_ref, w3_ref, b3_ref, o_ref):
    h = jnp.dot(x_ref[...], w2_ref[...], preferred_element_type=jnp.float32)
    h = jnp.maximum(h + b2_ref[...], 0.0)
    o_ref[...] = (
        jnp.dot(h, w3_ref[...], preferred_element_type=jnp.float32)
        + b3_ref[...]
    )


def fc2_fc3_fused(x, w2, b2, w3_padded, b3_padded):
    M, H = x.shape
    H2, Np = w3_padded.shape
    assert w2.shape == (H, H2)
    return pl.pallas_call(
        _fc23_kernel,
        out_shape=jax.ShapeDtypeStruct((M, Np), jnp.float32),
        grid_spec=pltpu.PrefetchScalarGridSpec(
            num_scalar_prefetch=0,
            grid=(1,),
            in_specs=[
                pl.BlockSpec((M, H), lambda i: (0, 0)),
                pl.BlockSpec((H, H2), lambda i: (0, 0)),
                pl.BlockSpec((1, H2), lambda i: (0, 0)),
                pl.BlockSpec((H2, Np), lambda i: (0, 0)),
                pl.BlockSpec((1, Np), lambda i: (0, 0)),
            ],
            out_specs=pl.BlockSpec((M, Np), lambda i: (0, 0)),
        ),
        compiler_params=pltpu.CompilerParams(
            dimension_semantics=("arbitrary",),
        ),
    )(x, w2, b2.reshape(1, H2), w3_padded, b3_padded.reshape(1, Np))


# ----------------------------------------------------------------------------
# im2col glue (pure JAX data movement; the matmul itself is in the kernel)
# ----------------------------------------------------------------------------
def im2col(x_nhwc, kh, kw):
    B, H, W, C = x_nhwc.shape
    Ho, Wo = H - kh + 1, W - kw + 1
    cols = []
    for i in range(kh):
        for j in range(kw):
            cols.append(x_nhwc[:, i : i + Ho, j : j + Wo, :])
    patches = jnp.concatenate(cols, axis=-1)          # (B, Ho, Wo, kh*kw*C)
    return patches.reshape(B * Ho * Wo, kh * kw * C), (B, Ho, Wo)


def conv2d_relu(x_nhwc, w_khwcico, b):
    """Valid 3x3 conv, stride 1, + bias + ReLU. w: (KH, KW, Cin, Cout)."""
    KH, KW, Cin, Cout = w_khwcico.shape
    patches, (B, Ho, Wo) = im2col(x_nhwc, KH, KW)
    w2 = w_khwcico.reshape(KH * KW * Cin, Cout)
    y = matmul_bias_relu(patches, w2, b)              # Pallas kernel
    return y.reshape(B, Ho, Wo, Cout)


# ----------------------------------------------------------------------------
# Parameter setup (deterministic, synthetic)
# ----------------------------------------------------------------------------
def init_params(key, num_classes=11):
    def conv_w(key, kh, kw, cin, cout):
        scale = 1.0 / jnp.sqrt(kh * kw * cin)
        return scale * jax.random.normal(key, (kh, kw, cin, cout), jnp.float32)

    def fc_w(key, fin, fout):
        scale = 1.0 / jnp.sqrt(fin)
        return scale * jax.random.normal(key, (fin, fout), jnp.float32)

    ks = jax.random.split(key, 12)

    # fc1 is generated in PyTorch's flatten order (rows indexed flat over
    # (C, H, W)) and pre-permuted once to NHWC flatten order (H, W, C) so the
    # forward pass can flatten with a plain reshape (no transpose before fc1).
    # It is then reshaped to shard-major (FC1_SHARDS, K, FC1_TN) and cast to
    # bf16 so each TensorCore streams a fully contiguous half of the weight.
    C, Hs, Ws, F1 = 128, 26, 26, 512
    K1 = C * Hs * Ws
    w_fc1_chw = fc_w(ks[6], K1, F1)
    w_fc1 = (
        w_fc1_chw.reshape(C, Hs, Ws, F1)
        .transpose(1, 2, 0, 3)
        .reshape(Hs * Ws * C, F1)
    )
    w_fc1_sharded = (
        w_fc1.reshape(K1, FC1_SHARDS, FC1_TN)
        .transpose(1, 0, 2)                            # (nj, K, tn)
        .astype(jnp.bfloat16)
    )

    params = {
        "conv1": (conv_w(ks[0], 3, 3, 4, 32),
                  0.01 * jax.random.normal(ks[1], (32,), jnp.float32)),
        "conv2": (conv_w(ks[2], 3, 3, 32, 64),
                  0.01 * jax.random.normal(ks[3], (64,), jnp.float32)),
        "conv3": (conv_w(ks[4], 3, 3, 64, 128),
                  0.01 * jax.random.normal(ks[5], (128,), jnp.float32)),
        "fc1": (w_fc1_sharded,
                0.01 * jax.random.normal(ks[7], (512,), jnp.float32)),
        "fc2": (fc_w(ks[8], 512, 512),
                0.01 * jax.random.normal(ks[9], (512,), jnp.float32)),
        "fc3": (fc_w(ks[10], 512, num_classes),
                0.01 * jax.random.normal(ks[11], (num_classes,), jnp.float32)),
    }
    return params


# ----------------------------------------------------------------------------
# Forward pass (mirrors SoliCNNTaskA.forward)
# ----------------------------------------------------------------------------
def solicnn_forward(x_nchw, params):
    # NCHW (PyTorch) -> NHWC (kernel layout)
    x = jnp.transpose(x_nchw, (0, 2, 3, 1))

    for name in ("conv1", "conv2", "conv3"):
        w, b = params[name]
        x = conv2d_relu(x, w, b)                      # ReLU(conv)

    # x: (B, 26, 26, 128).  fc1 weight rows were permuted at init to NHWC
    # flatten order, so a plain reshape matches PyTorch's x.view(-1, 128*26*26).
    # Cast to bf16 so fc1 is a true single-pass bf16 MXU matmul (f32 accum).
    B = x.shape[0]
    feat = x.reshape(B, 26 * 26 * 128).astype(jnp.bfloat16)

    # fc1: bf16 weight stream (~88.6 MB), shard-major contiguous DMAs,
    # K tiles of 21632 (4 steps per shard), 2-way parallel N shards for v7x.
    # NOTE: jnp.dot uses default TPU matmul precision (bf16 MXU passes); pass
    # precision=jax.lax.Precision.HIGHEST inside the kernels if bitwise-closer
    # f32 parity with PyTorch is required.
    w1, b1 = params["fc1"]
    h = fc1_matmul_relu(feat, w1, b1)

    # fc2 + fc3 fused into one pallas_call; fc3's N padded to a lane-dense
    # multiple of 128, sliced back to num_classes afterwards.
    w2, b2 = params["fc2"]
    w3, b3 = params["fc3"]
    nc = w3.shape[1]
    pad = (-nc) % 128
    if pad:
        w3 = jnp.pad(w3, ((0, 0), (0, pad)))
        b3 = jnp.pad(b3, (0, pad))
    out = fc2_fc3_fused(h, w2, b2, w3, b3)
    return out[:, :nc]


if __name__ == "__main__":
    key = jax.random.PRNGKey(0)
    pkey, xkey = jax.random.split(key)

    params = init_params(pkey, num_classes=11)
    # Module geometry requires 32x32 spatial input (three valid 3x3 convs -> 26x26).
    x = jax.random.normal(xkey, (2, 4, 32, 32), jnp.float32)

    out = solicnn_forward(x, params)
    out = jax.block_until_ready(out)
    assert out.shape == (2, 11), out.shape
    assert out.dtype == jnp.float32
    print("KERNEL_OK")
</pallas_src>

<mosaic_0001>
module attributes {stable_mosaic.version = 11 : i64} {
  func.func @_matmul_bias_relu_kernel(%arg0: i32, %arg1: memref<1800x36xf32, #tpu.memory_space<vmem>>, %arg2: memref<36x32xf32, #tpu.memory_space<vmem>>, %arg3: memref<1x32xf32, #tpu.memory_space<vmem>>, %arg4: memref<1800x32xf32, #tpu.memory_space<vmem>>) attributes {dimension_semantics = [#tpu.dimension_semantics<arbitrary>], iteration_bounds = array<i64: 1>, scalar_prefetch = 0 : i64, scratch_operands = 0 : i64, tpu.core_type = #tpu.core_type<tc>, window_params = [{pipeline_mode = #tpu.pipeline_mode<synchronous>, transform_indices = @transform_0, window_bounds = array<i64: 1800, 36>}, {pipeline_mode = #tpu.pipeline_mode<synchronous>, transform_indices = @transform_1, window_bounds = array<i64: 36, 32>}, {pipeline_mode = #tpu.pipeline_mode<synchronous>, transform_indices = @transform_2, window_bounds = array<i64: 1, 32>}, {pipeline_mode = #tpu.pipeline_mode<synchronous>, transform_indices = @transform_3, window_bounds = array<i64: 1800, 32>}]} {
    %c0 = arith.constant 0 : index
    %c0_0 = arith.constant 0 : index
    %0 = vector.load %arg1[%c0, %c0_0] : memref<1800x36xf32, #tpu.memory_space<vmem>>, vector<1800x36xf32>
    %c0_1 = arith.constant 0 : index
    %c0_2 = arith.constant 0 : index
    %1 = vector.load %arg2[%c0_1, %c0_2] : memref<36x32xf32, #tpu.memory_space<vmem>>, vector<36x32xf32>
    %cst = arith.constant dense<0.000000e+00> : vector<1800x32xf32>
    %2 = tpu.matmul %0, %1, %cst {dimension_numbers = #tpu.dot_dimension_numbers<[1], [0], [0], [1], [0, 0, 1, 1], [], []>} : vector<1800x36xf32>, vector<36x32xf32>, vector<1800x32xf32> -> vector<1800x32xf32>
    %c0_3 = arith.constant 0 : index
    %c0_4 = arith.constant 0 : index
    %3 = vector.load %arg3[%c0_3, %c0_4] : memref<1x32xf32, #tpu.memory_space<vmem>>, vector<1x32xf32>
    %4 = vector.broadcast %3 : vector<1x32xf32> to vector<1800x32xf32>
    %5 = arith.addf %2, %4 : vector<1800x32xf32>
    %cst_5 = arith.constant 0.000000e+00 : f32
    %6 = vector.broadcast %cst_5 : f32 to vector<1800x32xf32>
    %7 = arith.maximumf %5, %6 : vector<1800x32xf32>
    %c0_6 = arith.constant 0 : index
    %c0_7 = arith.constant 0 : index
    %8 = vector.load %arg4[%c0_6, %c0_7] : memref<1800x32xf32, #tpu.memory_space<vmem>>, vector<1800x32xf32>
    tpu.vector_store %arg4[%c0_6, %c0_7], %7 {strides = array<i32>} : memref<1800x32xf32, #tpu.memory_space<vmem>>, vector<1800x32xf32>,
    return
  }
  func.func @transform_0(%arg0: i32) -> (i32, i32) {
    %c0_i32 = arith.constant 0 : i32
    %c0_i32_0 = arith.constant 0 : i32
    %c0_i32_1 = arith.constant 0 : i32
    return %c0_i32, %c0_i32_0 : i32, i32
  }
  func.func @transform_1(%arg0: i32) -> (i32, i32) {
    %c0_i32 = arith.constant 0 : i32
    %c0_i32_0 = arith.constant 0 : i32
    %c0_i32_1 = arith.constant 0 : i32
    return %c0_i32, %c0_i32_0 : i32, i32
  }
  func.func @transform_2(%arg0: i32) -> (i32, i32) {
    %c0_i32 = arith.constant 0 : i32
    %c0_i32_0 = arith.constant 0 : i32
    %c0_i32_1 = arith.constant 0 : i32
    return %c0_i32, %c0_i32_0 : i32, i32
  }
  func.func @transform_3(%arg0: i32) -> (i32, i32) {
    %c0_i32 = arith.constant 0 : i32
    %c0_i32_0 = arith.constant 0 : i32
    %c0_i32_1 = arith.constant 0 : i32
    return %c0_i32, %c0_i32_0 : i32, i32
  }
}

</mosaic_0001>

<bundles_post_ra>
// kernel: tpu_custom_call.1
= control target key start
LH: loop header
LB: loop body
LE: loop exit
PB: predicated region body
PF: predicated region fallthrough
CT: control target
= control target key end

     0   :  { %v3735_v0 = vmov 0.0|0.0   ;;  %vm3736_vm0 = vmmov 0   ;;  %v3737_v6 = vmov 0.0   ;;  %vm927_vm1 = vcmask 1043456   ;;  %s6265_s1 = inlined_call_operand.vmem [shape: f32[36,32], index: 1, kind: input, shape index: {}]   ;;  %s6266_s0 = inlined_call_operand.vmem [shape: f32[1800,36], index: 0, kind: input, shape index: {}]   ;;  %s6267_s2 = inlined_call_operand.vmem [shape: f32[1,32], index: 2, kind: input, shape index: {}]   ;;  %s6268_s3 = inlined_call_operand.vmem [shape: f32[1800,32], index: 3, kind: output, shape index: {}]  }
   0x1   :  { %3718 = vmatprep.subr.bf16.mxu0 %v3735_v0  ;;  %v239_v1 = vld [vmem:[%s6265_s1] sm:$0xff]  ;;  %v240_v2 = vld [vmem:[%s6265_s1 + $0x8] sm:$0xff]  ;;  %3724 = vmatprep.subr.bf16.mxu1 %v3735_v0  ;;  %v241_v3 = vld [vmem:[%s6265_s1 + $0x10] sm:$0xff]  ;;  %vm251_vm2 = vcmask 293888   ;;  %vm2346_vm3 = vcmask 261120  }
   0x2   :  { %v3719_v4 = vpack.c.bf16 %v240_v2, %v239_v1  ;;  %v242_v5 = vld [vmem:[%s6265_s1 + $0x18] sm:$0xff]  ;;  %3043 = vmatprep.mubr.msk.f32.mxu0 %vm3736_vm0, %v3737_v6  ;;  %3382 = vmatprep.mubr.msk.f32.mxu1 %vm3736_vm0, %v3737_v6  ;;  %v243_v8 = vld [vmem:[%s6265_s1 + $0x20] sm:$0xf]  ;;  %v127_v10 = vld [vmem:[%s6266_s0 + $0x388] sm:$0xff] }
   0x3   :  { %v3722_v7 = vpack.c.bf16 %v242_v5, %v241_v3  ;;  %v14_v9 = vld [vmem:[%s6266_s0] sm:$0xff]  ;;  %v15_v11 = vld [vmem:[%s6266_s0 + $0x8] sm:$0xff]  ;;  %v128_v12 = vld [vmem:[%s6266_s0 + $0x390] sm:$0xff] }
   0x4   :  { %3720 = vmatpush3.bf16.msra.mxu0 %v3719_v4  ;;  %3727 = vmatpush3.bf16.msra.mxu1 %v3719_v4  ;;  %v16_v13 = vld [vmem:[%s6266_s0 + $0x10] sm:$0xff]  ;;  %v129_v14 = vld [vmem:[%s6266_s0 + $0x398] sm:$0xff]  ;;  %v130_v16 = vld [vmem:[%s6266_s0 + $0x3a0] sm:$0xff] }
   0x5   :  { %3721 = vmatprep.subr.bf16.mxu0 %v3735_v0  ;;  %3725 = vmatprep.subr.bf16.mxu1 %v3735_v0  ;;  %v17_v15 = vld [vmem:[%s6266_s0 + $0x18] sm:$0xff]  ;;  %v18_v17 = vld [vmem:[%s6266_s0 + $0x20] sm:$0xff]  ;;  %v131_v18 = vld [vmem:[%s6266_s0 + $0x3a8] sm:$0xff] }
   0x6   :  { %v19_v19 = vld [vmem:[%s6266_s0 + $0x28] sm:$0xff]  ;;  %v132_v20 = vld [vmem:[%s6266_s0 + $0x3b0] sm:$0xff]  ;;  %v133_v22 = vld [vmem:[%s6266_s0 + $0x3b8] sm:$0xff] }
   0x7   :  { %v20_v21 = vld [vmem:[%s6266_s0 + $0x30] sm:$0xff]  ;;  %v21_v23 = vld [vmem:[%s6266_s0 + $0x38] sm:$0xff]  ;;  %v134_v24 = vld [vmem:[%s6266_s0 + $0x3c0] sm:$0xff] }
   0x8   :  { %3723 = vmatpush3.bf16.msra.mxu0 %v3722_v7  ;;  %3728 = vmatpush3.bf16.msra.mxu1 %v3722_v7  ;;  %v22_v25 = vld [vmem:[%s6266_s0 + $0x40] sm:$0xff]  ;;  %v135_v26 = vld [vmem:[%s6266_s0 + $0x3c8] sm:$0xff]  ;;  %v136_v28 = vld [vmem:[%s6266_s0 + $0x3d0] sm:$0xff] }
   0x9   :  { %3041 = vmatprep.subr.mxu0 %v3737_v6  ;;  %3726 = vmatprep.subr.mxu1 %v3737_v6  ;;  %v23_v27 = vld [vmem:[%s6266_s0 + $0x48] sm:$0xff]  ;;  %v24_v29 = vld [vmem:[%s6266_s0 + $0x50] sm:$0xff]  ;;  %v137_v30 = vld [vmem:[%s6266_s0 + $0x3d8] sm:$0xff] }
   0xa   :  { %v25_v31 = vld [vmem:[%s6266_s0 + $0x58] sm:$0xff]  ;;  %v138_v32 = vld [vmem:[%s6266_s0 + $0x3e0] sm:$0xff]  ;;  %v139_v34 = vld [vmem:[%s6266_s0 + $0x3e8] sm:$0xff] }
   0xb   :  { %v26_v33 = vld [vmem:[%s6266_s0 + $0x60] sm:$0xff]  ;;  %v27_v35 = vld [vmem:[%s6266_s0 + $0x68] sm:$0xff]  ;;  %v140_v36 = vld [vmem:[%s6266_s0 + $0x3f0] sm:$0xff] }
   0xc   :  { %3042 = vmatpush3.msk.msra.mxu0 %vm927_vm1, %v243_v8  ;;  %3729 = vmatpush3.msk.msra.mxu1 %vm927_vm1, %v243_v8  ;;  %v28_v37 = vld [vmem:[%s6266_s0 + $0x70] sm:$0xff]  ;;  %v141_v38 = vld [vmem:[%s6266_s0 + $0x3f8] sm:$0xff]  ;;  %v142_v40 = vld [vmem:[%s6266_s0 + $0x400] sm:$0xff] }
   0xd   :  { %3044 = vmatmul.mubr.msk.f32.vlgmr.msra.gmra.mrb[0].mxu0 %vm251_vm2, %v14_v9  ;;  %3383 = vmatmul.mubr.msk.f32.vlgmr.msra.gmra.mrb[0].mxu1 %vm251_vm2, %v127_v10  ;;  %v29_v39 = vld [vmem:[%s6266_s0 + $0x78] sm:$0xff]  ;;  %v30_v41 = vld [vmem:[%s6266_s0 + $0x80] sm:$0xff]  ;;  %v143_v42 = vld [vmem:[%s6266_s0 + $0x408] sm:$0xff] }
   0xe   :  { %3046 = vmatprep.mubr.msk.f32.mxu0 %vm3736_vm0, %v3737_v6  ;;  %3385 = vmatprep.mubr.msk.f32.mxu1 %vm3736_vm0, %v3737_v6  ;;  %v31_v43 = vld [vmem:[%s6266_s0 + $0x88] sm:$0xff]  ;;  %v144_v44 = vld [vmem:[%s6266_s0 + $0x410] sm:$0xff]  ;;  %v145_v46 = vld [vmem:[%s6266_s0 + $0x418] sm:$0xff] }
   0xf   :  { %v32_v45 = vld [vmem:[%s6266_s0 + $0x90] sm:$0xff]  ;;  %v33_v47 = vld [vmem:[%s6266_s0 + $0x98] sm:$0xff]  ;;  %v146_v48 = vld [vmem:[%s6266_s0 + $0x420] sm:$0xff] }
  0x10   :  { %v34_v49 = vld [vmem:[%s6266_s0 + $0xa0] sm:$0xff]  ;;  %v147_v50 = vld [vmem:[%s6266_s0 + $0x428] sm:$0xff]  ;;  %v148_v52 = vld [vmem:[%s6266_s0 + $0x430] sm:$0xff] }
  0x11   :  { %3047 = vmatmul.mubr.msk.f32.gmra.mrb[2].mxu0 %vm251_vm2, %v15_v11  ;;  %3386 = vmatmul.mubr.msk.f32.gmra.mrb[2].mxu1 %vm251_vm2, %v128_v12  ;;  %v35_v51 = vld [vmem:[%s6266_s0 + $0xa8] sm:$0xff]  ;;  %v36_v53 = vld [vmem:[%s6266_s0 + $0xb0] sm:$0xff]  ;;  %v149_v54 = vld [vmem:[%s6266_s0 + $0x438] sm:$0xff] }
  0x12   :  { %3049 = vmatprep.mubr.msk.f32.mxu0 %vm3736_vm0, %v3737_v6  ;;  %3388 = vmatprep.mubr.msk.f32.mxu1 %vm3736_vm0, %v3737_v6  ;;  %v37_v55 = vld [vmem:[%s6266_s0 + $0xb8] sm:$0xff]  ;;  %v150_v56 = vld [vmem:[%s6266_s0 + $0x440] sm:$0xff]  ;;  %v151_v58 = vld [vmem:[%s6266_s0 + $0x448] sm:$0xff] }
  0x13   :  { %v38_v57 = vld [vmem:[%s6266_s0 + $0xc0] sm:$0xff]  ;;  %v39_v59 = vld [vmem:[%s6266_s0 + $0xc8] sm:$0xff]  ;;  %v152_v60 = vld [vmem:[%s6266_s0 + $0x450] sm:$0xff] }
  0x14   :  { %v40_v61 = vld [vmem:[%s6266_s0 + $0xd0] sm:$0xff]  ;;  %v153_v62 = vld [vmem:[%s6266_s0 + $0x458] sm:$0xff]  ;;  %v154_v0 = vld [vmem:[%s6266_s0 + $0x460] sm:$0xff] }
  0x15   :  { %3050 = vmatmul.mubr.msk.f32.gmra.mrb[4].mxu0 %vm251_vm2, %v16_v13  ;;  %3389 = vmatmul.mubr.msk.f32.gmra.mrb[4].mxu1 %vm251_vm2, %v129_v14  ;;  %v41_v63 = vld [vmem:[%s6266_s0 + $0xd8] sm:$0xff]  ;;  %v42_v1 = vld [vmem:[%s6266_s0 + $0xe0] sm:$0xff]  ;;  %v155_v2 = vld [vmem:[%s6266_s0 + $0x468] sm:$0xff] }
  0x16   :  { %3052 = vmatprep.mubr.msk.f32.mxu0 %vm3736_vm0, %v3737_v6  ;;  %3391 = vmatprep.mubr.msk.f32.mxu1 %vm3736_vm0, %v3737_v6  ;;  %v43_v3 = vld [vmem:[%s6266_s0 + $0xe8] sm:$0xff]  ;;  %v156_v4 = vld [vmem:[%s6266_s0 + $0x470] sm:$0xff]  ;;  %v157_v7 = vld [vmem:[%s6266_s0 + $0x478] sm:$0xff] }
  0x17   :  { %v44_v5 = vld [vmem:[%s6266_s0 + $0xf0] sm:$0xff]  ;;  %v45_v8 = vld [vmem:[%s6266_s0 + $0xf8] sm:$0xff]  ;;  %v158_v9 = vld [vmem:[%s6266_s0 + $0x480] sm:$0xff] }
  0x18   :  { %v46_v10 = vld [vmem:[%s6266_s0 + $0x100] sm:$0xff]  ;;  %v159_v11 = vld [vmem:[%s6266_s0 + $0x488] sm:$0xff]  ;;  %v160_v13 = vld [vmem:[%s6266_s0 + $0x490] sm:$0xff] }
  0x19   :  { %3053 = vmatmul.mubr.msk.f32.gmra.mrb[6].mxu0 %vm251_vm2, %v17_v15  ;;  %3392 = vmatmul.mubr.msk.f32.gmra.mrb[6].mxu1 %vm251_vm2, %v130_v16  ;;  %v47_v12 = vld [vmem:[%s6266_s0 + $0x108] sm:$0xff]  ;;  %v48_v14 = vld [vmem:[%s6266_s0 + $0x110] sm:$0xff]  ;;  %v161_v15 = vld [vmem:[%s6266_s0 + $0x498] sm:$0xff] }
  0x1a   :  { %3055 = vmatprep.mubr.msk.f32.mxu0 %vm3736_vm0, %v3737_v6  ;;  %3394 = vmatprep.mubr.msk.f32.mxu1 %vm3736_vm0, %v3737_v6  ;;  %v49_v16 = vld [vmem:[%s6266_s0 + $0x118] sm:$0xff] }
  0x1d   :  { %3056 = vmatmul.mubr.msk.f32.gmra.mrb[8].mxu0 %vm251_vm2, %v18_v17  ;;  %3395 = vmatmul.mubr.msk.f32.gmra.mrb[8].mxu1 %vm251_vm2, %v131_v18  ;;  %v162_v17 = vld [vmem:[%s6266_s0 + $0x4a0] sm:$0xff] }
  0x1e   :  { %3058 = vmatprep.mubr.msk.f32.mxu0 %vm3736_vm0, %v3737_v6  ;;  %3397 = vmatprep.mubr.msk.f32.mxu1 %vm3736_vm0, %v3737_v6  ;;  %v50_v18 = vld [vmem:[%s6266_s0 + $0x120] sm:$0xff] }
  0x21   :  { %3059 = vmatmul.mubr.msk.f32.gmra.mrb[10].mxu0 %vm251_vm2, %v19_v19  ;;  %3398 = vmatmul.mubr.msk.f32.gmra.mrb[10].mxu1 %vm251_vm2, %v132_v20  ;;  %v163_v19 = vld [vmem:[%s6266_s0 + $0x4a8] sm:$0xff] }
  0x22   :  { %3061 = vmatprep.mubr.msk.f32.mxu0 %vm3736_vm0, %v3737_v6  ;;  %3400 = vmatprep.mubr.msk.f32.mxu1 %vm3736_vm0, %v3737_v6  ;;  %v51_v20 = vld [vmem:[%s6266_s0 + $0x128] sm:$0xff] }
  0x25   :  { %3062 = vmatmul.mubr.msk.f32.gmra.mrb[12].mxu0 %vm251_vm2, %v20_v21  ;;  %3401 = vmatmul.mubr.msk.f32.gmra.mrb[12].mxu1 %vm251_vm2, %v133_v22  ;;  %v164_v21 = vld [vmem:[%s6266_s0 + $0x4b0] sm:$0xff] }
  0x26   :  { %3064 = vmatprep.mubr.msk.f32.mxu0 %vm3736_vm0, %v3737_v6  ;;  %3403 = vmatprep.mubr.msk.f32.mxu1 %vm3736_vm0, %v3737_v6  ;;  %v52_v22 = vld [vmem:[%s6266_s0 + $0x130] sm:$0xff] }
  0x29   :  { %3065 = vmatmul.mubr.msk.f32.gmra.mrb[14].mxu0 %vm251_vm2, %v21_v23  ;;  %3404 = vmatmul.mubr.msk.f32.gmra.mrb[14].mxu1 %vm251_vm2, %v134_v24  ;;  %v165_v23 = vld [vmem:[%s6266_s0 + $0x4b8] sm:$0xff] }
  0x2a   :  { %3067 = vmatprep.mubr.msk.f32.mxu0 %vm3736_vm0, %v3737_v6  ;;  %3406 = vmatprep.mubr.msk.f32.mxu1 %vm3736_vm0, %v3737_v6  ;;  %v53_v24 = vld [vmem:[%s6266_s0 + $0x138] sm:$0xff] }
  0x2d   :  { %3068 = vmatmul.mubr.msk.f32.gmra.mrb[16].mxu0 %vm251_vm2, %v22_v25  ;;  %3407 = vmatmul.mubr.msk.f32.gmra.mrb[16].mxu1 %vm251_vm2, %v135_v26  ;;  %v166_v25 = vld [vmem:[%s6266_s0 + $0x4c0] sm:$0xff] }
  0x2e   :  { %3070 = vmatprep.mubr.msk.f32.mxu0 %vm3736_vm0, %v3737_v6  ;;  %3409 = vmatprep.mubr.msk.f32.mxu1 %vm3736_vm0, %v3737_v6  ;;  %v54_v26 = vld [vmem:[%s6266_s0 + $0x140] sm:$0xff] }
  0x31   :  { %3071 = vmatmul.mubr.msk.f32.gmra.mrb[18].mxu0 %vm251_vm2, %v23_v27  ;;  %3410 = vmatmul.mubr.msk.f32.gmra.mrb[18].mxu1 %vm251_vm2, %v136_v28  ;;  %v167_v27 = vld [vmem:[%s6266_s0 + $0x4c8] sm:$0xff] }
  0x32   :  { %3073 = vmatprep.mubr.msk.f32.mxu0 %vm3736_vm0, %v3737_v6  ;;  %3412 = vmatprep.mubr.msk.f32.mxu1 %vm3736_vm0, %v3737_v6  ;;  %v55_v28 = vld [vmem:[%s6266_s0 + $0x148] sm:$0xff] }
  0x35   :  { %3074 = vmatmul.mubr.msk.f32.gmra.mrb[20].mxu0 %vm251_vm2, %v24_v29  ;;  %3413 = vmatmul.mubr.msk.f32.gmra.mrb[20].mxu1 %vm251_vm2, %v137_v30  ;;  %v168_v29 = vld [vmem:[%s6266_s0 + $0x4d0] sm:$0xff] }
  0x36   :  { %3076 = vmatprep.mubr.msk.f32.mxu0 %vm3736_vm0, %v3737_v6  ;;  %3415 = vmatprep.mubr.msk.f32.mxu1 %vm3736_vm0, %v3737_v6  ;;  %v56_v30 = vld [vmem:[%s6266_s0 + $0x150] sm:$0xff] }
  0x39   :  { %3077 = vmatmul.mubr.msk.f32.gmra.mrb[22].mxu0 %vm251_vm2, %v25_v31  ;;  %3416 = vmatmul.mubr.msk.f32.gmra.mrb[22].mxu1 %vm251_vm2, %v138_v32  ;;  %v169_v31 = vld [vmem:[%s6266_s0 + $0x4d8] sm:$0xff] }
  0x3a   :  { %3079 = vmatprep.mubr.msk.f32.mxu0 %vm3736_vm0, %v3737_v6  ;;  %3418 = vmatprep.mubr.msk.f32.mxu1 %vm3736_vm0, %v3737_v6  ;;  %v57_v32 = vld [vmem:[%s6266_s0 + $0x158] sm:$0xff] }
  0x3d   :  { %3080 = vmatmul.mubr.msk.f32.gmra.mrb[24].mxu0 %vm251_vm2, %v26_v33  ;;  %3419 = vmatmul.mubr.msk.f32.gmra.mrb[24].mxu1 %vm251_vm2, %v139_v34  ;;  %v170_v33 = vld [vmem:[%s6266_s0 + $0x4e0] sm:$0xff] }
  0x3e   :  { %3082 = vmatprep.mubr.msk.f32.mxu0 %vm3736_vm0, %v3737_v6  ;;  %3421 = vmatprep.mubr.msk.f32.mxu1 %vm3736_vm0, %v3737_v6  ;;  %v58_v34 = vld [vmem:[%s6266_s0 + $0x160] sm:$0xff] }
  0x41   :  { %3083 = vmatmul.mubr.msk.f32.gmra.mrb[26].mxu0 %vm251_vm2, %v27_v35  ;;  %3422 = vmatmul.mubr.msk.f32.gmra.mrb[26].mxu1 %vm251_vm2, %v140_v36  ;;  %v171_v35 = vld [vmem:[%s6266_s0 + $0x4e8] sm:$0xff] }
  0x42   :  { %3085 = vmatprep.mubr.msk.f32.mxu0 %vm3736_vm0, %v3737_v6  ;;  %3424 = vmatprep.mubr.msk.f32.mxu1 %vm3736_vm0, %v3737_v6  ;;  %v59_v36 = vld [vmem:[%s6266_s0 + $0x168] sm:$0xff] }
  0x45   :  { %3086 = vmatmul.mubr.msk.f32.gmra.mrb[28].mxu0 %vm251_vm2, %v28_v37  ;;  %3425 = vmatmul.mubr.msk.f32.gmra.mrb[28].mxu1 %vm251_vm2, %v141_v38  ;;  %v172_v37 = vld [vmem:[%s6266_s0 + $0x4f0] sm:$0xff] }
  0x46   :  { %3088 = vmatprep.mubr.msk.f32.mxu0 %vm3736_vm0, %v3737_v6  ;;  %3427 = vmatprep.mubr.msk.f32.mxu1 %vm3736_vm0, %v3737_v6  ;;  %v60_v38 = vld [vmem:[%s6266_s0 + $0x170] sm:$0xff] }
  0x49   :  { %3089 = vmatmul.mubr.msk.f32.gmra.mrb[30].mxu0 %vm251_vm2, %v29_v39  ;;  %3428 = vmatmul.mubr.msk.f32.gmra.mrb[30].mxu1 %vm251_vm2, %v142_v40  ;;  %v173_v39 = vld [vmem:[%s6266_s0 + $0x4f8] sm:$0xff] }
  0x4a   :  { %3091 = vmatprep.mubr.msk.f32.mxu0 %vm3736_vm0, %v3737_v6  ;;  %3430 = vmatprep.mubr.msk.f32.mxu1 %vm3736_vm0, %v3737_v6  ;;  %v61_v40 = vld [vmem:[%s6266_s0 + $0x178] sm:$0xff] }
  0x4d   :  { %3092 = vmatmul.mubr.msk.f32.gmra.mrb[32].mxu0 %vm251_vm2, %v30_v41  ;;  %3431 = vmatmul.mubr.msk.f32.gmra.mrb[32].mxu1 %vm251_vm2, %v143_v42  ;;  %v174_v41 = vld [vmem:[%s6266_s0 + $0x500] sm:$0xff] }
  0x4e   :  { %3094 = vmatprep.mubr.msk.f32.mxu0 %vm3736_vm0, %v3737_v6  ;;  %3433 = vmatprep.mubr.msk.f32.mxu1 %vm3736_vm0, %v3737_v6  ;;  %v62_v42 = vld [vmem:[%s6266_s0 + $0x180] sm:$0xff] }
  0x51   :  { %3095 = vmatmul.mubr.msk.f32.gmra.mrb[34].mxu0 %vm251_vm2, %v31_v43  ;;  %3434 = vmatmul.mubr.msk.f32.gmra.mrb[34].mxu1 %vm251_vm2, %v144_v44  ;;  %v175_v43 = vld [vmem:[%s6266_s0 + $0x508] sm:$0xff] }
  0x52   :  { %3097 = vmatprep.mubr.msk.f32.mxu0 %vm3736_vm0, %v3737_v6  ;;  %3436 = vmatprep.mubr.msk.f32.mxu1 %vm3736_vm0, %v3737_v6  ;;  %v63_v44 = vld [vmem:[%s6266_s0 + $0x188] sm:$0xff] }
  0x55   :  { %3098 = vmatmul.mubr.msk.f32.gmra.mrb[36].mxu0 %vm251_vm2, %v32_v45  ;;  %3437 = vmatmul.mubr.msk.f32.gmra.mrb[36].mxu1 %vm251_vm2, %v145_v46  ;;  %v176_v45 = vld [vmem:[%s6266_s0 + $0x510] sm:$0xff] }
  0x56   :  { %3100 = vmatprep.mubr.msk.f32.mxu0 %vm3736_vm0, %v3737_v6  ;;  %3439 = vmatprep.mubr.msk.f32.mxu1 %vm3736_vm0, %v3737_v6  ;;  %v64_v46 = vld [vmem:[%s6266_s0 + $0x190] sm:$0xff] }
  0x59   :  { %3101 = vmatmul.mubr.msk.f32.gmra.mrb[38].mxu0 %vm251_vm2, %v33_v47  ;;  %3440 = vmatmul.mubr.msk.f32.gmra.mrb[38].mxu1 %vm251_vm2, %v146_v48  ;;  %v177_v47 = vld [vmem:[%s6266_s0 + $0x518] sm:$0xff] }
  0x5a   :  { %3103 = vmatprep.mubr.msk.f32.mxu0 %vm3736_vm0, %v3737_v6  ;;  %3442 = vmatprep.mubr.msk.f32.mxu1 %vm3736_vm0, %v3737_v6  ;;  %v65_v48 = vld [vmem:[%s6266_s0 + $0x198] sm:$0xff] }
  0x5d   :  { %3104 = vmatmul.mubr.msk.f32.gmra.mrb[40].mxu0 %vm251_vm2, %v34_v49  ;;  %3443 = vmatmul.mubr.msk.f32.gmra.mrb[40].mxu1 %vm251_vm2, %v147_v50  ;;  %v178_v49 = vld [vmem:[%s6266_s0 + $0x520] sm:$0xff] }
  0x5e   :  { %3106 = vmatprep.mubr.msk.f32.mxu0 %vm3736_vm0, %v3737_v6  ;;  %3445 = vmatprep.mubr.msk.f32.mxu1 %vm3736_vm0, %v3737_v6  ;;  %v66_v50 = vld [vmem:[%s6266_s0 + $0x1a0] sm:$0xff] }
  0x61   :  { %3107 = vmatmul.mubr.msk.f32.gmra.mrb[42].mxu0 %vm251_vm2, %v35_v51  ;;  %3446 = vmatmul.mubr.msk.f32.gmra.mrb[42].mxu1 %vm251_vm2, %v148_v52  ;;  %v179_v51 = vld [vmem:[%s6266_s0 + $0x528] sm:$0xff]  ;;  %v4414_v52 = vld [vmem:[%s6267_s2] ss:$0 sm:$0xff] }
  0x62   :  { %3109 = vmatprep.mubr.msk.f32.mxu0 %vm3736_vm0, %v3737_v6  ;;  %3448 = vmatprep.mubr.msk.f32.mxu1 %vm3736_vm0, %v3737_v6 }
  0x65   :  { %3110 = vmatmul.mubr.msk.f32.gmra.mrb[44].mxu0 %vm251_vm2, %v36_v53  ;;  %3449 = vmatmul.mubr.msk.f32.gmra.mrb[44].mxu1 %vm251_vm2, %v149_v54  ;;  %v67_v53 = vld [vmem:[%s6266_s0 + $0x1a8] sm:$0xff]  ;;  %v180_v54 = vld [vmem:[%s6266_s0 + $0x530] sm:$0xff] }
  0x66   :  { %3112 = vmatprep.mubr.msk.f32.mxu0 %vm3736_vm0, %v3737_v6  ;;  %3451 = vmatprep.mubr.msk.f32.mxu1 %vm3736_vm0, %v3737_v6 }
  0x69   :  { %3113 = vmatmul.mubr.msk.f32.gmra.mrb[46].mxu0 %vm251_vm2, %v37_v55  ;;  %3452 = vmatmul.mubr.msk.f32.gmra.mrb[46].mxu1 %vm251_vm2, %v150_v56 }
  0x6a   :  { %3115 = vmatprep.mubr.msk.f32.mxu0 %vm3736_vm0, %v3737_v6  ;;  %3454 = vmatprep.mubr.msk.f32.mxu1 %vm3736_vm0, %v3737_v6 }
  0x6d   :  { %3116 = vmatmul.mubr.msk.f32.gmra.mrb[48].mxu0 %vm251_vm2, %v38_v57  ;;  %3455 = vmatmul.mubr.msk.f32.gmra.mrb[48].mxu1 %vm251_vm2, %v151_v58 }
  0x6e   :  { %3118 = vmatprep.mubr.msk.f32.mxu0 %vm3736_vm0, %v3737_v6  ;;  %3457 = vmatprep.mubr.msk.f32.mxu1 %vm3736_vm0, %v3737_v6 }
  0x71   :  { %3119 = vmatmul.mubr.msk.f32.gmra.mrb[50].mxu0 %vm251_vm2, %v39_v59  ;;  %3458 = vmatmul.mubr.msk.f32.gmra.mrb[50].mxu1 %vm251_vm2, %v152_v60 }
  0x72   :  { %3121 = vmatprep.mubr.msk.f32.mxu0 %vm3736_vm0, %v3737_v6  ;;  %3460 = vmatprep.mubr.msk.f32.mxu1 %vm3736_vm0, %v3737_v6 }
  0x75   :  { %3122 = vmatmul.mubr.msk.f32.gmra.mrb[52].mxu0 %vm251_vm2, %v40_v61  ;;  %3461 = vmatmul.mubr.msk.f32.gmra.mrb[52].mxu1 %vm251_vm2, %v153_v62  ;;  %v68_v61 = vld [vmem:[%s6266_s0 + $0x1b0] sm:$0xff]  ;;  %v181_v62 = vld [vmem:[%s6266_s0 + $0x538] sm:$0xff] }
  0x76   :  { %3124 = vmatprep.mubr.msk.f32.mxu0 %vm3736_vm0, %v3737_v6  ;;  %3463 = vmatprep.mubr.msk.f32.mxu1 %vm3736_vm0, %v3737_v6 }
  0x79   :  { %3125 = vmatmul.mubr.msk.f32.gmra.mrb[54].mxu0 %vm251_vm2, %v41_v63  ;;  %3464 = vmatmul.mubr.msk.f32.gmra.mrb[54].mxu1 %vm251_vm2, %v154_v0 }
  0x7a   :  { %3127 = vmatprep.mubr.msk.f32.mxu0 %vm3736_vm0, %v3737_v6  ;;  %3466 = vmatprep.mubr.msk.f32.mxu1 %vm3736_vm0, %v3737_v6 }
  0x7d   :  { %3128 = vmatmul.mubr.msk.f32.gmra.mrb[56].mxu0 %vm251_vm2, %v42_v1  ;;  %3467 = vmatmul.mubr.msk.f32.gmra.mrb[56].mxu1 %vm251_vm2, %v155_v2 }
  0x7e   :  { %3130 = vmatprep.mubr.msk.f32.mxu0 %vm3736_vm0, %v3737_v6  ;;  %3469 = vmatprep.mubr.msk.f32.mxu1 %vm3736_vm0, %v3737_v6 }
  0x81   :  { %3131 = vmatmul.mubr.msk.f32.gmra.mrb[58].mxu0 %vm251_vm2, %v43_v3  ;;  %3470 = vmatmul.mubr.msk.f32.gmra.mrb[58].mxu1 %vm251_vm2, %v156_v4 }
  0x82   :  { %3133 = vmatprep.mubr.msk.f32.mxu0 %vm3736_vm0, %v3737_v6  ;;  %3472 = vmatprep.mubr.msk.f32.mxu1 %vm3736_vm0, %v3737_v6 }
  0x85   :  { %3134 = vmatmul.mubr.msk.f32.gmra.mrb[60].mxu0 %vm251_vm2, %v44_v5  ;;  %3473 = vmatmul.mubr.msk.f32.gmra.mrb[60].mxu1 %vm251_vm2, %v157_v7 }
  0x86   :  { %3136 = vmatprep.mubr.msk.f32.mxu0 %vm3736_vm0, %v3737_v6  ;;  %3475 = vmatprep.mubr.msk.f32.mxu1 %vm3736_vm0, %v3737_v6 }
  0x89   :  { %3137 = vmatmul.mubr.msk.f32.gmra.mrb[62].mxu0 %vm251_vm2, %v45_v8  ;;  %3476 = vmatmul.mubr.msk.f32.gmra.mrb[62].mxu1 %vm251_vm2, %v158_v9  ;;  %v69_v8 = vld [vmem:[%s6266_s0 + $0x1b8] sm:$0xff]  ;;  %v182_v9 = vld [vmem:[%s6266_s0 + $0x540] sm:$0xff] }
  0x8a   :  { %3139 = vmatprep.mubr.msk.f32.mxu0 %vm3736_vm0, %v3737_v6  ;;  %3478 = vmatprep.mubr.msk.f32.mxu1 %vm3736_vm0, %v3737_v6 }
  0x8d   :  { %3140 = vmatmul.mubr.msk.f32.gmra.mrb[64].mxu0 %vm251_vm2, %v46_v10  ;;  %3479 = vmatmul.mubr.msk.f32.gmra.mrb[64].mxu1 %vm251_vm2, %v159_v11 }
  0x8e   :  { %3142 = vmatprep.mubr.msk.f32.mxu0 %vm3736_vm0, %v3737_v6  ;;  %3481 = vmatprep.mubr.msk.f32.mxu1 %vm3736_vm0, %v3737_v6 }
  0x91   :  { %3143 = vmatmul.mubr.msk.f32.gmra.mrb[66].mxu0 %vm251_vm2, %v47_v12  ;;  %3482 = vmatmul.mubr.msk.f32.gmra.mrb[66].mxu1 %vm251_vm2, %v160_v13 }
  0x92   :  { %3145 = vmatprep.mubr.msk.f32.mxu0 %vm3736_vm0, %v3737_v6  ;;  %3484 = vmatprep.mubr.msk.f32.mxu1 %vm3736_vm0, %v3737_v6 }
  0x95   :  { %3146 = vmatmul.mubr.msk.f32.gmra.mrb[68].mxu0 %vm251_vm2, %v48_v14  ;;  %3485 = vmatmul.mubr.msk.f32.gmra.mrb[68].mxu1 %vm251_vm2, %v161_v15 }
  0x96   :  { %3148 = vmatprep.mubr.msk.f32.mxu0 %vm3736_vm0, %v3737_v6  ;;  %3487 = vmatprep.mubr.msk.f32.mxu1 %vm3736_vm0, %v3737_v6 }
  0x99   :  { %3149 = vmatmul.mubr.msk.f32.gmra.mrb[70].mxu0 %vm251_vm2, %v49_v16  ;;  %3488 = vmatmul.mubr.msk.f32.gmra.mrb[70].mxu1 %vm251_vm2, %v162_v17 }
  0x9a   :  { %3151 = vmatprep.mubr.msk.f32.mxu0 %vm3736_vm0, %v3737_v6  ;;  %3490 = vmatprep.mubr.msk.f32.mxu1 %vm3736_vm0, %v3737_v6 }
  0x9d   :  { %3152 = vmatmul.mubr.msk.f32.gmra.mrb[72].mxu0 %vm251_vm2, %v50_v18  ;;  %3491 = vmatmul.mubr.msk.f32.gmra.mrb[72].mxu1 %vm251_vm2, %v163_v19  ;;  %v70_v18 = vld [vmem:[%s6266_s0 + $0x1c0] sm:$0xff]  ;;  %v183_v19 = vld [vmem:[%s6266_s0 + $0x548] sm:$0xff] }
  0x9e   :  { %3154 = vmatprep.mubr.msk.f32.mxu0 %vm3736_vm0, %v3737_v6  ;;  %3493 = vmatprep.mubr.msk.f32.mxu1 %vm3736_vm0, %v3737_v6 }
  0xa1   :  { %3155 = vmatmul.mubr.msk.f32.gmra.mrb[74].mxu0 %vm251_vm2, %v51_v20  ;;  %3494 = vmatmul.mubr.msk.f32.gmra.mrb[74].mxu1 %vm251_vm2, %v164_v21 }
  0xa2   :  { %3157 = vmatprep.mubr.msk.f32.mxu0 %vm3736_vm0, %v3737_v6  ;;  %3496 = vmatprep.mubr.msk.f32.mxu1 %vm3736_vm0, %v3737_v6 }
  0xa5   :  { %3158 = vmatmul.mubr.msk.f32.gmra.mrb[76].mxu0 %vm251_vm2, %v52_v22  ;;  %3497 = vmatmul.mubr.msk.f32.gmra.mrb[76].mxu1 %vm251_vm2, %v165_v23 }
  0xa6   :  { %3160 = vmatprep.mubr.msk.f32.mxu0 %vm3736_vm0, %v3737_v6  ;;  %3499 = vmatprep.mubr.msk.f32.mxu1 %vm3736_vm0, %v3737_v6 }
  0xa9   :  { %3161 = vmatmul.mubr.msk.f32.gmra.mrb[78].mxu0 %vm251_vm2, %v53_v24  ;;  %3500 = vmatmul.mubr.msk.f32.gmra.mrb[78].mxu1 %vm251_vm2, %v166_v25 }
  0xaa   :  { %3163 = vmatprep.mubr.msk.f32.mxu0 %vm3736_vm0, %v3737_v6  ;;  %3502 = vmatprep.mubr.msk.f32.mxu1 %vm3736_vm0, %v3737_v6 }
  0xad   :  { %3164 = vmatmul.mubr.msk.f32.gmra.mrb[80].mxu0 %vm251_vm2, %v54_v26  ;;  %3503 = vmatmul.mubr.msk.f32.gmra.mrb[80].mxu1 %vm251_vm2, %v167_v27 }
  0xae   :  { %3166 = vmatprep.mubr.msk.f32.mxu0 %vm3736_vm0, %v3737_v6  ;;  %3505 = vmatprep.mubr.msk.f32.mxu1 %vm3736_vm0, %v3737_v6 }
  0xb1   :  { %3167 = vmatmul.mubr.msk.f32.gmra.mrb[82].mxu0 %vm251_vm2, %v55_v28  ;;  %3506 = vmatmul.mubr.msk.f32.gmra.mrb[82].mxu1 %vm251_vm2, %v168_v29  ;;  %v71_v28 = vld [vmem:[%s6266_s0 + $0x1c8] sm:$0xff]  ;;  %v184_v29 = vld [vmem:[%s6266_s0 + $0x550] sm:$0xff] }
  0xb2   :  { %3169 = vmatprep.mubr.msk.f32.mxu0 %vm3736_vm0, %v3737_v6  ;;  %3508 = vmatprep.mubr.msk.f32.mxu1 %vm3736_vm0, %v3737_v6 }
  0xb5   :  { %3170 = vmatmul.mubr.msk.f32.gmra.mrb[84].mxu0 %vm251_vm2, %v56_v30  ;;  %3509 = vmatmul.mubr.msk.f32.gmra.mrb[84].mxu1 %vm251_vm2, %v169_v31 }
  0xb6   :  { %3172 = vmatprep.mubr.msk.f32.mxu0 %vm3736_vm0, %v3737_v6  ;;  %3511 = vmatprep.mubr.msk.f32.mxu1 %vm3736_vm0, %v3737_v6 }
  0xb9   :  { %3173 = vmatmul.mubr.msk.f32.gmra.mrb[86].mxu0 %vm251_vm2, %v57_v32  ;;  %3512 = vmatmul.mubr.msk.f32.gmra.mrb[86].mxu1 %vm251_vm2, %v170_v33 }
  0xba   :  { %3175 = vmatprep.mubr.msk.f32.mxu0 %vm3736_vm0, %v3737_v6  ;;  %3514 = vmatprep.mubr.msk.f32.mxu1 %vm3736_vm0, %v3737_v6 }
  0xbd   :  { %3176 = vmatmul.mubr.msk.f32.gmra.mrb[88].mxu0 %vm251_vm2, %v58_v34  ;;  %3515 = vmatmul.mubr.msk.f32.gmra.mrb[88].mxu1 %vm251_vm2, %v171_v35 }
  0xbe   :  { %3178 = vmatprep.mubr.msk.f32.mxu0 %vm3736_vm0, %v3737_v6  ;;  %3517 = vmatprep.mubr.msk.f32.mxu1 %vm3736_vm0, %v3737_v6 }
  0xc1   :  { %3179 = vmatmul.mubr.msk.f32.gmra.mrb[90].mxu0 %vm251_vm2, %v59_v36  ;;  %3518 = vmatmul.mubr.msk.f32.gmra.mrb[90].mxu1 %vm251_vm2, %v172_v37 }
  0xc2   :  { %3181 = vmatprep.mubr.msk.f32.mxu0 %vm3736_vm0, %v3737_v6  ;;  %3520 = vmatprep.mubr.msk.f32.mxu1 %vm3736_vm0, %v3737_v6 }
  0xc5   :  { %3182 = vmatmul.mubr.msk.f32.gmra.mrb[92].mxu0 %vm251_vm2, %v60_v38  ;;  %3521 = vmatmul.mubr.msk.f32.gmra.mrb[92].mxu1 %vm251_vm2, %v173_v39  ;;  %v72_v38 = vld [vmem:[%s6266_s0 + $0x1d0] sm:$0xff]  ;;  %v185_v39 = vld [vmem:[%s6266_s0 + $0x558] sm:$0xff] }
  0xc6   :  { %3184 = vmatprep.mubr.msk.f32.mxu0 %vm3736_vm0, %v3737_v6  ;;  %3523 = vmatprep.mubr.msk.f32.mxu1 %vm3736_vm0, %v3737_v6 }
  0xc9   :  { %3185 = vmatmul.mubr.msk.f32.gmra.mrb[94].mxu0 %vm251_vm2, %v61_v40  ;;  %3524 = vmatmul.mubr.msk.f32.gmra.mrb[94].mxu1 %vm251_vm2, %v174_v41 }
  0xca   :  { %3187 = vmatprep.mubr.msk.f32.mxu0 %vm3736_vm0, %v3737_v6  ;;  %3526 = vmatprep.mubr.msk.f32.mxu1 %vm3736_vm0, %v3737_v6 }
  0xcd   :  { %3188 = vmatmul.mubr.msk.f32.gmra.mrb[96].mxu0 %vm251_vm2, %v62_v42  ;;  %3527 = vmatmul.mubr.msk.f32.gmra.mrb[96].mxu1 %vm251_vm2, %v175_v43 }
  0xce   :  { %3190 = vmatprep.mubr.msk.f32.mxu0 %vm3736_vm0, %v3737_v6  ;;  %3529 = vmatprep.mubr.msk.f32.mxu1 %vm3736_vm0, %v3737_v6 }
  0xd1   :  { %3191 = vmatmul.mubr.msk.f32.gmra.mrb[98].mxu0 %vm251_vm2, %v63_v44  ;;  %3530 = vmatmul.mubr.msk.f32.gmra.mrb[98].mxu1 %vm251_vm2, %v176_v45 }
  0xd2   :  { %3193 = vmatprep.mubr.msk.f32.mxu0 %vm3736_vm0, %v3737_v6  ;;  %3532 = vmatprep.mubr.msk.f32.mxu1 %vm3736_vm0, %v3737_v6 }
  0xd5   :  { %3194 = vmatmul.mubr.msk.f32.gmra.mrb[100].mxu0 %vm251_vm2, %v64_v46  ;;  %3533 = vmatmul.mubr.msk.f32.gmra.mrb[100].mxu1 %vm251_vm2, %v177_v47 }
  0xd6   :  { %3196 = vmatprep.mubr.msk.f32.mxu0 %vm3736_vm0, %v3737_v6  ;;  %3535 = vmatprep.mubr.msk.f32.mxu1 %vm3736_vm0, %v3737_v6 }
  0xd9   :  { %3197 = vmatmul.mubr.msk.f32.gmra.mrb[102].mxu0 %vm251_vm2, %v65_v48  ;;  %3536 = vmatmul.mubr.msk.f32.gmra.mrb[102].mxu1 %vm251_vm2, %v178_v49  ;;  %v73_v48 = vld [vmem:[%s6266_s0 + $0x1d8] sm:$0xff]  ;;  %v186_v49 = vld [vmem:[%s6266_s0 + $0x560] sm:$0xff] }
  0xda   :  { %3199 = vmatprep.mubr.msk.f32.mxu0 %vm3736_vm0, %v3737_v6  ;;  %3538 = vmatprep.mubr.msk.f32.mxu1 %vm3736_vm0, %v3737_v6 }
  0xdd   :  { %3200 = vmatmul.mubr.msk.f32.gmra.mrb[104].mxu0 %vm251_vm2, %v66_v50  ;;  %3539 = vmatmul.mubr.msk.f32.gmra.mrb[104].mxu1 %vm251_vm2, %v179_v51 }
  0xde   :  { %3202 = vmatprep.mubr.msk.f32.mxu0 %vm3736_vm0, %v3737_v6  ;;  %3541 = vmatprep.mubr.msk.f32.mxu1 %vm3736_vm0, %v3737_v6 }
  0xe0   :  { %v997_v55 = vpop.f32.mrb[0].mxu0  ;;  %v1562_v56 = vpop.f32.mrb[0].mxu1 }
  0xe1   :  { %v998_v57 = vadd.f32 %v4414_v52, %v997_v55  ;;  %v3045_v58 = vpop.f32.mrb[1].mxu0  ;;  %3203 = vmatmul.mubr.msk.f32.gmra.mrb[106].mxu0 %vm251_vm2, %v67_v53  ;;  %v1563_v59 = vadd.f32 %v4414_v52, %v1562_v56  ;;  %v3384_v60 = vpop.f32.mrb[1].mxu1  ;;  %3542 = vmatmul.mubr.msk.f32.gmra.mrb[106].mxu1 %vm251_vm2, %v180_v54 }
  0xe2   :  { %3205 = vmatprep.mubr.msk.f32.mxu0 %vm3736_vm0, %v3737_v6  ;;  %3544 = vmatprep.mubr.msk.f32.mxu1 %vm3736_vm0, %v3737_v6  ;;  %v187_v60 = vld [vmem:[%s6266_s0 + $0x568] sm:$0xff] }
  0xe3   :  { %v2121_v63 = vmax.f32 %v998_v57, 0.0  ;;  %v2234_v0 = vmax.f32 %v1563_v59, 0.0  ;;  %v74_v59 = vld [vmem:[%s6266_s0 + $0x1e0] sm:$0xff] }
  0xe4   :  { %v1002_v1 = vpop.f32.mrb[2].mxu0  ;;  %v1567_v2 = vpop.f32.mrb[2].mxu1 }
  0xe5   :  { %2347 = vst.msk [vmem:[%s6268_s3] sm:$0xff] %vm2346_vm3, %v2121_v63  ;;  %2460 = vst.msk [vmem:[%s6268_s3 + $0x388] sm:$0xff] %vm2346_vm3, %v2234_v0  ;;  %v1003_v3 = vadd.f32 %v4414_v52, %v1002_v1  ;;  %v3048_v4 = vpop.f32.mrb[3].mxu0  ;;  %3206 = vmatmul.mubr.msk.f32.gmra.mrb[108].mxu0 %vm251_vm2, %v68_v61  ;;  %v1568_v5 = vadd.f32 %v4414_v52, %v1567_v2  ;;  %v3387_v7 = vpop.f32.mrb[3].mxu1  ;;  %3545 = vmatmul.mubr.msk.f32.gmra.mrb[108].mxu1 %vm251_vm2, %v181_v62 }
  0xe6   :  { %3208 = vmatprep.mubr.msk.f32.mxu0 %vm3736_vm0, %v3737_v6  ;;  %3547 = vmatprep.mubr.msk.f32.mxu1 %vm3736_vm0, %v3737_v6  ;;  %v188_v7 = vld [vmem:[%s6266_s0 + $0x570] sm:$0xff] }
  0xe7   :  { %v2122_v10 = vmax.f32 %v1003_v3, 0.0  ;;  %v2235_v11 = vmax.f32 %v1568_v5, 0.0  ;;  %v75_v5 = vld [vmem:[%s6266_s0 + $0x1e8] sm:$0xff] }
  0xe8   :  { %v1007_v12 = vpop.f32.mrb[4].mxu0  ;;  %v1572_v13 = vpop.f32.mrb[4].mxu1 }
  0xe9   :  { %2348 = vst.msk [vmem:[%s6268_s3 + $0x8] sm:$0xff] %vm2346_vm3, %v2122_v10  ;;  %2461 = vst.msk [vmem:[%s6268_s3 + $0x390] sm:$0xff] %vm2346_vm3, %v2235_v11  ;;  %v1008_v14 = vadd.f32 %v4414_v52, %v1007_v12  ;;  %v3051_v15 = vpop.f32.mrb[5].mxu0  ;;  %3209 = vmatmul.mubr.msk.f32.gmra.mrb[110].mxu0 %vm251_vm2, %v69_v8  ;;  %v1573_v16 = vadd.f32 %v4414_v52, %v1572_v13  ;;  %v3390_v17 = vpop.f32.mrb[5].mxu1  ;;  %3548 = vmatmul.mubr.msk.f32.gmra.mrb[110].mxu1 %vm251_vm2, %v182_v9 }
  0xea   :  { %3211 = vmatprep.mubr.msk.f32.mxu0 %vm3736_vm0, %v3737_v6  ;;  %3550 = vmatprep.mubr.msk.f32.mxu1 %vm3736_vm0, %v3737_v6  ;;  %v189_v17 = vld [vmem:[%s6266_s0 + $0x578] sm:$0xff] }
  0xeb   :  { %v2123_v20 = vmax.f32 %v1008_v14, 0.0  ;;  %v2236_v21 = vmax.f32 %v1573_v16, 0.0  ;;  %v76_v16 = vld [vmem:[%s6266_s0 + $0x1f0] sm:$0xff] }
  0xec   :  { %v1012_v22 = vpop.f32.mrb[6].mxu0  ;;  %v1577_v23 = vpop.f32.mrb[6].mxu1 }
  0xed   :  { %2349 = vst.msk [vmem:[%s6268_s3 + $0x10] sm:$0xff] %vm2346_vm3, %v2123_v20  ;;  %2462 = vst.msk [vmem:[%s6268_s3 + $0x398] sm:$0xff] %vm2346_vm3, %v2236_v21  ;;  %v1013_v24 = vadd.f32 %v4414_v52, %v1012_v22  ;;  %v3054_v25 = vpop.f32.mrb[7].mxu0  ;;  %3212 = vmatmul.mubr.msk.f32.gmra.mrb[112].mxu0 %vm251_vm2, %v70_v18  ;;  %v1578_v26 = vadd.f32 %v4414_v52, %v1577_v23  ;;  %v3393_v27 = vpop.f32.mrb[7].mxu1  ;;  %3551 = vmatmul.mubr.msk.f32.gmra.mrb[112].mxu1 %vm251_vm2, %v183_v19 }
  0xee   :  { %3214 = vmatprep.mubr.msk.f32.mxu0 %vm3736_vm0, %v3737_v6  ;;  %3553 = vmatprep.mubr.msk.f32.mxu1 %vm3736_vm0, %v3737_v6  ;;  %v190_v27 = vld [vmem:[%s6266_s0 + $0x580] sm:$0xff] }
  0xef   :  { %v2124_v30 = vmax.f32 %v1013_v24, 0.0  ;;  %v2237_v31 = vmax.f32 %v1578_v26, 0.0  ;;  %v77_v26 = vld [vmem:[%s6266_s0 + $0x1f8] sm:$0xff] }
  0xf0   :  { %v1017_v32 = vpop.f32.mrb[8].mxu0  ;;  %v1582_v33 = vpop.f32.mrb[8].mxu1 }
  0xf1   :  { %2350 = vst.msk [vmem:[%s6268_s3 + $0x18] sm:$0xff] %vm2346_vm3, %v2124_v30  ;;  %2463 = vst.msk [vmem:[%s6268_s3 + $0x3a0] sm:$0xff] %vm2346_vm3, %v2237_v31  ;;  %v1018_v34 = vadd.f32 %v4414_v52, %v1017_v32  ;;  %v3057_v35 = vpop.f32.mrb[9].mxu0  ;;  %3215 = vmatmul.mubr.msk.f32.gmra.mrb[114].mxu0 %vm251_vm2, %v71_v28  ;;  %v1583_v36 = vadd.f32 %v4414_v52, %v1582_v33  ;;  %v3396_v37 = vpop.f32.mrb[9].mxu1  ;;  %3554 = vmatmul.mubr.msk.f32.gmra.mrb[114].mxu1 %vm251_vm2, %v184_v29 }
  0xf2   :  { %3217 = vmatprep.mubr.msk.f32.mxu0 %vm3736_vm0, %v3737_v6  ;;  %3556 = vmatprep.mubr.msk.f32.mxu1 %vm3736_vm0, %v3737_v6  ;;  %v191_v37 = vld [vmem:[%s6266_s0 + $0x588] sm:$0xff] }
  0xf3   :  { %v2125_v40 = vmax.f32 %v1018_v34, 0.0  ;;  %v2238_v41 = vmax.f32 %v1583_v36, 0.0  ;;  %v78_v36 = vld [vmem:[%s6266_s0 + $0x200] sm:$0xff] }
  0xf4   :  { %v1022_v42 = vpop.f32.mrb[10].mxu0  ;;  %v1587_v43 = vpop.f32.mrb[10].mxu1 }
  0xf5   :  { %2351 = vst.msk [vmem:[%s6268_s3 + $0x20] sm:$0xff] %vm2346_vm3, %v2125_v40  ;;  %2464 = vst.msk [vmem:[%s6268_s3 + $0x3a8] sm:$0xff] %vm2346_vm3, %v2238_v41  ;;  %v1023_v44 = vadd.f32 %v4414_v52, %v1022_v42  ;;  %v3060_v45 = vpop.f32.mrb[11].mxu0  ;;  %3218 = vmatmul.mubr.msk.f32.gmra.mrb[116].mxu0 %vm251_vm2, %v72_v38  ;;  %v1588_v46 = vadd.f32 %v4414_v52, %v1587_v43  ;;  %v3399_v47 = vpop.f32.mrb[11].mxu1  ;;  %3557 = vmatmul.mubr.msk.f32.gmra.mrb[116].mxu1 %vm251_vm2, %v185_v39 }
  0xf6   :  { %3220 = vmatprep.mubr.msk.f32.mxu0 %vm3736_vm0, %v3737_v6  ;;  %3559 = vmatprep.mubr.msk.f32.mxu1 %vm3736_vm0, %v3737_v6  ;;  %v192_v47 = vld [vmem:[%s6266_s0 + $0x590] sm:$0xff] }
  0xf7   :  { %v2126_v50 = vmax.f32 %v1023_v44, 0.0  ;;  %v2239_v51 = vmax.f32 %v1588_v46, 0.0  ;;  %v79_v46 = vld [vmem:[%s6266_s0 + $0x208] sm:$0xff] }
  0xf8   :  { %v1027_v53 = vpop.f32.mrb[12].mxu0  ;;  %v1592_v54 = vpop.f32.mrb[12].mxu1 }
  0xf9   :  { %2352 = vst.msk [vmem:[%s6268_s3 + $0x28] sm:$0xff] %vm2346_vm3, %v2126_v50  ;;  %2465 = vst.msk [vmem:[%s6268_s3 + $0x3b0] sm:$0xff] %vm2346_vm3, %v2239_v51  ;;  %v1028_v55 = vadd.f32 %v4414_v52, %v1027_v53  ;;  %v3063_v56 = vpop.f32.mrb[13].mxu0  ;;  %3221 = vmatmul.mubr.msk.f32.gmra.mrb[118].mxu0 %vm251_vm2, %v73_v48  ;;  %v1593_v57 = vadd.f32 %v4414_v52, %v1592_v54  ;;  %v3402_v58 = vpop.f32.mrb[13].mxu1  ;;  %3560 = vmatmul.mubr.msk.f32.gmra.mrb[118].mxu1 %vm251_vm2, %v186_v49 }
  0xfa   :  { %3223 = vmatprep.mubr.msk.f32.mxu0 %vm3736_vm0, %v3737_v6  ;;  %3562 = vmatprep.mubr.msk.f32.mxu1 %vm3736_vm0, %v3737_v6  ;;  %v193_v58 = vld [vmem:[%s6266_s0 + $0x598] sm:$0xff] }
  0xfb   :  { %v2127_v61 = vmax.f32 %v1028_v55, 0.0  ;;  %v2240_v62 = vmax.f32 %v1593_v57, 0.0  ;;  %v80_v57 = vld [vmem:[%s6266_s0 + $0x210] sm:$0xff] }
  0xfc   :  { %v1032_v63 = vpop.f32.mrb[14].mxu0  ;;  %v1597_v0 = vpop.f32.mrb[14].mxu1 }
  0xfd   :  { %2353 = vst.msk [vmem:[%s6268_s3 + $0x30] sm:$0xff] %vm2346_vm3, %v2127_v61  ;;  %2466 = vst.msk [vmem:[%s6268_s3 + $0x3b8] sm:$0xff] %vm2346_vm3, %v2240_v62  ;;  %v1033_v1 = vadd.f32 %v4414_v52, %v1032_v63  ;;  %v3066_v2 = vpop.f32.mrb[15].mxu0  ;;  %3224 = vmatmul.mubr.msk.f32.gmra.mrb[120].mxu0 %vm251_vm2, %v74_v59  ;;  %v1598_v3 = vadd.f32 %v4414_v52, %v1597_v0  ;;  %v3405_v4 = vpop.f32.mrb[15].mxu1  ;;  %3563 = vmatmul.mubr.msk.f32.gmra.mrb[120].mxu1 %vm251_vm2, %v187_v60 }
  0xfe   :  { %3226 = vmatprep.mubr.msk.f32.mxu0 %vm3736_vm0, %v3737_v6  ;;  %3565 = vmatprep.mubr.msk.f32.mxu1 %vm3736_vm0, %v3737_v6  ;;  %v194_v4 = vld [vmem:[%s6266_s0 + $0x5a0] sm:$0xff] }
  0xff   :  { %v2128_v8 = vmax.f32 %v1033_v1, 0.0  ;;  %v2241_v9 = vmax.f32 %v1598_v3, 0.0  ;;  %v81_v3 = vld [vmem:[%s6266_s0 + $0x218] sm:$0xff] }
 0x100   :  { %v1037_v10 = vpop.f32.mrb[16].mxu0  ;;  %v1602_v11 = vpop.f32.mrb[16].mxu1 }
 0x101   :  { %2354 = vst.msk [vmem:[%s6268_s3 + $0x38] sm:$0xff] %vm2346_vm3, %v2128_v8  ;;  %2467 = vst.msk [vmem:[%s6268_s3 + $0x3c0] sm:$0xff] %vm2346_vm3, %v2241_v9  ;;  %v1038_v12 = vadd.f32 %v4414_v52, %v1037_v10  ;;  %v3069_v13 = vpop.f32.mrb[17].mxu0  ;;  %3227 = vmatmul.mubr.msk.f32.gmra.mrb[122].mxu0 %vm251_vm2, %v75_v5  ;;  %v1603_v14 = vadd.f32 %v4414_v52, %v1602_v11  ;;  %v3408_v15 = vpop.f32.mrb[17].mxu1  ;;  %3566 = vmatmul.mubr.msk.f32.gmra.mrb[122].mxu1 %vm251_vm2, %v188_v7 }
 0x102   :  { %3229 = vmatprep.mubr.msk.f32.mxu0 %vm3736_vm0, %v3737_v6  ;;  %3568 = vmatprep.mubr.msk.f32.mxu1 %vm3736_vm0, %v3737_v6  ;;  %v195_v15 = vld [vmem:[%s6266_s0 + $0x5a8] sm:$0xff] }
 0x103   :  { %v2129_v18 = vmax.f32 %v1038_v12, 0.0  ;;  %v2242_v19 = vmax.f32 %v1603_v14, 0.0  ;;  %v82_v14 = vld [vmem:[%s6266_s0 + $0x220] sm:$0xff] }
 0x104   :  { %v1042_v20 = vpop.f32.mrb[18].mxu0  ;;  %v1607_v21 = vpop.f32.mrb[18].mxu1 }
 0x105   :  { %2355 = vst.msk [vmem:[%s6268_s3 + $0x40] sm:$0xff] %vm2346_vm3, %v2129_v18  ;;  %2468 = vst.msk [vmem:[%s6268_s3 + $0x3c8] sm:$0xff] %vm2346_vm3, %v2242_v19  ;;  %v1043_v22 = vadd.f32 %v4414_v52, %v1042_v20  ;;  %v3072_v23 = vpop.f32.mrb[19].mxu0  ;;  %3230 = vmatmul.mubr.msk.f32.gmra.mrb[124].mxu0 %vm251_vm2, %v76_v16  ;;  %v1608_v24 = vadd.f32 %v4414_v52, %v1607_v21  ;;  %v3411_v25 = vpop.f32.mrb[19].mxu1  ;;  %3569 = vmatmul.mubr.msk.f32.gmra.mrb[124].mxu1 %vm251_vm2, %v189_v17 }
 0x106   :  { %3232 = vmatprep.mubr.msk.f32.mxu0 %vm3736_vm0, %v3737_v6  ;;  %3571 = vmatprep.mubr.msk.f32.mxu1 %vm3736_vm0, %v3737_v6  ;;  %v196_v25 = vld [vmem:[%s6266_s0 + $0x5b0] sm:$0xff] }
 0x107   :  { %v2130_v28 = vmax.f32 %v1043_v22, 0.0  ;;  %v2243_v29 = vmax.f32 %v1608_v24, 0.0  ;;  %v83_v24 = vld [vmem:[%s6266_s0 + $0x228] sm:$0xff] }
 0x108   :  { %v1047_v30 = vpop.f32.mrb[20].mxu0  ;;  %v1612_v31 = vpop.f32.mrb[20].mxu1 }
 0x109   :  { %2356 = vst.msk [vmem:[%s6268_s3 + $0x48] sm:$0xff] %vm2346_vm3, %v2130_v28  ;;  %2469 = vst.msk [vmem:[%s6268_s3 + $0x3d0] sm:$0xff] %vm2346_vm3, %v2243_v29  ;;  %v1048_v32 = vadd.f32 %v4414_v52, %v1047_v30  ;;  %v3075_v33 = vpop.f32.mrb[21].mxu0  ;;  %3233 = vmatmul.mubr.msk.f32.gmra.mrb[126].mxu0 %vm251_vm2, %v77_v26  ;;  %v1613_v34 = vadd.f32 %v4414_v52, %v1612_v31  ;;  %v3414_v35 = vpop.f32.mrb[21].mxu1  ;;  %3572 = vmatmul.mubr.msk.f32.gmra.mrb[126].mxu1 %vm251_vm2, %v190_v27 }
 0x10a   :  { %3235 = vmatprep.mubr.msk.f32.mxu0 %vm3736_vm0, %v3737_v6  ;;  %3574 = vmatprep.mubr.msk.f32.mxu1 %vm3736_vm0, %v3737_v6  ;;  %v197_v35 = vld [vmem:[%s6266_s0 + $0x5b8] sm:$0xff] }
 0x10b   :  { %v2131_v38 = vmax.f32 %v1048_v32, 0.0  ;;  %v2244_v39 = vmax.f32 %v1613_v34, 0.0  ;;  %v84_v34 = vld [vmem:[%s6266_s0 + $0x230] sm:$0xff] }
 0x10c   :  { %v1052_v40 = vpop.f32.mrb[22].mxu0  ;;  %v1617_v41 = vpop.f32.mrb[22].mxu1 }
 0x10d   :  { %2357 = vst.msk [vmem:[%s6268_s3 + $0x50] sm:$0xff] %vm2346_vm3, %v2131_v38  ;;  %2470 = vst.msk [vmem:[%s6268_s3 + $0x3d8] sm:$0xff] %vm2346_vm3, %v2244_v39  ;;  %v1053_v42 = vadd.f32 %v4414_v52, %v1052_v40  ;;  %v3078_v43 = vpop.f32.mrb[23].mxu0  ;;  %3236 = vmatmul.mubr.msk.f32.gmra.mrb[128].mxu0 %vm251_vm2, %v78_v36  ;;  %v1618_v44 = vadd.f32 %v4414_v52, %v1617_v41  ;;  %v3417_v45 = vpop.f32.mrb[23].mxu1  ;;  %3575 = vmatmul.mubr.msk.f32.gmra.mrb[128].mxu1 %vm251_vm2, %v191_v37 }
 0x10e   :  { %3238 = vmatprep.mubr.msk.f32.mxu0 %vm3736_vm0, %v3737_v6  ;;  %3577 = vmatprep.mubr.msk.f32.mxu1 %vm3736_vm0, %v3737_v6  ;;  %v198_v45 = vld [vmem:[%s6266_s0 + $0x5c0] sm:$0xff] }
 0x10f   :  { %v2132_v48 = vmax.f32 %v1053_v42, 0.0  ;;  %v2245_v49 = vmax.f32 %v1618_v44, 0.0  ;;  %v85_v44 = vld [vmem:[%s6266_s0 + $0x238] sm:$0xff] }
 0x110   :  { %v1057_v50 = vpop.f32.mrb[24].mxu0  ;;  %v1622_v51 = vpop.f32.mrb[24].mxu1 }
 0x111   :  { %2358 = vst.msk [vmem:[%s6268_s3 + $0x58] sm:$0xff] %vm2346_vm3, %v2132_v48  ;;  %2471 = vst.msk [vmem:[%s6268_s3 + $0x3e0] sm:$0xff] %vm2346_vm3, %v2245_v49  ;;  %v1058_v53 = vadd.f32 %v4414_v52, %v1057_v50  ;;  %v3081_v54 = vpop.f32.mrb[25].mxu0  ;;  %3239 = vmatmul.mubr.msk.f32.gmra.mrb[130].mxu0 %vm251_vm2, %v79_v46  ;;  %v1623_v55 = vadd.f32 %v4414_v52, %v1622_v51  ;;  %v3420_v56 = vpop.f32.mrb[25].mxu1  ;;  %3578 = vmatmul.mubr.msk.f32.gmra.mrb[130].mxu1 %vm251_vm2, %v192_v47 }
 0x112   :  { %3241 = vmatprep.mubr.msk.f32.mxu0 %vm3736_vm0, %v3737_v6  ;;  %3580 = vmatprep.mubr.msk.f32.mxu1 %vm3736_vm0, %v3737_v6  ;;  %v199_v56 = vld [vmem:[%s6266_s0 + $0x5c8] sm:$0xff] }
 0x113   :  { %v2133_v59 = vmax.f32 %v1058_v53, 0.0  ;;  %v2246_v60 = vmax.f32 %v1623_v55, 0.0  ;;  %v86_v55 = vld [vmem:[%s6266_s0 + $0x240] sm:$0xff] }
 0x114   :  { %v1062_v61 = vpop.f32.mrb[26].mxu0  ;;  %v1627_v62 = vpop.f32.mrb[26].mxu1 }
 0x115   :  { %2359 = vst.msk [vmem:[%s6268_s3 + $0x60] sm:$0xff] %vm2346_vm3, %v2133_v59  ;;  %2472 = vst.msk [vmem:[%s6268_s3 + $0x3e8] sm:$0xff] %vm2346_vm3, %v2246_v60  ;;  %v1063_v63 = vadd.f32 %v4414_v52, %v1062_v61  ;;  %v3084_v0 = vpop.f32.mrb[27].mxu0  ;;  %3242 = vmatmul.mubr.msk.f32.gmra.mrb[132].mxu0 %vm251_vm2, %v80_v57  ;;  %v1628_v1 = vadd.f32 %v4414_v52, %v1627_v62  ;;  %v3423_v2 = vpop.f32.mrb[27].mxu1  ;;  %3581 = vmatmul.mubr.msk.f32.gmra.mrb[132].mxu1 %vm251_vm2, %v193_v58 }
 0x116   :  { %3244 = vmatprep.mubr.msk.f32.mxu0 %vm3736_vm0, %v3737_v6  ;;  %3583 = vmatprep.mubr.msk.f32.mxu1 %vm3736_vm0, %v3737_v6  ;;  %v200_v2 = vld [vmem:[%s6266_s0 + $0x5d0] sm:$0xff] }
 0x117   :  { %v2134_v5 = vmax.f32 %v1063_v63, 0.0  ;;  %v2247_v7 = vmax.f32 %v1628_v1, 0.0  ;;  %v87_v1 = vld [vmem:[%s6266_s0 + $0x248] sm:$0xff] }
 0x118   :  { %v1067_v8 = vpop.f32.mrb[28].mxu0  ;;  %v1632_v9 = vpop.f32.mrb[28].mxu1 }
 0x119   :  { %2360 = vst.msk [vmem:[%s6268_s3 + $0x68] sm:$0xff] %vm2346_vm3, %v2134_v5  ;;  %2473 = vst.msk [vmem:[%s6268_s3 + $0x3f0] sm:$0xff] %vm2346_vm3, %v2247_v7  ;;  %v1068_v10 = vadd.f32 %v4414_v52, %v1067_v8  ;;  %v3087_v11 = vpop.f32.mrb[29].mxu0  ;;  %3245 = vmatmul.mubr.msk.f32.gmra.mrb[134].mxu0 %vm251_vm2, %v81_v3  ;;  %v1633_v12 = vadd.f32 %v4414_v52, %v1632_v9  ;;  %v3426_v13 = vpop.f32.mrb[29].mxu1  ;;  %3584 = vmatmul.mubr.msk.f32.gmra.mrb[134].mxu1 %vm251_vm2, %v194_v4 }
 0x11a   :  { %3247 = vmatprep.mubr.msk.f32.mxu0 %vm3736_vm0, %v3737_v6  ;;  %3586 = vmatprep.mubr.msk.f32.mxu1 %vm3736_vm0, %v3737_v6  ;;  %v201_v13 = vld [vmem:[%s6266_s0 + $0x5d8] sm:$0xff] }
 0x11b   :  { %v2135_v16 = vmax.f32 %v1068_v10, 0.0  ;;  %v2248_v17 = vmax.f32 %v1633_v12, 0.0  ;;  %v88_v12 = vld [vmem:[%s6266_s0 + $0x250] sm:$0xff] }
 0x11c   :  { %v1072_v18 = vpop.f32.mrb[30].mxu0  ;;  %v1637_v19 = vpop.f32.mrb[30].mxu1 }
 0x11d   :  { %2361 = vst.msk [vmem:[%s6268_s3 + $0x70] sm:$0xff] %vm2346_vm3, %v2135_v16  ;;  %2474 = vst.msk [vmem:[%s6268_s3 + $0x3f8] sm:$0xff] %vm2346_vm3, %v2248_v17  ;;  %v1073_v20 = vadd.f32 %v4414_v52, %v1072_v18  ;;  %v3090_v21 = vpop.f32.mrb[31].mxu0  ;;  %3248 = vmatmul.mubr.msk.f32.gmra.mrb[136].mxu0 %vm251_vm2, %v82_v14  ;;  %v1638_v22 = vadd.f32 %v4414_v52, %v1637_v19  ;;  %v3429_v23 = vpop.f32.mrb[31].mxu1  ;;  %3587 = vmatmul.mubr.msk.f32.gmra.mrb[136].mxu1 %vm251_vm2, %v195_v15 }
 0x11e   :  { %3250 = vmatprep.mubr.msk.f32.mxu0 %vm3736_vm0, %v3737_v6  ;;  %3589 = vmatprep.mubr.msk.f32.mxu1 %vm3736_vm0, %v3737_v6  ;;  %v202_v23 = vld [vmem:[%s6266_s0 + $0x5e0] sm:$0xff] }
 0x11f   :  { %v2136_v26 = vmax.f32 %v1073_v20, 0.0  ;;  %v2249_v27 = vmax.f32 %v1638_v22, 0.0  ;;  %v89_v22 = vld [vmem:[%s6266_s0 + $0x258] sm:$0xff] }
 0x120   :  { %v1077_v28 = vpop.f32.mrb[32].mxu0  ;;  %v1642_v29 = vpop.f32.mrb[32].mxu1 }
 0x121   :  { %2362 = vst.msk [vmem:[%s6268_s3 + $0x78] sm:$0xff] %vm2346_vm3, %v2136_v26  ;;  %2475 = vst.msk [vmem:[%s6268_s3 + $0x400] sm:$0xff] %vm2346_vm3, %v2249_v27  ;;  %v1078_v30 = vadd.f32 %v4414_v52, %v1077_v28  ;;  %v3093_v31 = vpop.f32.mrb[33].mxu0  ;;  %3251 = vmatmul.mubr.msk.f32.gmra.mrb[138].mxu0 %vm251_vm2, %v83_v24  ;;  %v1643_v32 = vadd.f32 %v4414_v52, %v1642_v29  ;;  %v3432_v33 = vpop.f32.mrb[33].mxu1  ;;  %3590 = vmatmul.mubr.msk.f32.gmra.mrb[138].mxu1 %vm251_vm2, %v196_v25 }
 0x122   :  { %3253 = vmatprep.mubr.msk.f32.mxu0 %vm3736_vm0, %v3737_v6  ;;  %3592 = vmatprep.mubr.msk.f32.mxu1 %vm3736_vm0, %v3737_v6  ;;  %v203_v33 = vld [vmem:[%s6266_s0 + $0x5e8] sm:$0xff] }
 0x123   :  { %v2137_v36 = vmax.f32 %v1078_v30, 0.0  ;;  %v2250_v37 = vmax.f32 %v1643_v32, 0.0  ;;  %v90_v32 = vld [vmem:[%s6266_s0 + $0x260] sm:$0xff] }
 0x124   :  { %v1082_v38 = vpop.f32.mrb[34].mxu0  ;;  %v1647_v39 = vpop.f32.mrb[34].mxu1 }
 0x125   :  { %2363 = vst.msk [vmem:[%s6268_s3 + $0x80] sm:$0xff] %vm2346_vm3, %v2137_v36  ;;  %2476 = vst.msk [vmem:[%s6268_s3 + $0x408] sm:$0xff] %vm2346_vm3, %v2250_v37  ;;  %v1083_v40 = vadd.f32 %v4414_v52, %v1082_v38  ;;  %v3096_v41 = vpop.f32.mrb[35].mxu0  ;;  %3254 = vmatmul.mubr.msk.f32.gmra.mrb[140].mxu0 %vm251_vm2, %v84_v34  ;;  %v1648_v42 = vadd.f32 %v4414_v52, %v1647_v39  ;;  %v3435_v43 = vpop.f32.mrb[35].mxu1  ;;  %3593 = vmatmul.mubr.msk.f32.gmra.mrb[140].mxu1 %vm251_vm2, %v197_v35 }
 0x126   :  { %3256 = vmatprep.mubr.msk.f32.mxu0 %vm3736_vm0, %v3737_v6  ;;  %3595 = vmatprep.mubr.msk.f32.mxu1 %vm3736_vm0, %v3737_v6  ;;  %v204_v43 = vld [vmem:[%s6266_s0 + $0x5f0] sm:$0xff] }
 0x127   :  { %v2138_v46 = vmax.f32 %v1083_v40, 0.0  ;;  %v2251_v47 = vmax.f32 %v1648_v42, 0.0  ;;  %v91_v42 = vld [vmem:[%s6266_s0 + $0x268] sm:$0xff] }
 0x128   :  { %v1087_v48 = vpop.f32.mrb[36].mxu0  ;;  %v1652_v49 = vpop.f32.mrb[36].mxu1 }
 0x129   :  { %2364 = vst.msk [vmem:[%s6268_s3 + $0x88] sm:$0xff] %vm2346_vm3, %v2138_v46  ;;  %2477 = vst.msk [vmem:[%s6268_s3 + $0x410] sm:$0xff] %vm2346_vm3, %v2251_v47  ;;  %v1088_v50 = vadd.f32 %v4414_v52, %v1087_v48  ;;  %v3099_v51 = vpop.f32.mrb[37].mxu0  ;;  %3257 = vmatmul.mubr.msk.f32.gmra.mrb[142].mxu0 %vm251_vm2, %v85_v44  ;;  %v1653_v53 = vadd.f32 %v4414_v52, %v1652_v49  ;;  %v3438_v54 = vpop.f32.mrb[37].mxu1  ;;  %3596 = vmatmul.mubr.msk.f32.gmra.mrb[142].mxu1 %vm251_vm2, %v198_v45 }
 0x12a   :  { %3259 = vmatprep.mubr.msk.f32.mxu0 %vm3736_vm0, %v3737_v6  ;;  %3598 = vmatprep.mubr.msk.f32.mxu1 %vm3736_vm0, %v3737_v6  ;;  %v205_v54 = vld [vmem:[%s6266_s0 + $0x5f8] sm:$0xff] }
 0x12b   :  { %v2139_v57 = vmax.f32 %v1088_v50, 0.0  ;;  %v2252_v58 = vmax.f32 %v1653_v53, 0.0  ;;  %v92_v53 = vld [vmem:[%s6266_s0 + $0x270] sm:$0xff] }
 0x12c   :  { %v1092_v59 = vpop.f32.mrb[38].mxu0  ;;  %v1657_v60 = vpop.f32.mrb[38].mxu1 }
 0x12d   :  { %2365 = vst.msk [vmem:[%s6268_s3 + $0x90] sm:$0xff] %vm2346_vm3, %v2139_v57  ;;  %2478 = vst.msk [vmem:[%s6268_s3 + $0x418] sm:$0xff] %vm2346_vm3, %v2252_v58  ;;  %v1093_v61 = vadd.f32 %v4414_v52, %v1092_v59  ;;  %v3102_v62 = vpop.f32.mrb[39].mxu0  ;;  %3260 = vmatmul.mubr.msk.f32.gmra.mrb[144].mxu0 %vm251_vm2, %v86_v55  ;;  %v1658_v63 = vadd.f32 %v4414_v52, %v1657_v60  ;;  %v3441_v0 = vpop.f32.mrb[39].mxu1  ;;  %3599 = vmatmul.mubr.msk.f32.gmra.mrb[144].mxu1 %vm251_vm2, %v199_v56 }
 0x12e   :  { %3262 = vmatprep.mubr.msk.f32.mxu0 %vm3736_vm0, %v3737_v6  ;;  %3601 = vmatprep.mubr.msk.f32.mxu1 %vm3736_vm0, %v3737_v6  ;;  %v206_v0 = vld [vmem:[%s6266_s0 + $0x600] sm:$0xff] }
 0x12f   :  { %v2140_v3 = vmax.f32 %v1093_v61, 0.0  ;;  %v2253_v4 = vmax.f32 %v1658_v63, 0.0  ;;  %v93_v63 = vld [vmem:[%s6266_s0 + $0x278] sm:$0xff] }
 0x130   :  { %v1097_v5 = vpop.f32.mrb[40].mxu0  ;;  %v1662_v7 = vpop.f32.mrb[40].mxu1 }
 0x131   :  { %2366 = vst.msk [vmem:[%s6268_s3 + $0x98] sm:$0xff] %vm2346_vm3, %v2140_v3  ;;  %2479 = vst.msk [vmem:[%s6268_s3 + $0x420] sm:$0xff] %vm2346_vm3, %v2253_v4  ;;  %v1098_v8 = vadd.f32 %v4414_v52, %v1097_v5  ;;  %v3105_v9 = vpop.f32.mrb[41].mxu0  ;;  %3263 = vmatmul.mubr.msk.f32.gmra.mrb[146].mxu0 %vm251_vm2, %v87_v1  ;;  %v1663_v10 = vadd.f32 %v4414_v52, %v1662_v7  ;;  %v3444_v11 = vpop.f32.mrb[41].mxu1  ;;  %3602 = vmatmul.mubr.msk.f32.gmra.mrb[146].mxu1 %vm251_vm2, %v200_v2 }
 0x132   :  { %3265 = vmatprep.mubr.msk.f32.mxu0 %vm3736_vm0, %v3737_v6  ;;  %3604 = vmatprep.mubr.msk.f32.mxu1 %vm3736_vm0, %v3737_v6  ;;  %v207_v11 = vld [vmem:[%s6266_s0 + $0x608] sm:$0xff] }
 0x133   :  { %v2141_v14 = vmax.f32 %v1098_v8, 0.0  ;;  %v2254_v15 = vmax.f32 %v1663_v10, 0.0  ;;  %v94_v10 = vld [vmem:[%s6266_s0 + $0x280] sm:$0xff] }
 0x134   :  { %v1102_v16 = vpop.f32.mrb[42].mxu0  ;;  %v1667_v17 = vpop.f32.mrb[42].mxu1 }
 0x135   :  { %2367 = vst.msk [vmem:[%s6268_s3 + $0xa0] sm:$0xff] %vm2346_vm3, %v2141_v14  ;;  %2480 = vst.msk [vmem:[%s6268_s3 + $0x428] sm:$0xff] %vm2346_vm3, %v2254_v15  ;;  %v1103_v18 = vadd.f32 %v4414_v52, %v1102_v16  ;;  %v3108_v19 = vpop.f32.mrb[43].mxu0  ;;  %3266 = vmatmul.mubr.msk.f32.gmra.mrb[148].mxu0 %vm251_vm2, %v88_v12  ;;  %v1668_v20 = vadd.f32 %v4414_v52, %v1667_v17  ;;  %v3447_v21 = vpop.f32.mrb[43].mxu1  ;;  %3605 = vmatmul.mubr.msk.f32.gmra.mrb[148].mxu1 %vm251_vm2, %v201_v13 }
 0x136   :  { %3268 = vmatprep.mubr.msk.f32.mxu0 %vm3736_vm0, %v3737_v6  ;;  %3607 = vmatprep.mubr.msk.f32.mxu1 %vm3736_vm0, %v3737_v6  ;;  %v208_v21 = vld [vmem:[%s6266_s0 + $0x610] sm:$0xff] }
 0x137   :  { %v2142_v24 = vmax.f32 %v1103_v18, 0.0  ;;  %v2255_v25 = vmax.f32 %v1668_v20, 0.0  ;;  %v95_v20 = vld [vmem:[%s6266_s0 + $0x288] sm:$0xff] }
 0x138   :  { %v1107_v26 = vpop.f32.mrb[44].mxu0  ;;  %v1672_v27 = vpop.f32.mrb[44].mxu1 }
 0x139   :  { %2368 = vst.msk [vmem:[%s6268_s3 + $0xa8] sm:$0xff] %vm2346_vm3, %v2142_v24  ;;  %2481 = vst.msk [vmem:[%s6268_s3 + $0x430] sm:$0xff] %vm2346_vm3, %v2255_v25  ;;  %v1108_v28 = vadd.f32 %v4414_v52, %v1107_v26  ;;  %v3111_v29 = vpop.f32.mrb[45].mxu0  ;;  %3269 = vmatmul.mubr.msk.f32.gmra.mrb[150].mxu0 %vm251_vm2, %v89_v22  ;;  %v1673_v30 = vadd.f32 %v4414_v52, %v1672_v27  ;;  %v3450_v31 = vpop.f32.mrb[45].mxu1  ;;  %3608 = vmatmul.mubr.msk.f32.gmra.mrb[150].mxu1 %vm251_vm2, %v202_v23 }
 0x13a   :  { %3271 = vmatprep.mubr.msk.f32.mxu0 %vm3736_vm0, %v3737_v6  ;;  %3610 = vmatprep.mubr.msk.f32.mxu1 %vm3736_vm0, %v3737_v6  ;;  %v209_v31 = vld [vmem:[%s6266_s0 + $0x618] sm:$0xff] }
 0x13b   :  { %v2143_v34 = vmax.f32 %v1108_v28, 0.0  ;;  %v2256_v35 = vmax.f32 %v1673_v30, 0.0  ;;  %v96_v30 = vld [vmem:[%s6266_s0 + $0x290] sm:$0xff] }
 0x13c   :  { %v1112_v36 = vpop.f32.mrb[46].mxu0  ;;  %v1677_v37 = vpop.f32.mrb[46].mxu1 }
 0x13d   :  { %2369 = vst.msk [vmem:[%s6268_s3 + $0xb0] sm:$0xff] %vm2346_vm3, %v2143_v34  ;;  %2482 = vst.msk [vmem:[%s6268_s3 + $0x438] sm:$0xff] %vm2346_vm3, %v2256_v35  ;;  %v1113_v38 = vadd.f32 %v4414_v52, %v1112_v36  ;;  %v3114_v39 = vpop.f32.mrb[47].mxu0  ;;  %3272 = vmatmul.mubr.msk.f32.gmra.mrb[152].mxu0 %vm251_vm2, %v90_v32  ;;  %v1678_v40 = vadd.f32 %v4414_v52, %v1677_v37  ;;  %v3453_v41 = vpop.f32.mrb[47].mxu1  ;;  %3611 = vmatmul.mubr.msk.f32.gmra.mrb[152].mxu1 %vm251_vm2, %v203_v33 }
 0x13e   :  { %3274 = vmatprep.mubr.msk.f32.mxu0 %vm3736_vm0, %v3737_v6  ;;  %3613 = vmatprep.mubr.msk.f32.mxu1 %vm3736_vm0, %v3737_v6  ;;  %v210_v41 = vld [vmem:[%s6266_s0 + $0x620] sm:$0xff] }
 0x13f   :  { %v2144_v44 = vmax.f32 %v1113_v38, 0.0  ;;  %v2257_v45 = vmax.f32 %v1678_v40, 0.0  ;;  %v97_v40 = vld [vmem:[%s6266_s0 + $0x298] sm:$0xff] }
 0x140   :  { %v1117_v46 = vpop.f32.mrb[48].mxu0  ;;  %v1682_v47 = vpop.f32.mrb[48].mxu1 }
 0x141   :  { %2370 = vst.msk [vmem:[%s6268_s3 + $0xb8] sm:$0xff] %vm2346_vm3, %v2144_v44  ;;  %2483 = vst.msk [vmem:[%s6268_s3 + $0x440] sm:$0xff] %vm2346_vm3, %v2257_v45  ;;  %v1118_v48 = vadd.f32 %v4414_v52, %v1117_v46  ;;  %v3117_v49 = vpop.f32.mrb[49].mxu0  ;;  %3275 = vmatmul.mubr.msk.f32.gmra.mrb[154].mxu0 %vm251_vm2, %v91_v42  ;;  %v1683_v50 = vadd.f32 %v4414_v52, %v1682_v47  ;;  %v3456_v51 = vpop.f32.mrb[49].mxu1  ;;  %3614 = vmatmul.mubr.msk.f32.gmra.mrb[154].mxu1 %vm251_vm2, %v204_v43 }
 0x142   :  { %3277 = vmatprep.mubr.msk.f32.mxu0 %vm3736_vm0, %v3737_v6  ;;  %3616 = vmatprep.mubr.msk.f32.mxu1 %vm3736_vm0, %v3737_v6  ;;  %v211_v51 = vld [vmem:[%s6266_s0 + $0x628] sm:$0xff] }
 0x143   :  { %v2145_v55 = vmax.f32 %v1118_v48, 0.0  ;;  %v2258_v56 = vmax.f32 %v1683_v50, 0.0  ;;  %v98_v50 = vld [vmem:[%s6266_s0 + $0x2a0] sm:$0xff] }
 0x144   :  { %v1122_v57 = vpop.f32.mrb[50].mxu0  ;;  %v1687_v58 = vpop.f32.mrb[50].mxu1 }
 0x145   :  { %2371 = vst.msk [vmem:[%s6268_s3 + $0xc0] sm:$0xff] %vm2346_vm3, %v2145_v55  ;;  %2484 = vst.msk [vmem:[%s6268_s3 + $0x448] sm:$0xff] %vm2346_vm3, %v2258_v56  ;;  %v1123_v59 = vadd.f32 %v4414_v52, %v1122_v57  ;;  %v3120_v60 = vpop.f32.mrb[51].mxu0  ;;  %3278 = vmatmul.mubr.msk.f32.gmra.mrb[156].mxu0 %vm251_vm2, %v92_v53  ;;  %v1688_v61 = vadd.f32 %v4414_v52, %v1687_v58  ;;  %v3459_v62 = vpop.f32.mrb[51].mxu1  ;;  %3617 = vmatmul.mubr.msk.f32.gmra.mrb[156].mxu1 %vm251_vm2, %v205_v54 }
 0x146   :  { %3280 = vmatprep.mubr.msk.f32.mxu0 %vm3736_vm0, %v3737_v6  ;;  %3619 = vmatprep.mubr.msk.f32.mxu1 %vm3736_vm0, %v3737_v6  ;;  %v212_v62 = vld [vmem:[%s6266_s0 + $0x630] sm:$0xff] }
 0x147   :  { %v2146_v1 = vmax.f32 %v1123_v59, 0.0  ;;  %v2259_v2 = vmax.f32 %v1688_v61, 0.0  ;;  %v99_v61 = vld [vmem:[%s6266_s0 + $0x2a8] sm:$0xff] }
 0x148   :  { %v1127_v3 = vpop.f32.mrb[52].mxu0  ;;  %v1692_v4 = vpop.f32.mrb[52].mxu1 }
 0x149   :  { %2372 = vst.msk [vmem:[%s6268_s3 + $0xc8] sm:$0xff] %vm2346_vm3, %v2146_v1  ;;  %2485 = vst.msk [vmem:[%s6268_s3 + $0x450] sm:$0xff] %vm2346_vm3, %v2259_v2  ;;  %v1128_v5 = vadd.f32 %v4414_v52, %v1127_v3  ;;  %v3123_v7 = vpop.f32.mrb[53].mxu0  ;;  %3281 = vmatmul.mubr.msk.f32.gmra.mrb[158].mxu0 %vm251_vm2, %v93_v63  ;;  %v1693_v8 = vadd.f32 %v4414_v52, %v1692_v4  ;;  %v3462_v9 = vpop.f32.mrb[53].mxu1  ;;  %3620 = vmatmul.mubr.msk.f32.gmra.mrb[158].mxu1 %vm251_vm2, %v206_v0  ;;  %v5133_v2 = vld [vmem:[%s6267_s2] ss:$0 sm:$0xff] }
 0x14a   :  { %3283 = vmatprep.mubr.msk.f32.mxu0 %vm3736_vm0, %v3737_v6  ;;  %3622 = vmatprep.mubr.msk.f32.mxu1 %vm3736_vm0, %v3737_v6  ;;  %v213_v9 = vld [vmem:[%s6266_s0 + $0x638] sm:$0xff] }
 0x14b   :  { %v2147_v12 = vmax.f32 %v1128_v5, 0.0  ;;  %v2260_v13 = vmax.f32 %v1693_v8, 0.0  ;;  %v100_v8 = vld [vmem:[%s6266_s0 + $0x2b0] sm:$0xff] }
 0x14c   :  { %v1132_v14 = vpop.f32.mrb[54].mxu0  ;;  %v1697_v15 = vpop.f32.mrb[54].mxu1 }
 0x14d   :  { %2373 = vst.msk [vmem:[%s6268_s3 + $0xd0] sm:$0xff] %vm2346_vm3, %v2147_v12  ;;  %2486 = vst.msk [vmem:[%s6268_s3 + $0x458] sm:$0xff] %vm2346_vm3, %v2260_v13  ;;  %v1133_v16 = vadd.f32 %v4414_v52, %v1132_v14  ;;  %v3126_v17 = vpop.f32.mrb[55].mxu0  ;;  %3284 = vmatmul.mubr.msk.f32.gmra.mrb[160].mxu0 %vm251_vm2, %v94_v10  ;;  %v1698_v18 = vadd.f32 %v4414_v52, %v1697_v15  ;;  %v3465_v19 = vpop.f32.mrb[55].mxu1  ;;  %3623 = vmatmul.mubr.msk.f32.gmra.mrb[160].mxu1 %vm251_vm2, %v207_v11 }
 0x14e   :  { %3286 = vmatprep.mubr.msk.f32.mxu0 %vm3736_vm0, %v3737_v6  ;;  %3625 = vmatprep.mubr.msk.f32.mxu1 %vm3736_vm0, %v3737_v6  ;;  %v214_v19 = vld [vmem:[%s6266_s0 + $0x640] sm:$0xff] }
 0x14f   :  { %v2148_v22 = vmax.f32 %v1133_v16, 0.0  ;;  %v2261_v23 = vmax.f32 %v1698_v18, 0.0  ;;  %v101_v18 = vld [vmem:[%s6266_s0 + $0x2b8] sm:$0xff] }
 0x150   :  { %v1137_v24 = vpop.f32.mrb[56].mxu0  ;;  %v1702_v25 = vpop.f32.mrb[56].mxu1 }
 0x151   :  { %2374 = vst.msk [vmem:[%s6268_s3 + $0xd8] sm:$0xff] %vm2346_vm3, %v2148_v22  ;;  %2487 = vst.msk [vmem:[%s6268_s3 + $0x460] sm:$0xff] %vm2346_vm3, %v2261_v23  ;;  %v1138_v26 = vadd.f32 %v4414_v52, %v1137_v24  ;;  %v3129_v27 = vpop.f32.mrb[57].mxu0  ;;  %3287 = vmatmul.mubr.msk.f32.gmra.mrb[162].mxu0 %vm251_vm2, %v95_v20  ;;  %v1703_v28 = vadd.f32 %v4414_v52, %v1702_v25  ;;  %v3468_v29 = vpop.f32.mrb[57].mxu1  ;;  %3626 = vmatmul.mubr.msk.f32.gmra.mrb[162].mxu1 %vm251_vm2, %v208_v21 }
 0x152   :  { %3289 = vmatprep.mubr.msk.f32.mxu0 %vm3736_vm0, %v3737_v6  ;;  %3628 = vmatprep.mubr.msk.f32.mxu1 %vm3736_vm0, %v3737_v6  ;;  %v215_v29 = vld [vmem:[%s6266_s0 + $0x648] sm:$0xff] }
 0x153   :  { %v2149_v32 = vmax.f32 %v1138_v26, 0.0  ;;  %v2262_v33 = vmax.f32 %v1703_v28, 0.0  ;;  %v102_v28 = vld [vmem:[%s6266_s0 + $0x2c0] sm:$0xff] }
 0x154   :  { %v1142_v34 = vpop.f32.mrb[58].mxu0  ;;  %v1707_v35 = vpop.f32.mrb[58].mxu1 }
 0x155   :  { %2375 = vst.msk [vmem:[%s6268_s3 + $0xe0] sm:$0xff] %vm2346_vm3, %v2149_v32  ;;  %2488 = vst.msk [vmem:[%s6268_s3 + $0x468] sm:$0xff] %vm2346_vm3, %v2262_v33  ;;  %v1143_v36 = vadd.f32 %v4414_v52, %v1142_v34  ;;  %v3132_v37 = vpop.f32.mrb[59].mxu0  ;;  %3290 = vmatmul.mubr.msk.f32.gmra.mrb[164].mxu0 %vm251_vm2, %v96_v30  ;;  %v1708_v38 = vadd.f32 %v4414_v52, %v1707_v35  ;;  %v3471_v39 = vpop.f32.mrb[59].mxu1  ;;  %3629 = vmatmul.mubr.msk.f32.gmra.mrb[164].mxu1 %vm251_vm2, %v209_v31 }
 0x156   :  { %3292 = vmatprep.mubr.msk.f32.mxu0 %vm3736_vm0, %v3737_v6  ;;  %3631 = vmatprep.mubr.msk.f32.mxu1 %vm3736_vm0, %v3737_v6  ;;  %v216_v39 = vld [vmem:[%s6266_s0 + $0x650] sm:$0xff] }
 0x157   :  { %v2150_v42 = vmax.f32 %v1143_v36, 0.0  ;;  %v2263_v43 = vmax.f32 %v1708_v38, 0.0  ;;  %v103_v38 = vld [vmem:[%s6266_s0 + $0x2c8] sm:$0xff] }
 0x158   :  { %v1147_v44 = vpop.f32.mrb[60].mxu0  ;;  %v1712_v45 = vpop.f32.mrb[60].mxu1 }
 0x159   :  { %2376 = vst.msk [vmem:[%s6268_s3 + $0xe8] sm:$0xff] %vm2346_vm3, %v2150_v42  ;;  %2489 = vst.msk [vmem:[%s6268_s3 + $0x470] sm:$0xff] %vm2346_vm3, %v2263_v43  ;;  %v1148_v46 = vadd.f32 %v4414_v52, %v1147_v44  ;;  %v3135_v47 = vpop.f32.mrb[61].mxu0  ;;  %3293 = vmatmul.mubr.msk.f32.gmra.mrb[166].mxu0 %vm251_vm2, %v97_v40  ;;  %v1713_v48 = vadd.f32 %v4414_v52, %v1712_v45  ;;  %v3474_v49 = vpop.f32.mrb[61].mxu1  ;;  %3632 = vmatmul.mubr.msk.f32.gmra.mrb[166].mxu1 %vm251_vm2, %v210_v41 }
 0x15a   :  { %3295 = vmatprep.mubr.msk.f32.mxu0 %vm3736_vm0, %v3737_v6  ;;  %3634 = vmatprep.mubr.msk.f32.mxu1 %vm3736_vm0, %v3737_v6  ;;  %v217_v49 = vld [vmem:[%s6266_s0 + $0x658] sm:$0xff] }
 0x15b   :  { %v2151_v53 = vmax.f32 %v1148_v46, 0.0  ;;  %v2264_v54 = vmax.f32 %v1713_v48, 0.0  ;;  %v104_v48 = vld [vmem:[%s6266_s0 + $0x2d0] sm:$0xff] }
 0x15c   :  { %v1152_v55 = vpop.f32.mrb[62].mxu0  ;;  %v1717_v56 = vpop.f32.mrb[62].mxu1 }
 0x15d   :  { %2377 = vst.msk [vmem:[%s6268_s3 + $0xf0] sm:$0xff] %vm2346_vm3, %v2151_v53  ;;  %2490 = vst.msk [vmem:[%s6268_s3 + $0x478] sm:$0xff] %vm2346_vm3, %v2264_v54  ;;  %v1153_v57 = vadd.f32 %v4414_v52, %v1152_v55  ;;  %v3138_v58 = vpop.f32.mrb[63].mxu0  ;;  %3296 = vmatmul.mubr.msk.f32.gmra.mrb[168].mxu0 %vm251_vm2, %v98_v50  ;;  %v1718_v59 = vadd.f32 %v4414_v52, %v1717_v56  ;;  %v3477_v60 = vpop.f32.mrb[63].mxu1  ;;  %3635 = vmatmul.mubr.msk.f32.gmra.mrb[168].mxu1 %vm251_vm2, %v211_v51 }
 0x15e   :  { %3298 = vmatprep.mubr.msk.f32.mxu0 %vm3736_vm0, %v3737_v6  ;;  %3637 = vmatprep.mubr.msk.f32.mxu1 %vm3736_vm0, %v3737_v6  ;;  %v218_v60 = vld [vmem:[%s6266_s0 + $0x660] sm:$0xff] }
 0x15f   :  { %v2152_v63 = vmax.f32 %v1153_v57, 0.0  ;;  %v2265_v0 = vmax.f32 %v1718_v59, 0.0  ;;  %v105_v59 = vld [vmem:[%s6266_s0 + $0x2d8] sm:$0xff] }
 0x160   :  { %v1157_v52 = vpop.f32.mrb[64].mxu0  ;;  %v1722_v1 = vpop.f32.mrb[64].mxu1 }
 0x161   :  { %2378 = vst.msk [vmem:[%s6268_s3 + $0xf8] sm:$0xff] %vm2346_vm3, %v2152_v63  ;;  %2491 = vst.msk [vmem:[%s6268_s3 + $0x480] sm:$0xff] %vm2346_vm3, %v2265_v0  ;;  %v1158_v3 = vadd.f32 %v5133_v2, %v1157_v52  ;;  %v3141_v4 = vpop.f32.mrb[65].mxu0  ;;  %3299 = vmatmul.mubr.msk.f32.gmra.mrb[170].mxu0 %vm251_vm2, %v99_v61  ;;  %v1723_v5 = vadd.f32 %v5133_v2, %v1722_v1  ;;  %v3480_v7 = vpop.f32.mrb[65].mxu1  ;;  %3638 = vmatmul.mubr.msk.f32.gmra.mrb[170].mxu1 %vm251_vm2, %v212_v62 }
 0x162   :  { %3301 = vmatprep.mubr.msk.f32.mxu0 %vm3736_vm0, %v3737_v6  ;;  %3640 = vmatprep.mubr.msk.f32.mxu1 %vm3736_vm0, %v3737_v6  ;;  %v219_v7 = vld [vmem:[%s6266_s0 + $0x668] sm:$0xff] }
 0x163   :  { %v2153_v10 = vmax.f32 %v1158_v3, 0.0  ;;  %v2266_v11 = vmax.f32 %v1723_v5, 0.0  ;;  %v106_v5 = vld [vmem:[%s6266_s0 + $0x2e0] sm:$0xff] }
 0x164   :  { %v1162_v12 = vpop.f32.mrb[66].mxu0  ;;  %v1727_v13 = vpop.f32.mrb[66].mxu1 }
 0x165   :  { %2379 = vst.msk [vmem:[%s6268_s3 + $0x100] sm:$0xff] %vm2346_vm3, %v2153_v10  ;;  %2492 = vst.msk [vmem:[%s6268_s3 + $0x488] sm:$0xff] %vm2346_vm3, %v2266_v11  ;;  %v1163_v14 = vadd.f32 %v5133_v2, %v1162_v12  ;;  %v3144_v15 = vpop.f32.mrb[67].mxu0  ;;  %3302 = vmatmul.mubr.msk.f32.gmra.mrb[172].mxu0 %vm251_vm2, %v100_v8  ;;  %v1728_v16 = vadd.f32 %v5133_v2, %v1727_v13  ;;  %v3483_v17 = vpop.f32.mrb[67].mxu1  ;;  %3641 = vmatmul.mubr.msk.f32.gmra.mrb[172].mxu1 %vm251_vm2, %v213_v9 }
 0x166   :  { %3304 = vmatprep.mubr.msk.f32.mxu0 %vm3736_vm0, %v3737_v6  ;;  %3643 = vmatprep.mubr.msk.f32.mxu1 %vm3736_vm0, %v3737_v6  ;;  %v220_v17 = vld [vmem:[%s6266_s0 + $0x670] sm:$0xff] }
 0x167   :  { %v2154_v20 = vmax.f32 %v1163_v14, 0.0  ;;  %v2267_v21 = vmax.f32 %v1728_v16, 0.0  ;;  %v107_v16 = vld [vmem:[%s6266_s0 + $0x2e8] sm:$0xff] }
 0x168   :  { %v1167_v22 = vpop.f32.mrb[68].mxu0  ;;  %v1732_v23 = vpop.f32.mrb[68].mxu1 }
 0x169   :  { %2380 = vst.msk [vmem:[%s6268_s3 + $0x108] sm:$0xff] %vm2346_vm3, %v2154_v20  ;;  %2493 = vst.msk [vmem:[%s6268_s3 + $0x490] sm:$0xff] %vm2346_vm3, %v2267_v21  ;;  %v1168_v24 = vadd.f32 %v5133_v2, %v1167_v22  ;;  %v3147_v25 = vpop.f32.mrb[69].mxu0  ;;  %3305 = vmatmul.mubr.msk.f32.gmra.mrb[174].mxu0 %vm251_vm2, %v101_v18  ;;  %v1733_v26 = vadd.f32 %v5133_v2, %v1732_v23  ;;  %v3486_v27 = vpop.f32.mrb[69].mxu1  ;;  %3644 = vmatmul.mubr.msk.f32.gmra.mrb[174].mxu1 %vm251_vm2, %v214_v19 }
 0x16a   :  { %3307 = vmatprep.mubr.msk.f32.mxu0 %vm3736_vm0, %v3737_v6  ;;  %3646 = vmatprep.mubr.msk.f32.mxu1 %vm3736_vm0, %v3737_v6  ;;  %v221_v27 = vld [vmem:[%s6266_s0 + $0x678] sm:$0xff] }
 0x16b   :  { %v2155_v30 = vmax.f32 %v1168_v24, 0.0  ;;  %v2268_v31 = vmax.f32 %v1733_v26, 0.0  ;;  %v108_v26 = vld [vmem:[%s6266_s0 + $0x2f0] sm:$0xff] }
 0x16c   :  { %v1172_v32 = vpop.f32.mrb[70].mxu0  ;;  %v1737_v33 = vpop.f32.mrb[70].mxu1 }
 0x16d   :  { %2381 = vst.msk [vmem:[%s6268_s3 + $0x110] sm:$0xff] %vm2346_vm3, %v2155_v30  ;;  %2494 = vst.msk [vmem:[%s6268_s3 + $0x498] sm:$0xff] %vm2346_vm3, %v2268_v31  ;;  %v1173_v34 = vadd.f32 %v5133_v2, %v1172_v32  ;;  %v3150_v35 = vpop.f32.mrb[71].mxu0  ;;  %3308 = vmatmul.mubr.msk.f32.gmra.mrb[176].mxu0 %vm251_vm2, %v102_v28  ;;  %v1738_v36 = vadd.f32 %v5133_v2, %v1737_v33  ;;  %v3489_v37 = vpop.f32.mrb[71].mxu1  ;;  %3647 = vmatmul.mubr.msk.f32.gmra.mrb[176].mxu1 %vm251_vm2, %v215_v29 }
 0x16e   :  { %3310 = vmatprep.mubr.msk.f32.mxu0 %vm3736_vm0, %v3737_v6  ;;  %3649 = vmatprep.mubr.msk.f32.mxu1 %vm3736_vm0, %v3737_v6  ;;  %v222_v37 = vld [vmem:[%s6266_s0 + $0x680] sm:$0xff] }
 0x16f   :  { %v2156_v40 = vmax.f32 %v1173_v34, 0.0  ;;  %v2269_v41 = vmax.f32 %v1738_v36, 0.0  ;;  %v109_v36 = vld [vmem:[%s6266_s0 + $0x2f8] sm:$0xff] }
 0x170   :  { %v1177_v42 = vpop.f32.mrb[72].mxu0  ;;  %v1742_v43 = vpop.f32.mrb[72].mxu1 }
 0x171   :  { %2382 = vst.msk [vmem:[%s6268_s3 + $0x118] sm:$0xff] %vm2346_vm3, %v2156_v40  ;;  %2495 = vst.msk [vmem:[%s6268_s3 + $0x4a0] sm:$0xff] %vm2346_vm3, %v2269_v41  ;;  %v1178_v44 = vadd.f32 %v5133_v2, %v1177_v42  ;;  %v3153_v45 = vpop.f32.mrb[73].mxu0  ;;  %3311 = vmatmul.mubr.msk.f32.gmra.mrb[178].mxu0 %vm251_vm2, %v103_v38  ;;  %v1743_v46 = vadd.f32 %v5133_v2, %v1742_v43  ;;  %v3492_v47 = vpop.f32.mrb[73].mxu1  ;;  %3650 = vmatmul.mubr.msk.f32.gmra.mrb[178].mxu1 %vm251_vm2, %v216_v39 }
 0x172   :  { %3313 = vmatprep.mubr.msk.f32.mxu0 %vm3736_vm0, %v3737_v6  ;;  %3652 = vmatprep.mubr.msk.f32.mxu1 %vm3736_vm0, %v3737_v6  ;;  %v223_v47 = vld [vmem:[%s6266_s0 + $0x688] sm:$0xff] }
 0x173   :  { %v2157_v50 = vmax.f32 %v1178_v44, 0.0  ;;  %v2270_v51 = vmax.f32 %v1743_v46, 0.0  ;;  %v110_v46 = vld [vmem:[%s6266_s0 + $0x300] sm:$0xff] }
 0x174   :  { %v1182_v53 = vpop.f32.mrb[74].mxu0  ;;  %v1747_v54 = vpop.f32.mrb[74].mxu1 }
 0x175   :  { %2383 = vst.msk [vmem:[%s6268_s3 + $0x120] sm:$0xff] %vm2346_vm3, %v2157_v50  ;;  %2496 = vst.msk [vmem:[%s6268_s3 + $0x4a8] sm:$0xff] %vm2346_vm3, %v2270_v51  ;;  %v1183_v55 = vadd.f32 %v5133_v2, %v1182_v53  ;;  %v3156_v56 = vpop.f32.mrb[75].mxu0  ;;  %3314 = vmatmul.mubr.msk.f32.gmra.mrb[180].mxu0 %vm251_vm2, %v104_v48  ;;  %v1748_v57 = vadd.f32 %v5133_v2, %v1747_v54  ;;  %v3495_v58 = vpop.f32.mrb[75].mxu1  ;;  %3653 = vmatmul.mubr.msk.f32.gmra.mrb[180].mxu1 %vm251_vm2, %v217_v49 }
 0x176   :  { %3316 = vmatprep.mubr.msk.f32.mxu0 %vm3736_vm0, %v3737_v6  ;;  %3655 = vmatprep.mubr.msk.f32.mxu1 %vm3736_vm0, %v3737_v6  ;;  %v224_v58 = vld [vmem:[%s6266_s0 + $0x690] sm:$0xff] }
 0x177   :  { %v2158_v61 = vmax.f32 %v1183_v55, 0.0  ;;  %v2271_v62 = vmax.f32 %v1748_v57, 0.0  ;;  %v111_v57 = vld [vmem:[%s6266_s0 + $0x308] sm:$0xff] }
 0x178   :  { %v1187_v63 = vpop.f32.mrb[76].mxu0  ;;  %v1752_v0 = vpop.f32.mrb[76].mxu1 }
 0x179   :  { %2384 = vst.msk [vmem:[%s6268_s3 + $0x128] sm:$0xff] %vm2346_vm3, %v2158_v61  ;;  %2497 = vst.msk [vmem:[%s6268_s3 + $0x4b0] sm:$0xff] %vm2346_vm3, %v2271_v62  ;;  %v1188_v52 = vadd.f32 %v5133_v2, %v1187_v63  ;;  %v3159_v1 = vpop.f32.mrb[77].mxu0  ;;  %3317 = vmatmul.mubr.msk.f32.gmra.mrb[182].mxu0 %vm251_vm2, %v105_v59  ;;  %v1753_v3 = vadd.f32 %v5133_v2, %v1752_v0  ;;  %v3498_v4 = vpop.f32.mrb[77].mxu1  ;;  %3656 = vmatmul.mubr.msk.f32.gmra.mrb[182].mxu1 %vm251_vm2, %v218_v60 }
 0x17a   :  { %3319 = vmatprep.mubr.msk.f32.mxu0 %vm3736_vm0, %v3737_v6  ;;  %3658 = vmatprep.mubr.msk.f32.mxu1 %vm3736_vm0, %v3737_v6  ;;  %v225_v4 = vld [vmem:[%s6266_s0 + $0x698] sm:$0xff] }
 0x17b   :  { %v2159_v8 = vmax.f32 %v1188_v52, 0.0  ;;  %v2272_v9 = vmax.f32 %v1753_v3, 0.0  ;;  %v112_v3 = vld [vmem:[%s6266_s0 + $0x310] sm:$0xff] }
 0x17c   :  { %v1192_v10 = vpop.f32.mrb[78].mxu0  ;;  %v1757_v11 = vpop.f32.mrb[78].mxu1 }
 0x17d   :  { %2385 = vst.msk [vmem:[%s6268_s3 + $0x130] sm:$0xff] %vm2346_vm3, %v2159_v8  ;;  %2498 = vst.msk [vmem:[%s6268_s3 + $0x4b8] sm:$0xff] %vm2346_vm3, %v2272_v9  ;;  %v1193_v12 = vadd.f32 %v5133_v2, %v1192_v10  ;;  %v3162_v13 = vpop.f32.mrb[79].mxu0  ;;  %3320 = vmatmul.mubr.msk.f32.gmra.mrb[184].mxu0 %vm251_vm2, %v106_v5  ;;  %v1758_v14 = vadd.f32 %v5133_v2, %v1757_v11  ;;  %v3501_v15 = vpop.f32.mrb[79].mxu1  ;;  %3659 = vmatmul.mubr.msk.f32.gmra.mrb[184].mxu1 %vm251_vm2, %v219_v7 }
 0x17e   :  { %3322 = vmatprep.mubr.msk.f32.mxu0 %vm3736_vm0, %v3737_v6  ;;  %3661 = vmatprep.mubr.msk.f32.mxu1 %vm3736_vm0, %v3737_v6  ;;  %v226_v15 = vld [vmem:[%s6266_s0 + $0x6a0] sm:$0xff] }
 0x17f   :  { %v2160_v18 = vmax.f32 %v1193_v12, 0.0  ;;  %v2273_v19 = vmax.f32 %v1758_v14, 0.0  ;;  %v113_v14 = vld [vmem:[%s6266_s0 + $0x318] sm:$0xff] }
 0x180   :  { %v1197_v20 = vpop.f32.mrb[80].mxu0  ;;  %v1762_v21 = vpop.f32.mrb[80].mxu1 }
 0x181   :  { %2386 = vst.msk [vmem:[%s6268_s3 + $0x138] sm:$0xff] %vm2346_vm3, %v2160_v18  ;;  %2499 = vst.msk [vmem:[%s6268_s3 + $0x4c0] sm:$0xff] %vm2346_vm3, %v2273_v19  ;;  %v1198_v22 = vadd.f32 %v5133_v2, %v1197_v20  ;;  %v3165_v23 = vpop.f32.mrb[81].mxu0  ;;  %3323 = vmatmul.mubr.msk.f32.gmra.mrb[186].mxu0 %vm251_vm2, %v107_v16  ;;  %v1763_v24 = vadd.f32 %v5133_v2, %v1762_v21  ;;  %v3504_v25 = vpop.f32.mrb[81].mxu1  ;;  %3662 = vmatmul.mubr.msk.f32.gmra.mrb[186].mxu1 %vm251_vm2, %v220_v17 }
 0x182   :  { %3325 = vmatprep.mubr.msk.f32.mxu0 %vm3736_vm0, %v3737_v6  ;;  %3664 = vmatprep.mubr.msk.f32.mxu1 %vm3736_vm0, %v3737_v6  ;;  %v227_v25 = vld [vmem:[%s6266_s0 + $0x6a8] sm:$0xff] }
 0x183   :  { %v2161_v28 = vmax.f32 %v1198_v22, 0.0  ;;  %v2274_v29 = vmax.f32 %v1763_v24, 0.0  ;;  %v114_v24 = vld [vmem:[%s6266_s0 + $0x320] sm:$0xff] }
 0x184   :  { %v1202_v30 = vpop.f32.mrb[82].mxu0  ;;  %v1767_v31 = vpop.f32.mrb[82].mxu1 }
 0x185   :  { %2387 = vst.msk [vmem:[%s6268_s3 + $0x140] sm:$0xff] %vm2346_vm3, %v2161_v28  ;;  %2500 = vst.msk [vmem:[%s6268_s3 + $0x4c8] sm:$0xff] %vm2346_vm3, %v2274_v29  ;;  %v1203_v32 = vadd.f32 %v5133_v2, %v1202_v30  ;;  %v3168_v33 = vpop.f32.mrb[83].mxu0  ;;  %3326 = vmatmul.mubr.msk.f32.gmra.mrb[188].mxu0 %vm251_vm2, %v108_v26  ;;  %v1768_v34 = vadd.f32 %v5133_v2, %v1767_v31  ;;  %v3507_v35 = vpop.f32.mrb[83].mxu1  ;;  %3665 = vmatmul.mubr.msk.f32.gmra.mrb[188].mxu1 %vm251_vm2, %v221_v27 }
 0x186   :  { %3328 = vmatprep.mubr.msk.f32.mxu0 %vm3736_vm0, %v3737_v6  ;;  %3667 = vmatprep.mubr.msk.f32.mxu1 %vm3736_vm0, %v3737_v6  ;;  %v228_v35 = vld [vmem:[%s6266_s0 + $0x6b0] sm:$0xff] }
 0x187   :  { %v2162_v38 = vmax.f32 %v1203_v32, 0.0  ;;  %v2275_v39 = vmax.f32 %v1768_v34, 0.0  ;;  %v115_v34 = vld [vmem:[%s6266_s0 + $0x328] sm:$0xff] }
 0x188   :  { %v1207_v40 = vpop.f32.mrb[84].mxu0  ;;  %v1772_v41 = vpop.f32.mrb[84].mxu1 }
 0x189   :  { %2388 = vst.msk [vmem:[%s6268_s3 + $0x148] sm:$0xff] %vm2346_vm3, %v2162_v38  ;;  %2501 = vst.msk [vmem:[%s6268_s3 + $0x4d0] sm:$0xff] %vm2346_vm3, %v2275_v39  ;;  %v1208_v42 = vadd.f32 %v5133_v2, %v1207_v40  ;;  %v3171_v43 = vpop.f32.mrb[85].mxu0  ;;  %3329 = vmatmul.mubr.msk.f32.gmra.mrb[190].mxu0 %vm251_vm2, %v109_v36  ;;  %v1773_v44 = vadd.f32 %v5133_v2, %v1772_v41  ;;  %v3510_v45 = vpop.f32.mrb[85].mxu1  ;;  %3668 = vmatmul.mubr.msk.f32.gmra.mrb[190].mxu1 %vm251_vm2, %v222_v37 }
 0x18a   :  { %3331 = vmatprep.mubr.msk.f32.mxu0 %vm3736_vm0, %v3737_v6  ;;  %3670 = vmatprep.mubr.msk.f32.mxu1 %vm3736_vm0, %v3737_v6  ;;  %v229_v45 = vld [vmem:[%s6266_s0 + $0x6b8] sm:$0xff] }
 0x18b   :  { %v2163_v48 = vmax.f32 %v1208_v42, 0.0  ;;  %v2276_v49 = vmax.f32 %v1773_v44, 0.0  ;;  %v116_v44 = vld [vmem:[%s6266_s0 + $0x330] sm:$0xff] }
 0x18c   :  { %v1212_v50 = vpop.f32.mrb[86].mxu0  ;;  %v1777_v51 = vpop.f32.mrb[86].mxu1 }
 0x18d   :  { %2389 = vst.msk [vmem:[%s6268_s3 + $0x150] sm:$0xff] %vm2346_vm3, %v2163_v48  ;;  %2502 = vst.msk [vmem:[%s6268_s3 + $0x4d8] sm:$0xff] %vm2346_vm3, %v2276_v49  ;;  %v1213_v53 = vadd.f32 %v5133_v2, %v1212_v50  ;;  %v3174_v54 = vpop.f32.mrb[87].mxu0  ;;  %3332 = vmatmul.mubr.msk.f32.gmra.mrb[192].mxu0 %vm251_vm2, %v110_v46  ;;  %v1778_v55 = vadd.f32 %v5133_v2, %v1777_v51  ;;  %v3513_v56 = vpop.f32.mrb[87].mxu1  ;;  %3671 = vmatmul.mubr.msk.f32.gmra.mrb[192].mxu1 %vm251_vm2, %v223_v47 }
 0x18e   :  { %3334 = vmatprep.mubr.msk.f32.mxu0 %vm3736_vm0, %v3737_v6  ;;  %3673 = vmatprep.mubr.msk.f32.mxu1 %vm3736_vm0, %v3737_v6  ;;  %v230_v56 = vld [vmem:[%s6266_s0 + $0x6c0] sm:$0xff] }
 0x18f   :  { %v2164_v59 = vmax.f32 %v1213_v53, 0.0  ;;  %v2277_v60 = vmax.f32 %v1778_v55, 0.0  ;;  %v117_v55 = vld [vmem:[%s6266_s0 + $0x338] sm:$0xff] }
 0x190   :  { %v1217_v61 = vpop.f32.mrb[88].mxu0  ;;  %v1782_v62 = vpop.f32.mrb[88].mxu1 }
 0x191   :  { %2390 = vst.msk [vmem:[%s6268_s3 + $0x158] sm:$0xff] %vm2346_vm3, %v2164_v59  ;;  %2503 = vst.msk [vmem:[%s6268_s3 + $0x4e0] sm:$0xff] %vm2346_vm3, %v2277_v60  ;;  %v1218_v63 = vadd.f32 %v5133_v2, %v1217_v61  ;;  %v3177_v0 = vpop.f32.mrb[89].mxu0  ;;  %3335 = vmatmul.mubr.msk.f32.gmra.mrb[194].mxu0 %vm251_vm2, %v111_v57  ;;  %v1783_v52 = vadd.f32 %v5133_v2, %v1782_v62  ;;  %v3516_v1 = vpop.f32.mrb[89].mxu1  ;;  %3674 = vmatmul.mubr.msk.f32.gmra.mrb[194].mxu1 %vm251_vm2, %v224_v58 }
 0x192   :  { %3337 = vmatprep.mubr.msk.f32.mxu0 %vm3736_vm0, %v3737_v6  ;;  %3676 = vmatprep.mubr.msk.f32.mxu1 %vm3736_vm0, %v3737_v6  ;;  %v231_v1 = vld [vmem:[%s6266_s0 + $0x6c8] sm:$0xff] }
 0x193   :  { %v2165_v5 = vmax.f32 %v1218_v63, 0.0  ;;  %v2278_v7 = vmax.f32 %v1783_v52, 0.0  ;;  %v118_v52 = vld [vmem:[%s6266_s0 + $0x340] sm:$0xff] }
 0x194   :  { %v1222_v8 = vpop.f32.mrb[90].mxu0  ;;  %v1787_v9 = vpop.f32.mrb[90].mxu1 }
 0x195   :  { %2391 = vst.msk [vmem:[%s6268_s3 + $0x160] sm:$0xff] %vm2346_vm3, %v2165_v5  ;;  %2504 = vst.msk [vmem:[%s6268_s3 + $0x4e8] sm:$0xff] %vm2346_vm3, %v2278_v7  ;;  %v1223_v10 = vadd.f32 %v5133_v2, %v1222_v8  ;;  %v3180_v11 = vpop.f32.mrb[91].mxu0  ;;  %3338 = vmatmul.mubr.msk.f32.gmra.mrb[196].mxu0 %vm251_vm2, %v112_v3  ;;  %v1788_v12 = vadd.f32 %v5133_v2, %v1787_v9  ;;  %v3519_v13 = vpop.f32.mrb[91].mxu1  ;;  %3677 = vmatmul.mubr.msk.f32.gmra.mrb[196].mxu1 %vm251_vm2, %v225_v4 }
 0x196   :  { %3340 = vmatprep.mubr.msk.f32.mxu0 %vm3736_vm0, %v3737_v6  ;;  %3679 = vmatprep.mubr.msk.f32.mxu1 %vm3736_vm0, %v3737_v6  ;;  %v232_v13 = vld [vmem:[%s6266_s0 + $0x6d0] sm:$0xff] }
 0x197   :  { %v2166_v16 = vmax.f32 %v1223_v10, 0.0  ;;  %v2279_v17 = vmax.f32 %v1788_v12, 0.0  ;;  %v119_v12 = vld [vmem:[%s6266_s0 + $0x348] sm:$0xff] }
 0x198   :  { %v1227_v18 = vpop.f32.mrb[92].mxu0  ;;  %v1792_v19 = vpop.f32.mrb[92].mxu1 }
 0x199   :  { %2392 = vst.msk [vmem:[%s6268_s3 + $0x168] sm:$0xff] %vm2346_vm3, %v2166_v16  ;;  %2505 = vst.msk [vmem:[%s6268_s3 + $0x4f0] sm:$0xff] %vm2346_vm3, %v2279_v17  ;;  %v1228_v20 = vadd.f32 %v5133_v2, %v1227_v18  ;;  %v3183_v21 = vpop.f32.mrb[93].mxu0  ;;  %3341 = vmatmul.mubr.msk.f32.gmra.mrb[198].mxu0 %vm251_vm2, %v113_v14  ;;  %v1793_v22 = vadd.f32 %v5133_v2, %v1792_v19  ;;  %v3522_v23 = vpop.f32.mrb[93].mxu1  ;;  %3680 = vmatmul.mubr.msk.f32.gmra.mrb[198].mxu1 %vm251_vm2, %v226_v15 }
 0x19a   :  { %3343 = vmatprep.mubr.msk.f32.mxu0 %vm3736_vm0, %v3737_v6  ;;  %3682 = vmatprep.mubr.msk.f32.mxu1 %vm3736_vm0, %v3737_v6  ;;  %v233_v23 = vld [vmem:[%s6266_s0 + $0x6d8] sm:$0xff] }
 0x19b   :  { %v2167_v26 = vmax.f32 %v1228_v20, 0.0  ;;  %v2280_v27 = vmax.f32 %v1793_v22, 0.0  ;;  %v120_v22 = vld [vmem:[%s6266_s0 + $0x350] sm:$0xff] }
 0x19c   :  { %v1232_v28 = vpop.f32.mrb[94].mxu0  ;;  %v1797_v29 = vpop.f32.mrb[94].mxu1 }
 0x19d   :  { %2393 = vst.msk [vmem:[%s6268_s3 + $0x170] sm:$0xff] %vm2346_vm3, %v2167_v26  ;;  %2506 = vst.msk [vmem:[%s6268_s3 + $0x4f8] sm:$0xff] %vm2346_vm3, %v2280_v27  ;;  %v1233_v30 = vadd.f32 %v5133_v2, %v1232_v28  ;;  %v3186_v31 = vpop.f32.mrb[95].mxu0  ;;  %3344 = vmatmul.mubr.msk.f32.gmra.mrb[200].mxu0 %vm251_vm2, %v114_v24  ;;  %v1798_v32 = vadd.f32 %v5133_v2, %v1797_v29  ;;  %v3525_v33 = vpop.f32.mrb[95].mxu1  ;;  %3683 = vmatmul.mubr.msk.f32.gmra.mrb[200].mxu1 %vm251_vm2, %v227_v25 }
 0x19e   :  { %3346 = vmatprep.mubr.msk.f32.mxu0 %vm3736_vm0, %v3737_v6  ;;  %3685 = vmatprep.mubr.msk.f32.mxu1 %vm3736_vm0, %v3737_v6  ;;  %v234_v33 = vld [vmem:[%s6266_s0 + $0x6e0] sm:$0xff] }
 0x19f   :  { %v2168_v36 = vmax.f32 %v1233_v30, 0.0  ;;  %v2281_v37 = vmax.f32 %v1798_v32, 0.0  ;;  %v121_v32 = vld [vmem:[%s6266_s0 + $0x358] sm:$0xff] }
 0x1a0   :  { %v1237_v38 = vpop.f32.mrb[96].mxu0  ;;  %v1802_v39 = vpop.f32.mrb[96].mxu1 }
 0x1a1   :  { %2394 = vst.msk [vmem:[%s6268_s3 + $0x178] sm:$0xff] %vm2346_vm3, %v2168_v36  ;;  %2507 = vst.msk [vmem:[%s6268_s3 + $0x500] sm:$0xff] %vm2346_vm3, %v2281_v37  ;;  %v1238_v40 = vadd.f32 %v5133_v2, %v1237_v38  ;;  %v3189_v41 = vpop.f32.mrb[97].mxu0  ;;  %3347 = vmatmul.mubr.msk.f32.gmra.mrb[202].mxu0 %vm251_vm2, %v115_v34  ;;  %v1803_v42 = vadd.f32 %v5133_v2, %v1802_v39  ;;  %v3528_v43 = vpop.f32.mrb[97].mxu1  ;;  %3686 = vmatmul.mubr.msk.f32.gmra.mrb[202].mxu1 %vm251_vm2, %v228_v35 }
 0x1a2   :  { %3349 = vmatprep.mubr.msk.f32.mxu0 %vm3736_vm0, %v3737_v6  ;;  %3688 = vmatprep.mubr.msk.f32.mxu1 %vm3736_vm0, %v3737_v6  ;;  %v235_v43 = vld [vmem:[%s6266_s0 + $0x6e8] sm:$0xff] }
 0x1a3   :  { %v2169_v46 = vmax.f32 %v1238_v40, 0.0  ;;  %v2282_v47 = vmax.f32 %v1803_v42, 0.0  ;;  %v122_v42 = vld [vmem:[%s6266_s0 + $0x360] sm:$0xff] }
 0x1a4   :  { %v1242_v48 = vpop.f32.mrb[98].mxu0  ;;  %v1807_v49 = vpop.f32.mrb[98].mxu1 }
 0x1a5   :  { %2395 = vst.msk [vmem:[%s6268_s3 + $0x180] sm:$0xff] %vm2346_vm3, %v2169_v46  ;;  %2508 = vst.msk [vmem:[%s6268_s3 + $0x508] sm:$0xff] %vm2346_vm3, %v2282_v47  ;;  %v1243_v50 = vadd.f32 %v5133_v2, %v1242_v48  ;;  %v3192_v51 = vpop.f32.mrb[99].mxu0  ;;  %3350 = vmatmul.mubr.msk.f32.gmra.mrb[204].mxu0 %vm251_vm2, %v116_v44  ;;  %v1808_v53 = vadd.f32 %v5133_v2, %v1807_v49  ;;  %v3531_v54 = vpop.f32.mrb[99].mxu1  ;;  %3689 = vmatmul.mubr.msk.f32.gmra.mrb[204].mxu1 %vm251_vm2, %v229_v45 }
 0x1a6   :  { %3352 = vmatprep.mubr.msk.f32.mxu0 %vm3736_vm0, %v3737_v6  ;;  %3691 = vmatprep.mubr.msk.f32.mxu1 %vm3736_vm0, %v3737_v6  ;;  %v236_v54 = vld [vmem:[%s6266_s0 + $0x6f0] sm:$0xff] }
 0x1a7   :  { %v2170_v57 = vmax.f32 %v1243_v50, 0.0  ;;  %v2283_v58 = vmax.f32 %v1808_v53, 0.0  ;;  %v123_v53 = vld [vmem:[%s6266_s0 + $0x368] sm:$0xff] }
 0x1a8   :  { %v1247_v59 = vpop.f32.mrb[100].mxu0  ;;  %v1812_v60 = vpop.f32.mrb[100].mxu1 }
 0x1a9   :  { %2396 = vst.msk [vmem:[%s6268_s3 + $0x188] sm:$0xff] %vm2346_vm3, %v2170_v57  ;;  %2509 = vst.msk [vmem:[%s6268_s3 + $0x510] sm:$0xff] %vm2346_vm3, %v2283_v58  ;;  %v1248_v61 = vadd.f32 %v5133_v2, %v1247_v59  ;;  %v3195_v62 = vpop.f32.mrb[101].mxu0  ;;  %3353 = vmatmul.mubr.msk.f32.gmra.mrb[206].mxu0 %vm251_vm2, %v117_v55  ;;  %v1813_v63 = vadd.f32 %v5133_v2, %v1812_v60  ;;  %v3534_v0 = vpop.f32.mrb[101].mxu1  ;;  %3692 = vmatmul.mubr.msk.f32.gmra.mrb[206].mxu1 %vm251_vm2, %v230_v56 }
 0x1aa   :  { %3355 = vmatprep.mubr.msk.f32.mxu0 %vm3736_vm0, %v3737_v6  ;;  %3694 = vmatprep.mubr.msk.f32.mxu1 %vm3736_vm0, %v3737_v6  ;;  %v237_v0 = vld [vmem:[%s6266_s0 + $0x6f8] sm:$0xff] }
 0x1ab   :  { %v2171_v3 = vmax.f32 %v1248_v61, 0.0  ;;  %v2284_v4 = vmax.f32 %v1813_v63, 0.0  ;;  %v124_v63 = vld [vmem:[%s6266_s0 + $0x370] sm:$0xff] }
 0x1ac   :  { %v1252_v5 = vpop.f32.mrb[102].mxu0  ;;  %v1817_v7 = vpop.f32.mrb[102].mxu1 }
 0x1ad   :  { %2397 = vst.msk [vmem:[%s6268_s3 + $0x190] sm:$0xff] %vm2346_vm3, %v2171_v3  ;;  %2510 = vst.msk [vmem:[%s6268_s3 + $0x518] sm:$0xff] %vm2346_vm3, %v2284_v4  ;;  %v1253_v8 = vadd.f32 %v5133_v2, %v1252_v5  ;;  %v3198_v9 = vpop.f32.mrb[103].mxu0  ;;  %3356 = vmatmul.mubr.msk.f32.gmra.mrb[208].mxu0 %vm251_vm2, %v118_v52  ;;  %v1818_v10 = vadd.f32 %v5133_v2, %v1817_v7  ;;  %v3537_v11 = vpop.f32.mrb[103].mxu1  ;;  %3695 = vmatmul.mubr.msk.f32.gmra.mrb[208].mxu1 %vm251_vm2, %v231_v1 }
 0x1ae   :  { %3358 = vmatprep.mubr.msk.f32.mxu0 %vm3736_vm0, %v3737_v6  ;;  %3697 = vmatprep.mubr.msk.f32.mxu1 %vm3736_vm0, %v3737_v6  ;;  %v238_v11 = vld [vmem:[%s6266_s0 + $0x700] sm:$0xff] }
 0x1af   :  { %v2172_v14 = vmax.f32 %v1253_v8, 0.0  ;;  %v2285_v15 = vmax.f32 %v1818_v10, 0.0  ;;  %v125_v10 = vld [vmem:[%s6266_s0 + $0x378] sm:$0xff] }
 0x1b0   :  { %v1257_v16 = vpop.f32.mrb[104].mxu0  ;;  %v1822_v17 = vpop.f32.mrb[104].mxu1 }
 0x1b1   :  { %2398 = vst.msk [vmem:[%s6268_s3 + $0x198] sm:$0xff] %vm2346_vm3, %v2172_v14  ;;  %2511 = vst.msk [vmem:[%s6268_s3 + $0x520] sm:$0xff] %vm2346_vm3, %v2285_v15  ;;  %v1258_v18 = vadd.f32 %v5133_v2, %v1257_v16  ;;  %v3201_v19 = vpop.f32.mrb[105].mxu0  ;;  %3359 = vmatmul.mubr.msk.f32.gmra.mrb[210].mxu0 %vm251_vm2, %v119_v12  ;;  %v1823_v20 = vadd.f32 %v5133_v2, %v1822_v17  ;;  %v3540_v21 = vpop.f32.mrb[105].mxu1  ;;  %3698 = vmatmul.mubr.msk.f32.gmra.mrb[210].mxu1 %vm251_vm2, %v232_v13 }
 0x1b2   :  { %3361 = vmatprep.mubr.msk.f32.mxu0 %vm3736_vm0, %v3737_v6  ;;  %3700 = vmatprep.mubr.msk.f32.mxu1 %vm3736_vm0, %v3737_v6 }
 0x1b3   :  { %v2173_v24 = vmax.f32 %v1258_v18, 0.0  ;;  %v2286_v25 = vmax.f32 %v1823_v20, 0.0  ;;  %v126_v20 = vld [vmem:[%s6266_s0 + $0x380] sm:$0xff] }
 0x1b4   :  { %v1262_v26 = vpop.f32.mrb[106].mxu0  ;;  %v1827_v27 = vpop.f32.mrb[106].mxu1 }
 0x1b5   :  { %2399 = vst.msk [vmem:[%s6268_s3 + $0x1a0] sm:$0xff] %vm2346_vm3, %v2173_v24  ;;  %2512 = vst.msk [vmem:[%s6268_s3 + $0x528] sm:$0xff] %vm2346_vm3, %v2286_v25  ;;  %v1263_v28 = vadd.f32 %v5133_v2, %v1262_v26  ;;  %v3204_v29 = vpop.f32.mrb[107].mxu0  ;;  %3362 = vmatmul.mubr.msk.f32.gmra.mrb[212].mxu0 %vm251_vm2, %v120_v22  ;;  %v1828_v30 = vadd.f32 %v5133_v2, %v1827_v27  ;;  %v3543_v31 = vpop.f32.mrb[107].mxu1  ;;  %3701 = vmatmul.mubr.msk.f32.gmra.mrb[212].mxu1 %vm251_vm2, %v233_v23 }
 0x1b6   :  { %3364 = vmatprep.mubr.msk.f32.mxu0 %vm3736_vm0, %v3737_v6  ;;  %3703 = vmatprep.mubr.msk.f32.mxu1 %vm3736_vm0, %v3737_v6 }
 0x1b7   :  { %v2174_v34 = vmax.f32 %v1263_v28, 0.0  ;;  %v2287_v35 = vmax.f32 %v1828_v30, 0.0 }
 0x1b8   :  { %v1267_v36 = vpop.f32.mrb[108].mxu0  ;;  %v1832_v37 = vpop.f32.mrb[108].mxu1 }
 0x1b9   :  { %2400 = vst.msk [vmem:[%s6268_s3 + $0x1a8] sm:$0xff] %vm2346_vm3, %v2174_v34  ;;  %2513 = vst.msk [vmem:[%s6268_s3 + $0x530] sm:$0xff] %vm2346_vm3, %v2287_v35  ;;  %v1268_v38 = vadd.f32 %v5133_v2, %v1267_v36  ;;  %v3207_v39 = vpop.f32.mrb[109].mxu0  ;;  %3365 = vmatmul.mubr.msk.f32.gmra.mrb[214].mxu0 %vm251_vm2, %v121_v32  ;;  %v1833_v40 = vadd.f32 %v5133_v2, %v1832_v37  ;;  %v3546_v41 = vpop.f32.mrb[109].mxu1  ;;  %3704 = vmatmul.mubr.msk.f32.gmra.mrb[214].mxu1 %vm251_vm2, %v234_v33 }
 0x1ba   :  { %3367 = vmatprep.mubr.msk.f32.mxu0 %vm3736_vm0, %v3737_v6  ;;  %3706 = vmatprep.mubr.msk.f32.mxu1 %vm3736_vm0, %v3737_v6 }
 0x1bb   :  { %v2175_v44 = vmax.f32 %v1268_v38, 0.0  ;;  %v2288_v45 = vmax.f32 %v1833_v40, 0.0 }
 0x1bc   :  { %v1272_v46 = vpop.f32.mrb[110].mxu0  ;;  %v1837_v47 = vpop.f32.mrb[110].mxu1 }
 0x1bd   :  { %2401 = vst.msk [vmem:[%s6268_s3 + $0x1b0] sm:$0xff] %vm2346_vm3, %v2175_v44  ;;  %2514 = vst.msk [vmem:[%s6268_s3 + $0x538] sm:$0xff] %vm2346_vm3, %v2288_v45  ;;  %v1273_v48 = vadd.f32 %v5133_v2, %v1272_v46  ;;  %v3210_v49 = vpop.f32.mrb[111].mxu0  ;;  %3368 = vmatmul.mubr.msk.f32.gmra.mrb[216].mxu0 %vm251_vm2, %v122_v42  ;;  %v1838_v50 = vadd.f32 %v5133_v2, %v1837_v47  ;;  %v3549_v51 = vpop.f32.mrb[111].mxu1  ;;  %3707 = vmatmul.mubr.msk.f32.gmra.mrb[216].mxu1 %vm251_vm2, %v235_v43 }
 0x1be   :  { %3370 = vmatprep.mubr.msk.f32.mxu0 %vm3736_vm0, %v3737_v6  ;;  %3709 = vmatprep.mubr.msk.f32.mxu1 %vm3736_vm0, %v3737_v6 }
 0x1bf   :  { %v2176_v55 = vmax.f32 %v1273_v48, 0.0  ;;  %v2289_v56 = vmax.f32 %v1838_v50, 0.0 }
 0x1c0   :  { %v1277_v57 = vpop.f32.mrb[112].mxu0  ;;  %v1842_v58 = vpop.f32.mrb[112].mxu1 }
 0x1c1   :  { %2402 = vst.msk [vmem:[%s6268_s3 + $0x1b8] sm:$0xff] %vm2346_vm3, %v2176_v55  ;;  %2515 = vst.msk [vmem:[%s6268_s3 + $0x540] sm:$0xff] %vm2346_vm3, %v2289_v56  ;;  %v1278_v59 = vadd.f32 %v5133_v2, %v1277_v57  ;;  %v3213_v60 = vpop.f32.mrb[113].mxu0  ;;  %3371 = vmatmul.mubr.msk.f32.gmra.mrb[218].mxu0 %vm251_vm2, %v123_v53  ;;  %v1843_v61 = vadd.f32 %v5133_v2, %v1842_v58  ;;  %v3552_v62 = vpop.f32.mrb[113].mxu1  ;;  %3710 = vmatmul.mubr.msk.f32.gmra.mrb[218].mxu1 %vm251_vm2, %v236_v54 }
 0x1c2   :  { %3373 = vmatprep.mubr.msk.f32.mxu0 %vm3736_vm0, %v3737_v6  ;;  %3712 = vmatprep.mubr.msk.f32.mxu1 %vm3736_vm0, %v3737_v6 }
 0x1c3   :  { %v2177_v52 = vmax.f32 %v1278_v59, 0.0  ;;  %v2290_v1 = vmax.f32 %v1843_v61, 0.0 }
 0x1c4   :  { %v1282_v3 = vpop.f32.mrb[114].mxu0  ;;  %v1847_v4 = vpop.f32.mrb[114].mxu1 }
 0x1c5   :  { %2403 = vst.msk [vmem:[%s6268_s3 + $0x1c0] sm:$0xff] %vm2346_vm3, %v2177_v52  ;;  %2516 = vst.msk [vmem:[%s6268_s3 + $0x548] sm:$0xff] %vm2346_vm3, %v2290_v1  ;;  %v1283_v5 = vadd.f32 %v5133_v2, %v1282_v3  ;;  %v3216_v7 = vpop.f32.mrb[115].mxu0  ;;  %3374 = vmatmul.mubr.msk.f32.gmra.mrb[220].mxu0 %vm251_vm2, %v124_v63  ;;  %v1848_v8 = vadd.f32 %v5133_v2, %v1847_v4  ;;  %v3555_v9 = vpop.f32.mrb[115].mxu1  ;;  %3713 = vmatmul.mubr.msk.f32.gmra.mrb[220].mxu1 %vm251_vm2, %v237_v0 }
 0x1c6   :  { %3376 = vmatprep.mubr.msk.f32.mxu0 %vm3736_vm0, %v3737_v6  ;;  %3715 = vmatprep.mubr.msk.f32.mxu1 %vm3736_vm0, %v3737_v6 }
 0x1c7   :  { %v2178_v12 = vmax.f32 %v1283_v5, 0.0  ;;  %v2291_v13 = vmax.f32 %v1848_v8, 0.0 }
 0x1c8   :  { %v1287_v14 = vpop.f32.mrb[116].mxu0  ;;  %v1852_v15 = vpop.f32.mrb[116].mxu1 }
 0x1c9   :  { %2404 = vst.msk [vmem:[%s6268_s3 + $0x1c8] sm:$0xff] %vm2346_vm3, %v2178_v12  ;;  %2517 = vst.msk [vmem:[%s6268_s3 + $0x550] sm:$0xff] %vm2346_vm3, %v2291_v13  ;;  %v1288_v16 = vadd.f32 %v5133_v2, %v1287_v14  ;;  %v3219_v17 = vpop.f32.mrb[117].mxu0  ;;  %3377 = vmatmul.mubr.msk.f32.gmra.mrb[222].mxu0 %vm251_vm2, %v125_v10  ;;  %v1853_v18 = vadd.f32 %v5133_v2, %v1852_v15  ;;  %v3558_v19 = vpop.f32.mrb[117].mxu1  ;;  %3716 = vmatmul.mubr.msk.f32.gmra.mrb[222].mxu1 %vm251_vm2, %v238_v11 }
 0x1ca   :  { %3379 = vmatprep.mubr.msk.f32.mxu0 %vm3736_vm0, %v3737_v6 }
 0x1cb   :  { %v2179_v21 = vmax.f32 %v1288_v16, 0.0  ;;  %v2292_v22 = vmax.f32 %v1853_v18, 0.0 }
 0x1cc   :  { %v1292_v23 = vpop.f32.mrb[118].mxu0  ;;  %v1857_v24 = vpop.f32.mrb[118].mxu1 }
 0x1cd   :  { %2405 = vst.msk [vmem:[%s6268_s3 + $0x1d0] sm:$0xff] %vm2346_vm3, %v2179_v21  ;;  %2518 = vst.msk [vmem:[%s6268_s3 + $0x558] sm:$0xff] %vm2346_vm3, %v2292_v22  ;;  %v1293_v6 = vadd.f32 %v5133_v2, %v1292_v23  ;;  %v3222_v25 = vpop.f32.mrb[119].mxu0  ;;  %3380 = vmatmul.mubr.msk.f32.gmra.mrb[224].mxu0 %vm251_vm2, %v126_v20  ;;  %v1858_v26 = vadd.f32 %v5133_v2, %v1857_v24  ;;  %v3561_v27 = vpop.f32.mrb[119].mxu1 }
 0x1ce   :  { %v5809_v27 = vld [vmem:[%s6267_s2] ss:$0 sm:$0xff] }
 0x1cf   :  { %v2180_v28 = vmax.f32 %v1293_v6, 0.0  ;;  %v2293_v29 = vmax.f32 %v1858_v26, 0.0 }
 0x1d0   :  { %v1297_v30 = vpop.f32.mrb[120].mxu0  ;;  %v1862_v31 = vpop.f32.mrb[120].mxu1 }
 0x1d1   :  { %2406 = vst.msk [vmem:[%s6268_s3 + $0x1d8] sm:$0xff] %vm2346_vm3, %v2180_v28  ;;  %2519 = vst.msk [vmem:[%s6268_s3 + $0x560] sm:$0xff] %vm2346_vm3, %v2293_v29  ;;  %v1298_v32 = vadd.f32 %v5133_v2, %v1297_v30  ;;  %v3225_v33 = vpop.f32.mrb[121].mxu0  ;;  %v1863_v34 = vadd.f32 %v5133_v2, %v1862_v31  ;;  %v3564_v35 = vpop.f32.mrb[121].mxu1 }
 0x1d3   :  { %v2181_v36 = vmax.f32 %v1298_v32, 0.0  ;;  %v2294_v37 = vmax.f32 %v1863_v34, 0.0 }
 0x1d4   :  { %v1302_v38 = vpop.f32.mrb[122].mxu0  ;;  %v1867_v39 = vpop.f32.mrb[122].mxu1 }
 0x1d5   :  { %2407 = vst.msk [vmem:[%s6268_s3 + $0x1e0] sm:$0xff] %vm2346_vm3, %v2181_v36  ;;  %2520 = vst.msk [vmem:[%s6268_s3 + $0x568] sm:$0xff] %vm2346_vm3, %v2294_v37  ;;  %v1303_v40 = vadd.f32 %v5133_v2, %v1302_v38  ;;  %v3228_v41 = vpop.f32.mrb[123].mxu0  ;;  %v1868_v42 = vadd.f32 %v5133_v2, %v1867_v39  ;;  %v3567_v43 = vpop.f32.mrb[123].mxu1 }
 0x1d7   :  { %v2182_v44 = vmax.f32 %v1303_v40, 0.0  ;;  %v2295_v45 = vmax.f32 %v1868_v42, 0.0 }
 0x1d8   :  { %v1307_v46 = vpop.f32.mrb[124].mxu0  ;;  %v1872_v47 = vpop.f32.mrb[124].mxu1 }
 0x1d9   :  { %2408 = vst.msk [vmem:[%s6268_s3 + $0x1e8] sm:$0xff] %vm2346_vm3, %v2182_v44  ;;  %2521 = vst.msk [vmem:[%s6268_s3 + $0x570] sm:$0xff] %vm2346_vm3, %v2295_v45  ;;  %v1308_v48 = vadd.f32 %v5133_v2, %v1307_v46  ;;  %v3231_v49 = vpop.f32.mrb[125].mxu0  ;;  %v1873_v50 = vadd.f32 %v5133_v2, %v1872_v47  ;;  %v3570_v51 = vpop.f32.mrb[125].mxu1 }
 0x1db   :  { %v2183_v53 = vmax.f32 %v1308_v48, 0.0  ;;  %v2296_v54 = vmax.f32 %v1873_v50, 0.0 }
 0x1dc   :  { %v1312_v55 = vpop.f32.mrb[126].mxu0  ;;  %v1877_v56 = vpop.f32.mrb[126].mxu1 }
 0x1dd   :  { %2409 = vst.msk [vmem:[%s6268_s3 + $0x1f0] sm:$0xff] %vm2346_vm3, %v2183_v53  ;;  %2522 = vst.msk [vmem:[%s6268_s3 + $0x578] sm:$0xff] %vm2346_vm3, %v2296_v54  ;;  %v1313_v57 = vadd.f32 %v5133_v2, %v1312_v55  ;;  %v3234_v58 = vpop.f32.mrb[127].mxu0  ;;  %v1878_v59 = vadd.f32 %v5133_v2, %v1877_v56  ;;  %v3573_v60 = vpop.f32.mrb[127].mxu1 }
 0x1df   :  { %v2184_v61 = vmax.f32 %v1313_v57, 0.0  ;;  %v2297_v62 = vmax.f32 %v1878_v59, 0.0 }
 0x1e0   :  { %v1317_v63 = vpop.f32.mrb[128].mxu0  ;;  %v1882_v0 = vpop.f32.mrb[128].mxu1 }
 0x1e1   :  { %2410 = vst.msk [vmem:[%s6268_s3 + $0x1f8] sm:$0xff] %vm2346_vm3, %v2184_v61  ;;  %2523 = vst.msk [vmem:[%s6268_s3 + $0x580] sm:$0xff] %vm2346_vm3, %v2297_v62  ;;  %v1318_v52 = vadd.f32 %v5133_v2, %v1317_v63  ;;  %v3237_v1 = vpop.f32.mrb[129].mxu0  ;;  %v1883_v3 = vadd.f32 %v5133_v2, %v1882_v0  ;;  %v3576_v4 = vpop.f32.mrb[129].mxu1 }
 0x1e3   :  { %v2185_v5 = vmax.f32 %v1318_v52, 0.0  ;;  %v2298_v7 = vmax.f32 %v1883_v3, 0.0 }
 0x1e4   :  { %v1322_v8 = vpop.f32.mrb[130].mxu0  ;;  %v1887_v9 = vpop.f32.mrb[130].mxu1 }
 0x1e5   :  { %2411 = vst.msk [vmem:[%s6268_s3 + $0x200] sm:$0xff] %vm2346_vm3, %v2185_v5  ;;  %2524 = vst.msk [vmem:[%s6268_s3 + $0x588] sm:$0xff] %vm2346_vm3, %v2298_v7  ;;  %v1323_v10 = vadd.f32 %v5133_v2, %v1322_v8  ;;  %v3240_v11 = vpop.f32.mrb[131].mxu0  ;;  %v1888_v12 = vadd.f32 %v5133_v2, %v1887_v9  ;;  %v3579_v13 = vpop.f32.mrb[131].mxu1 }
 0x1e7   :  { %v2186_v14 = vmax.f32 %v1323_v10, 0.0  ;;  %v2299_v15 = vmax.f32 %v1888_v12, 0.0 }
 0x1e8   :  { %v1327_v16 = vpop.f32.mrb[132].mxu0  ;;  %v1892_v17 = vpop.f32.mrb[132].mxu1 }
 0x1e9   :  { %2412 = vst.msk [vmem:[%s6268_s3 + $0x208] sm:$0xff] %vm2346_vm3, %v2186_v14  ;;  %2525 = vst.msk [vmem:[%s6268_s3 + $0x590] sm:$0xff] %vm2346_vm3, %v2299_v15  ;;  %v1328_v18 = vadd.f32 %v5133_v2, %v1327_v16  ;;  %v3243_v19 = vpop.f32.mrb[133].mxu0  ;;  %v1893_v20 = vadd.f32 %v5133_v2, %v1892_v17  ;;  %v3582_v21 = vpop.f32.mrb[133].mxu1 }
 0x1eb   :  { %v2187_v22 = vmax.f32 %v1328_v18, 0.0  ;;  %v2300_v23 = vmax.f32 %v1893_v20, 0.0 }
 0x1ec   :  { %v1332_v24 = vpop.f32.mrb[134].mxu0  ;;  %v1897_v6 = vpop.f32.mrb[134].mxu1 }
 0x1ed   :  { %2413 = vst.msk [vmem:[%s6268_s3 + $0x210] sm:$0xff] %vm2346_vm3, %v2187_v22  ;;  %2526 = vst.msk [vmem:[%s6268_s3 + $0x598] sm:$0xff] %vm2346_vm3, %v2300_v23  ;;  %v1333_v25 = vadd.f32 %v5133_v2, %v1332_v24  ;;  %v3246_v26 = vpop.f32.mrb[135].mxu0  ;;  %v1898_v28 = vadd.f32 %v5809_v27, %v1897_v6  ;;  %v3585_v29 = vpop.f32.mrb[135].mxu1 }
 0x1ef   :  { %v2188_v30 = vmax.f32 %v1333_v25, 0.0  ;;  %v2301_v31 = vmax.f32 %v1898_v28, 0.0 }
 0x1f0   :  { %v1337_v32 = vpop.f32.mrb[136].mxu0  ;;  %v1902_v33 = vpop.f32.mrb[136].mxu1 }
 0x1f1   :  { %2414 = vst.msk [vmem:[%s6268_s3 + $0x218] sm:$0xff] %vm2346_vm3, %v2188_v30  ;;  %2527 = vst.msk [vmem:[%s6268_s3 + $0x5a0] sm:$0xff] %vm2346_vm3, %v2301_v31  ;;  %v1338_v2 = vadd.f32 %v5809_v27, %v1337_v32  ;;  %v3249_v34 = vpop.f32.mrb[137].mxu0  ;;  %v1903_v35 = vadd.f32 %v5809_v27, %v1902_v33  ;;  %v3588_v36 = vpop.f32.mrb[137].mxu1 }
 0x1f3   :  { %v2189_v37 = vmax.f32 %v1338_v2, 0.0  ;;  %v2302_v38 = vmax.f32 %v1903_v35, 0.0 }
 0x1f4   :  { %v1342_v39 = vpop.f32.mrb[138].mxu0  ;;  %v1907_v40 = vpop.f32.mrb[138].mxu1 }
 0x1f5   :  { %2415 = vst.msk [vmem:[%s6268_s3 + $0x220] sm:$0xff] %vm2346_vm3, %v2189_v37  ;;  %2528 = vst.msk [vmem:[%s6268_s3 + $0x5a8] sm:$0xff] %vm2346_vm3, %v2302_v38  ;;  %v1343_v41 = vadd.f32 %v5809_v27, %v1342_v39  ;;  %v3252_v42 = vpop.f32.mrb[139].mxu0  ;;  %v1908_v43 = vadd.f32 %v5809_v27, %v1907_v40  ;;  %v3591_v44 = vpop.f32.mrb[139].mxu1 }
 0x1f7   :  { %v2190_v45 = vmax.f32 %v1343_v41, 0.0  ;;  %v2303_v46 = vmax.f32 %v1908_v43, 0.0 }
 0x1f8   :  { %v1347_v47 = vpop.f32.mrb[140].mxu0  ;;  %v1912_v48 = vpop.f32.mrb[140].mxu1 }
 0x1f9   :  { %2416 = vst.msk [vmem:[%s6268_s3 + $0x228] sm:$0xff] %vm2346_vm3, %v2190_v45  ;;  %2529 = vst.msk [vmem:[%s6268_s3 + $0x5b0] sm:$0xff] %vm2346_vm3, %v2303_v46  ;;  %v1348_v49 = vadd.f32 %v5809_v27, %v1347_v47  ;;  %v3255_v50 = vpop.f32.mrb[141].mxu0  ;;  %v1913_v51 = vadd.f32 %v5809_v27, %v1912_v48  ;;  %v3594_v53 = vpop.f32.mrb[141].mxu1 }
 0x1fb   :  { %v2191_v54 = vmax.f32 %v1348_v49, 0.0  ;;  %v2304_v55 = vmax.f32 %v1913_v51, 0.0 }
 0x1fc   :  { %v1352_v56 = vpop.f32.mrb[142].mxu0  ;;  %v1917_v57 = vpop.f32.mrb[142].mxu1 }
 0x1fd   :  { %2417 = vst.msk [vmem:[%s6268_s3 + $0x230] sm:$0xff] %vm2346_vm3, %v2191_v54  ;;  %2530 = vst.msk [vmem:[%s6268_s3 + $0x5b8] sm:$0xff] %vm2346_vm3, %v2304_v55  ;;  %v1353_v58 = vadd.f32 %v5809_v27, %v1352_v56  ;;  %v3258_v59 = vpop.f32.mrb[143].mxu0  ;;  %v1918_v60 = vadd.f32 %v5809_v27, %v1917_v57  ;;  %v3597_v61 = vpop.f32.mrb[143].mxu1 }
 0x1ff   :  { %v2192_v62 = vmax.f32 %v1353_v58, 0.0  ;;  %v2305_v63 = vmax.f32 %v1918_v60, 0.0 }
 0x200   :  { %v1357_v0 = vpop.f32.mrb[144].mxu0  ;;  %v1922_v52 = vpop.f32.mrb[144].mxu1 }
 0x201   :  { %2418 = vst.msk [vmem:[%s6268_s3 + $0x238] sm:$0xff] %vm2346_vm3, %v2192_v62  ;;  %2531 = vst.msk [vmem:[%s6268_s3 + $0x5c0] sm:$0xff] %vm2346_vm3, %v2305_v63  ;;  %v1358_v1 = vadd.f32 %v5809_v27, %v1357_v0  ;;  %v3261_v3 = vpop.f32.mrb[145].mxu0  ;;  %v1923_v4 = vadd.f32 %v5809_v27, %v1922_v52  ;;  %v3600_v5 = vpop.f32.mrb[145].mxu1 }
 0x203   :  { %v2193_v7 = vmax.f32 %v1358_v1, 0.0  ;;  %v2306_v8 = vmax.f32 %v1923_v4, 0.0 }
 0x204   :  { %v1362_v9 = vpop.f32.mrb[146].mxu0  ;;  %v1927_v10 = vpop.f32.mrb[146].mxu1 }
 0x205   :  { %2419 = vst.msk [vmem:[%s6268_s3 + $0x240] sm:$0xff] %vm2346_vm3, %v2193_v7  ;;  %2532 = vst.msk [vmem:[%s6268_s3 + $0x5c8] sm:$0xff] %vm2346_vm3, %v2306_v8  ;;  %v1363_v11 = vadd.f32 %v5809_v27, %v1362_v9  ;;  %v3264_v12 = vpop.f32.mrb[147].mxu0  ;;  %v1928_v13 = vadd.f32 %v5809_v27, %v1927_v10  ;;  %v3603_v14 = vpop.f32.mrb[147].mxu1 }
 0x207   :  { %v2194_v15 = vmax.f32 %v1363_v11, 0.0  ;;  %v2307_v16 = vmax.f32 %v1928_v13, 0.0 }
 0x208   :  { %v1367_v17 = vpop.f32.mrb[148].mxu0  ;;  %v1932_v18 = vpop.f32.mrb[148].mxu1 }
 0x209   :  { %2420 = vst.msk [vmem:[%s6268_s3 + $0x248] sm:$0xff] %vm2346_vm3, %v2194_v15  ;;  %2533 = vst.msk [vmem:[%s6268_s3 + $0x5d0] sm:$0xff] %vm2346_vm3, %v2307_v16  ;;  %v1368_v19 = vadd.f32 %v5809_v27, %v1367_v17  ;;  %v3267_v20 = vpop.f32.mrb[149].mxu0  ;;  %v1933_v21 = vadd.f32 %v5809_v27, %v1932_v18  ;;  %v3606_v22 = vpop.f32.mrb[149].mxu1 }
 0x20b   :  { %v2195_v23 = vmax.f32 %v1368_v19, 0.0  ;;  %v2308_v24 = vmax.f32 %v1933_v21, 0.0 }
 0x20c   :  { %v1372_v6 = vpop.f32.mrb[150].mxu0  ;;  %v1937_v25 = vpop.f32.mrb[150].mxu1 }
 0x20d   :  { %2421 = vst.msk [vmem:[%s6268_s3 + $0x250] sm:$0xff] %vm2346_vm3, %v2195_v23  ;;  %2534 = vst.msk [vmem:[%s6268_s3 + $0x5d8] sm:$0xff] %vm2346_vm3, %v2308_v24  ;;  %v1373_v26 = vadd.f32 %v5809_v27, %v1372_v6  ;;  %v3270_v28 = vpop.f32.mrb[151].mxu0  ;;  %v1938_v29 = vadd.f32 %v5809_v27, %v1937_v25  ;;  %v3609_v30 = vpop.f32.mrb[151].mxu1 }
 0x20f   :  { %v2196_v31 = vmax.f32 %v1373_v26, 0.0  ;;  %v2309_v32 = vmax.f32 %v1938_v29, 0.0 }
 0x210   :  { %v1377_v33 = vpop.f32.mrb[152].mxu0  ;;  %v1942_v2 = vpop.f32.mrb[152].mxu1 }
 0x211   :  { %2422 = vst.msk [vmem:[%s6268_s3 + $0x258] sm:$0xff] %vm2346_vm3, %v2196_v31  ;;  %2535 = vst.msk [vmem:[%s6268_s3 + $0x5e0] sm:$0xff] %vm2346_vm3, %v2309_v32  ;;  %v1378_v34 = vadd.f32 %v5809_v27, %v1377_v33  ;;  %v3273_v35 = vpop.f32.mrb[153].mxu0  ;;  %v1943_v36 = vadd.f32 %v5809_v27, %v1942_v2  ;;  %v3612_v37 = vpop.f32.mrb[153].mxu1 }
 0x213   :  { %v2197_v38 = vmax.f32 %v1378_v34, 0.0  ;;  %v2310_v39 = vmax.f32 %v1943_v36, 0.0 }
 0x214   :  { %v1382_v40 = vpop.f32.mrb[154].mxu0  ;;  %v1947_v41 = vpop.f32.mrb[154].mxu1 }
 0x215   :  { %2423 = vst.msk [vmem:[%s6268_s3 + $0x260] sm:$0xff] %vm2346_vm3, %v2197_v38  ;;  %2536 = vst.msk [vmem:[%s6268_s3 + $0x5e8] sm:$0xff] %vm2346_vm3, %v2310_v39  ;;  %v1383_v42 = vadd.f32 %v5809_v27, %v1382_v40  ;;  %v3276_v43 = vpop.f32.mrb[155].mxu0  ;;  %v1948_v44 = vadd.f32 %v5809_v27, %v1947_v41  ;;  %v3615_v45 = vpop.f32.mrb[155].mxu1 }
 0x217   :  { %v2198_v46 = vmax.f32 %v1383_v42, 0.0  ;;  %v2311_v47 = vmax.f32 %v1948_v44, 0.0 }
 0x218   :  { %v1387_v48 = vpop.f32.mrb[156].mxu0  ;;  %v1952_v49 = vpop.f32.mrb[156].mxu1 }
 0x219   :  { %2424 = vst.msk [vmem:[%s6268_s3 + $0x268] sm:$0xff] %vm2346_vm3, %v2198_v46  ;;  %2537 = vst.msk [vmem:[%s6268_s3 + $0x5f0] sm:$0xff] %vm2346_vm3, %v2311_v47  ;;  %v1388_v50 = vadd.f32 %v5809_v27, %v1387_v48  ;;  %v3279_v51 = vpop.f32.mrb[157].mxu0  ;;  %v1953_v53 = vadd.f32 %v5809_v27, %v1952_v49  ;;  %v3618_v54 = vpop.f32.mrb[157].mxu1 }
 0x21b   :  { %v2199_v55 = vmax.f32 %v1388_v50, 0.0  ;;  %v2312_v56 = vmax.f32 %v1953_v53, 0.0 }
 0x21c   :  { %v1392_v57 = vpop.f32.mrb[158].mxu0  ;;  %v1957_v58 = vpop.f32.mrb[158].mxu1 }
 0x21d   :  { %2425 = vst.msk [vmem:[%s6268_s3 + $0x270] sm:$0xff] %vm2346_vm3, %v2199_v55  ;;  %2538 = vst.msk [vmem:[%s6268_s3 + $0x5f8] sm:$0xff] %vm2346_vm3, %v2312_v56  ;;  %v1393_v59 = vadd.f32 %v5809_v27, %v1392_v57  ;;  %v3282_v60 = vpop.f32.mrb[159].mxu0  ;;  %v1958_v61 = vadd.f32 %v5809_v27, %v1957_v58  ;;  %v3621_v62 = vpop.f32.mrb[159].mxu1 }
 0x21f   :  { %v2200_v63 = vmax.f32 %v1393_v59, 0.0  ;;  %v2313_v0 = vmax.f32 %v1958_v61, 0.0 }
 0x220   :  { %v1397_v52 = vpop.f32.mrb[160].mxu0  ;;  %v1962_v1 = vpop.f32.mrb[160].mxu1 }
 0x221   :  { %2426 = vst.msk [vmem:[%s6268_s3 + $0x278] sm:$0xff] %vm2346_vm3, %v2200_v63  ;;  %2539 = vst.msk [vmem:[%s6268_s3 + $0x600] sm:$0xff] %vm2346_vm3, %v2313_v0  ;;  %v1398_v3 = vadd.f32 %v5809_v27, %v1397_v52  ;;  %v3285_v4 = vpop.f32.mrb[161].mxu0  ;;  %v1963_v5 = vadd.f32 %v5809_v27, %v1962_v1  ;;  %v3624_v7 = vpop.f32.mrb[161].mxu1 }
 0x223   :  { %v2201_v8 = vmax.f32 %v1398_v3, 0.0  ;;  %v2314_v9 = vmax.f32 %v1963_v5, 0.0 }
 0x224   :  { %v1402_v10 = vpop.f32.mrb[162].mxu0  ;;  %v1967_v11 = vpop.f32.mrb[162].mxu1 }
 0x225   :  { %2427 = vst.msk [vmem:[%s6268_s3 + $0x280] sm:$0xff] %vm2346_vm3, %v2201_v8  ;;  %2540 = vst.msk [vmem:[%s6268_s3 + $0x608] sm:$0xff] %vm2346_vm3, %v2314_v9  ;;  %v1403_v12 = vadd.f32 %v5809_v27, %v1402_v10  ;;  %v3288_v13 = vpop.f32.mrb[163].mxu0  ;;  %v1968_v14 = vadd.f32 %v5809_v27, %v1967_v11  ;;  %v3627_v15 = vpop.f32.mrb[163].mxu1 }
 0x227   :  { %v2202_v16 = vmax.f32 %v1403_v12, 0.0  ;;  %v2315_v17 = vmax.f32 %v1968_v14, 0.0 }
 0x228   :  { %v1407_v18 = vpop.f32.mrb[164].mxu0  ;;  %v1972_v19 = vpop.f32.mrb[164].mxu1 }
 0x229   :  { %2428 = vst.msk [vmem:[%s6268_s3 + $0x288] sm:$0xff] %vm2346_vm3, %v2202_v16  ;;  %2541 = vst.msk [vmem:[%s6268_s3 + $0x610] sm:$0xff] %vm2346_vm3, %v2315_v17  ;;  %v1408_v20 = vadd.f32 %v5809_v27, %v1407_v18  ;;  %v3291_v21 = vpop.f32.mrb[165].mxu0  ;;  %v1973_v22 = vadd.f32 %v5809_v27, %v1972_v19  ;;  %v3630_v23 = vpop.f32.mrb[165].mxu1 }
 0x22b   :  { %v2203_v24 = vmax.f32 %v1408_v20, 0.0  ;;  %v2316_v6 = vmax.f32 %v1973_v22, 0.0 }
 0x22c   :  { %v1412_v25 = vpop.f32.mrb[166].mxu0  ;;  %v1977_v26 = vpop.f32.mrb[166].mxu1 }
 0x22d   :  { %2429 = vst.msk [vmem:[%s6268_s3 + $0x290] sm:$0xff] %vm2346_vm3, %v2203_v24  ;;  %2542 = vst.msk [vmem:[%s6268_s3 + $0x618] sm:$0xff] %vm2346_vm3, %v2316_v6  ;;  %v1413_v28 = vadd.f32 %v5809_v27, %v1412_v25  ;;  %v3294_v29 = vpop.f32.mrb[167].mxu0  ;;  %v1978_v30 = vadd.f32 %v5809_v27, %v1977_v26  ;;  %v3633_v31 = vpop.f32.mrb[167].mxu1 }
 0x22f   :  { %v2204_v32 = vmax.f32 %v1413_v28, 0.0  ;;  %v2317_v33 = vmax.f32 %v1978_v30, 0.0 }
 0x230   :  { %v1417_v2 = vpop.f32.mrb[168].mxu0  ;;  %v1982_v34 = vpop.f32.mrb[168].mxu1 }
 0x231   :  { %2430 = vst.msk [vmem:[%s6268_s3 + $0x298] sm:$0xff] %vm2346_vm3, %v2204_v32  ;;  %2543 = vst.msk [vmem:[%s6268_s3 + $0x620] sm:$0xff] %vm2346_vm3, %v2317_v33  ;;  %v1418_v35 = vadd.f32 %v5809_v27, %v1417_v2  ;;  %v3297_v36 = vpop.f32.mrb[169].mxu0  ;;  %v1983_v37 = vadd.f32 %v5809_v27, %v1982_v34  ;;  %v3636_v38 = vpop.f32.mrb[169].mxu1 }
 0x233   :  { %v2205_v39 = vmax.f32 %v1418_v35, 0.0  ;;  %v2318_v40 = vmax.f32 %v1983_v37, 0.0 }
 0x234   :  { %v1422_v41 = vpop.f32.mrb[170].mxu0  ;;  %v1987_v42 = vpop.f32.mrb[170].mxu1 }
 0x235   :  { %2431 = vst.msk [vmem:[%s6268_s3 + $0x2a0] sm:$0xff] %vm2346_vm3, %v2205_v39  ;;  %2544 = vst.msk [vmem:[%s6268_s3 + $0x628] sm:$0xff] %vm2346_vm3, %v2318_v40  ;;  %v1423_v43 = vadd.f32 %v5809_v27, %v1422_v41  ;;  %v3300_v44 = vpop.f32.mrb[171].mxu0  ;;  %v1988_v45 = vadd.f32 %v5809_v27, %v1987_v42  ;;  %v3639_v46 = vpop.f32.mrb[171].mxu1 }
 0x237   :  { %v2206_v47 = vmax.f32 %v1423_v43, 0.0  ;;  %v2319_v48 = vmax.f32 %v1988_v45, 0.0 }
 0x238   :  { %v1427_v49 = vpop.f32.mrb[172].mxu0  ;;  %v1992_v50 = vpop.f32.mrb[172].mxu1 }
 0x239   :  { %2432 = vst.msk [vmem:[%s6268_s3 + $0x2a8] sm:$0xff] %vm2346_vm3, %v2206_v47  ;;  %2545 = vst.msk [vmem:[%s6268_s3 + $0x630] sm:$0xff] %vm2346_vm3, %v2319_v48  ;;  %v1428_v51 = vadd.f32 %v5809_v27, %v1427_v49  ;;  %v3303_v53 = vpop.f32.mrb[173].mxu0  ;;  %v1993_v54 = vadd.f32 %v5809_v27, %v1992_v50  ;;  %v3642_v55 = vpop.f32.mrb[173].mxu1 }
 0x23b   :  { %v2207_v56 = vmax.f32 %v1428_v51, 0.0  ;;  %v2320_v57 = vmax.f32 %v1993_v54, 0.0 }
 0x23c   :  { %v1432_v58 = vpop.f32.mrb[174].mxu0  ;;  %v1997_v59 = vpop.f32.mrb[174].mxu1 }
 0x23d   :  { %2433 = vst.msk [vmem:[%s6268_s3 + $0x2b0] sm:$0xff] %vm2346_vm3, %v2207_v56  ;;  %2546 = vst.msk [vmem:[%s6268_s3 + $0x638] sm:$0xff] %vm2346_vm3, %v2320_v57  ;;  %v1433_v60 = vadd.f32 %v5809_v27, %v1432_v58  ;;  %v3306_v61 = vpop.f32.mrb[175].mxu0  ;;  %v1998_v62 = vadd.f32 %v5809_v27, %v1997_v59  ;;  %v3645_v63 = vpop.f32.mrb[175].mxu1 }
 0x23f   :  { %v2208_v0 = vmax.f32 %v1433_v60, 0.0  ;;  %v2321_v52 = vmax.f32 %v1998_v62, 0.0 }
 0x240   :  { %v1437_v1 = vpop.f32.mrb[176].mxu0  ;;  %v2002_v3 = vpop.f32.mrb[176].mxu1 }
 0x241   :  { %2434 = vst.msk [vmem:[%s6268_s3 + $0x2b8] sm:$0xff] %vm2346_vm3, %v2208_v0  ;;  %2547 = vst.msk [vmem:[%s6268_s3 + $0x640] sm:$0xff] %vm2346_vm3, %v2321_v52  ;;  %v1438_v4 = vadd.f32 %v5809_v27, %v1437_v1  ;;  %v3309_v5 = vpop.f32.mrb[177].mxu0  ;;  %v2003_v7 = vadd.f32 %v5809_v27, %v2002_v3  ;;  %v3648_v8 = vpop.f32.mrb[177].mxu1 }
 0x243   :  { %v2209_v9 = vmax.f32 %v1438_v4, 0.0  ;;  %v2322_v10 = vmax.f32 %v2003_v7, 0.0 }
 0x244   :  { %v1442_v11 = vpop.f32.mrb[178].mxu0  ;;  %v2007_v12 = vpop.f32.mrb[178].mxu1 }
 0x245   :  { %2435 = vst.msk [vmem:[%s6268_s3 + $0x2c0] sm:$0xff] %vm2346_vm3, %v2209_v9  ;;  %2548 = vst.msk [vmem:[%s6268_s3 + $0x648] sm:$0xff] %vm2346_vm3, %v2322_v10  ;;  %v1443_v13 = vadd.f32 %v5809_v27, %v1442_v11  ;;  %v3312_v14 = vpop.f32.mrb[179].mxu0  ;;  %v2008_v15 = vadd.f32 %v5809_v27, %v2007_v12  ;;  %v3651_v16 = vpop.f32.mrb[179].mxu1 }
 0x247   :  { %v2210_v17 = vmax.f32 %v1443_v13, 0.0  ;;  %v2323_v18 = vmax.f32 %v2008_v15, 0.0 }
 0x248   :  { %v1447_v19 = vpop.f32.mrb[180].mxu0  ;;  %v2012_v20 = vpop.f32.mrb[180].mxu1 }
 0x249   :  { %2436 = vst.msk [vmem:[%s6268_s3 + $0x2c8] sm:$0xff] %vm2346_vm3, %v2210_v17  ;;  %2549 = vst.msk [vmem:[%s6268_s3 + $0x650] sm:$0xff] %vm2346_vm3, %v2323_v18  ;;  %v1448_v21 = vadd.f32 %v5809_v27, %v1447_v19  ;;  %v3315_v22 = vpop.f32.mrb[181].mxu0  ;;  %v2013_v23 = vadd.f32 %v5809_v27, %v2012_v20  ;;  %v3654_v24 = vpop.f32.mrb[181].mxu1 }
 0x24b   :  { %v2211_v6 = vmax.f32 %v1448_v21, 0.0  ;;  %v2324_v25 = vmax.f32 %v2013_v23, 0.0 }
 0x24c   :  { %v1452_v26 = vpop.f32.mrb[182].mxu0  ;;  %v2017_v28 = vpop.f32.mrb[182].mxu1 }
 0x24d   :  { %2437 = vst.msk [vmem:[%s6268_s3 + $0x2d0] sm:$0xff] %vm2346_vm3, %v2211_v6  ;;  %2550 = vst.msk [vmem:[%s6268_s3 + $0x658] sm:$0xff] %vm2346_vm3, %v2324_v25  ;;  %v1453_v29 = vadd.f32 %v5809_v27, %v1452_v26  ;;  %v3318_v30 = vpop.f32.mrb[183].mxu0  ;;  %v2018_v31 = vadd.f32 %v5809_v27, %v2017_v28  ;;  %v3657_v32 = vpop.f32.mrb[183].mxu1 }
 0x24f   :  { %v2212_v33 = vmax.f32 %v1453_v29, 0.0  ;;  %v2325_v2 = vmax.f32 %v2018_v31, 0.0 }
 0x250   :  { %v1457_v34 = vpop.f32.mrb[184].mxu0  ;;  %v2022_v35 = vpop.f32.mrb[184].mxu1 }
 0x251   :  { %2438 = vst.msk [vmem:[%s6268_s3 + $0x2d8] sm:$0xff] %vm2346_vm3, %v2212_v33  ;;  %2551 = vst.msk [vmem:[%s6268_s3 + $0x660] sm:$0xff] %vm2346_vm3, %v2325_v2  ;;  %v1458_v36 = vadd.f32 %v5809_v27, %v1457_v34  ;;  %v3321_v37 = vpop.f32.mrb[185].mxu0  ;;  %v2023_v38 = vadd.f32 %v5809_v27, %v2022_v35  ;;  %v3660_v39 = vpop.f32.mrb[185].mxu1 }
 0x253   :  { %v2213_v40 = vmax.f32 %v1458_v36, 0.0  ;;  %v2326_v41 = vmax.f32 %v2023_v38, 0.0 }
 0x254   :  { %v1462_v42 = vpop.f32.mrb[186].mxu0  ;;  %v2027_v43 = vpop.f32.mrb[186].mxu1 }
 0x255   :  { %2439 = vst.msk [vmem:[%s6268_s3 + $0x2e0] sm:$0xff] %vm2346_vm3, %v2213_v40  ;;  %2552 = vst.msk [vmem:[%s6268_s3 + $0x668] sm:$0xff] %vm2346_vm3, %v2326_v41  ;;  %v1463_v44 = vadd.f32 %v5809_v27, %v1462_v42  ;;  %v3324_v45 = vpop.f32.mrb[187].mxu0  ;;  %v2028_v46 = vadd.f32 %v5809_v27, %v2027_v43  ;;  %v3663_v47 = vpop.f32.mrb[187].mxu1 }
 0x257   :  { %v2214_v48 = vmax.f32 %v1463_v44, 0.0  ;;  %v2327_v49 = vmax.f32 %v2028_v46, 0.0 }
 0x258   :  { %v1467_v50 = vpop.f32.mrb[188].mxu0  ;;  %v2032_v51 = vpop.f32.mrb[188].mxu1 }
 0x259   :  { %2440 = vst.msk [vmem:[%s6268_s3 + $0x2e8] sm:$0xff] %vm2346_vm3, %v2214_v48  ;;  %2553 = vst.msk [vmem:[%s6268_s3 + $0x670] sm:$0xff] %vm2346_vm3, %v2327_v49  ;;  %v1468_v53 = vadd.f32 %v5809_v27, %v1467_v50  ;;  %v3327_v54 = vpop.f32.mrb[189].mxu0  ;;  %v2033_v55 = vadd.f32 %v5809_v27, %v2032_v51  ;;  %v3666_v56 = vpop.f32.mrb[189].mxu1 }
 0x25b   :  { %v2215_v57 = vmax.f32 %v1468_v53, 0.0  ;;  %v2328_v58 = vmax.f32 %v2033_v55, 0.0 }
 0x25c   :  { %v1472_v59 = vpop.f32.mrb[190].mxu0  ;;  %v2037_v60 = vpop.f32.mrb[190].mxu1 }
 0x25d   :  { %2441 = vst.msk [vmem:[%s6268_s3 + $0x2f0] sm:$0xff] %vm2346_vm3, %v2215_v57  ;;  %2554 = vst.msk [vmem:[%s6268_s3 + $0x678] sm:$0xff] %vm2346_vm3, %v2328_v58  ;;  %v1473_v61 = vadd.f32 %v5809_v27, %v1472_v59  ;;  %v3330_v62 = vpop.f32.mrb[191].mxu0  ;;  %v2038_v63 = vadd.f32 %v5809_v27, %v2037_v60  ;;  %v3669_v0 = vpop.f32.mrb[191].mxu1 }
 0x25f   :  { %v2216_v52 = vmax.f32 %v1473_v61, 0.0  ;;  %v2329_v1 = vmax.f32 %v2038_v63, 0.0 }
 0x260   :  { %v1477_v3 = vpop.f32.mrb[192].mxu0  ;;  %v2042_v4 = vpop.f32.mrb[192].mxu1 }
 0x261   :  { %2442 = vst.msk [vmem:[%s6268_s3 + $0x2f8] sm:$0xff] %vm2346_vm3, %v2216_v52  ;;  %2555 = vst.msk [vmem:[%s6268_s3 + $0x680] sm:$0xff] %vm2346_vm3, %v2329_v1  ;;  %v1478_v5 = vadd.f32 %v5809_v27, %v1477_v3  ;;  %v3333_v7 = vpop.f32.mrb[193].mxu0  ;;  %v2043_v8 = vadd.f32 %v5809_v27, %v2042_v4  ;;  %v3672_v9 = vpop.f32.mrb[193].mxu1 }
 0x263   :  { %v2217_v10 = vmax.f32 %v1478_v5, 0.0  ;;  %v2330_v11 = vmax.f32 %v2043_v8, 0.0 }
 0x264   :  { %v1482_v12 = vpop.f32.mrb[194].mxu0  ;;  %v2047_v13 = vpop.f32.mrb[194].mxu1 }
 0x265   :  { %2443 = vst.msk [vmem:[%s6268_s3 + $0x300] sm:$0xff] %vm2346_vm3, %v2217_v10  ;;  %2556 = vst.msk [vmem:[%s6268_s3 + $0x688] sm:$0xff] %vm2346_vm3, %v2330_v11  ;;  %v1483_v14 = vadd.f32 %v5809_v27, %v1482_v12  ;;  %v3336_v15 = vpop.f32.mrb[195].mxu0  ;;  %v2048_v16 = vadd.f32 %v5809_v27, %v2047_v13  ;;  %v3675_v17 = vpop.f32.mrb[195].mxu1 }
 0x267   :  { %v2218_v18 = vmax.f32 %v1483_v14, 0.0  ;;  %v2331_v19 = vmax.f32 %v2048_v16, 0.0 }
 0x268   :  { %v1487_v20 = vpop.f32.mrb[196].mxu0  ;;  %v2052_v21 = vpop.f32.mrb[196].mxu1 }
 0x269   :  { %2444 = vst.msk [vmem:[%s6268_s3 + $0x308] sm:$0xff] %vm2346_vm3, %v2218_v18  ;;  %2557 = vst.msk [vmem:[%s6268_s3 + $0x690] sm:$0xff] %vm2346_vm3, %v2331_v19  ;;  %v1488_v22 = vadd.f32 %v5809_v27, %v1487_v20  ;;  %v3339_v23 = vpop.f32.mrb[197].mxu0  ;;  %v2053_v24 = vadd.f32 %v5809_v27, %v2052_v21  ;;  %v3678_v6 = vpop.f32.mrb[197].mxu1 }
 0x26b   :  { %v2219_v25 = vmax.f32 %v1488_v22, 0.0  ;;  %v2332_v26 = vmax.f32 %v2053_v24, 0.0 }
 0x26c   :  { %v1492_v28 = vpop.f32.mrb[198].mxu0  ;;  %v2057_v29 = vpop.f32.mrb[198].mxu1 }
 0x26d   :  { %2445 = vst.msk [vmem:[%s6268_s3 + $0x310] sm:$0xff] %vm2346_vm3, %v2219_v25  ;;  %2558 = vst.msk [vmem:[%s6268_s3 + $0x698] sm:$0xff] %vm2346_vm3, %v2332_v26  ;;  %v1493_v30 = vadd.f32 %v5809_v27, %v1492_v28  ;;  %v3342_v31 = vpop.f32.mrb[199].mxu0  ;;  %v2058_v32 = vadd.f32 %v5809_v27, %v2057_v29  ;;  %v3681_v33 = vpop.f32.mrb[199].mxu1 }
 0x26f   :  { %v2220_v2 = vmax.f32 %v1493_v30, 0.0  ;;  %v2333_v34 = vmax.f32 %v2058_v32, 0.0 }
 0x270   :  { %v1497_v35 = vpop.f32.mrb[200].mxu0  ;;  %v2062_v36 = vpop.f32.mrb[200].mxu1 }
 0x271   :  { %2446 = vst.msk [vmem:[%s6268_s3 + $0x318] sm:$0xff] %vm2346_vm3, %v2220_v2  ;;  %2559 = vst.msk [vmem:[%s6268_s3 + $0x6a0] sm:$0xff] %vm2346_vm3, %v2333_v34  ;;  %v1498_v37 = vadd.f32 %v5809_v27, %v1497_v35  ;;  %v3345_v38 = vpop.f32.mrb[201].mxu0  ;;  %v2063_v39 = vadd.f32 %v5809_v27, %v2062_v36  ;;  %v3684_v40 = vpop.f32.mrb[201].mxu1 }
 0x273   :  { %v2221_v41 = vmax.f32 %v1498_v37, 0.0  ;;  %v2334_v42 = vmax.f32 %v2063_v39, 0.0 }
 0x274   :  { %v1502_v43 = vpop.f32.mrb[202].mxu0  ;;  %v2067_v44 = vpop.f32.mrb[202].mxu1 }
 0x275   :  { %2447 = vst.msk [vmem:[%s6268_s3 + $0x320] sm:$0xff] %vm2346_vm3, %v2221_v41  ;;  %2560 = vst.msk [vmem:[%s6268_s3 + $0x6a8] sm:$0xff] %vm2346_vm3, %v2334_v42  ;;  %v1503_v45 = vadd.f32 %v5809_v27, %v1502_v43  ;;  %v3348_v46 = vpop.f32.mrb[203].mxu0  ;;  %v2068_v47 = vadd.f32 %v5809_v27, %v2067_v44  ;;  %v3687_v48 = vpop.f32.mrb[203].mxu1 }
 0x277   :  { %v2222_v49 = vmax.f32 %v1503_v45, 0.0  ;;  %v2335_v50 = vmax.f32 %v2068_v47, 0.0 }
 0x278   :  { %v1507_v51 = vpop.f32.mrb[204].mxu0  ;;  %v2072_v53 = vpop.f32.mrb[204].mxu1 }
 0x279   :  { %2448 = vst.msk [vmem:[%s6268_s3 + $0x328] sm:$0xff] %vm2346_vm3, %v2222_v49  ;;  %2561 = vst.msk [vmem:[%s6268_s3 + $0x6b0] sm:$0xff] %vm2346_vm3, %v2335_v50  ;;  %v1508_v54 = vadd.f32 %v5809_v27, %v1507_v51  ;;  %v3351_v55 = vpop.f32.mrb[205].mxu0  ;;  %v2073_v56 = vadd.f32 %v5809_v27, %v2072_v53  ;;  %v3690_v57 = vpop.f32.mrb[205].mxu1 }
 0x27b   :  { %v2223_v58 = vmax.f32 %v1508_v54, 0.0  ;;  %v2336_v59 = vmax.f32 %v2073_v56, 0.0 }
 0x27c   :  { %v1512_v60 = vpop.f32.mrb[206].mxu0  ;;  %v2077_v61 = vpop.f32.mrb[206].mxu1 }
 0x27d   :  { %2449 = vst.msk [vmem:[%s6268_s3 + $0x330] sm:$0xff] %vm2346_vm3, %v2223_v58  ;;  %2562 = vst.msk [vmem:[%s6268_s3 + $0x6b8] sm:$0xff] %vm2346_vm3, %v2336_v59  ;;  %v1513_v62 = vadd.f32 %v5809_v27, %v1512_v60  ;;  %v3354_v63 = vpop.f32.mrb[207].mxu0  ;;  %v2078_v0 = vadd.f32 %v5809_v27, %v2077_v61  ;;  %v3693_v52 = vpop.f32.mrb[207].mxu1 }
 0x27f   :  { %v2224_v1 = vmax.f32 %v1513_v62, 0.0  ;;  %v2337_v3 = vmax.f32 %v2078_v0, 0.0 }
 0x280   :  { %v1517_v4 = vpop.f32.mrb[208].mxu0  ;;  %v2082_v5 = vpop.f32.mrb[208].mxu1 }
 0x281   :  { %2450 = vst.msk [vmem:[%s6268_s3 + $0x338] sm:$0xff] %vm2346_vm3, %v2224_v1  ;;  %2563 = vst.msk [vmem:[%s6268_s3 + $0x6c0] sm:$0xff] %vm2346_vm3, %v2337_v3  ;;  %v1518_v7 = vadd.f32 %v5809_v27, %v1517_v4  ;;  %v3357_v8 = vpop.f32.mrb[209].mxu0  ;;  %v2083_v9 = vadd.f32 %v5809_v27, %v2082_v5  ;;  %v3696_v10 = vpop.f32.mrb[209].mxu1 }
 0x283   :  { %v2225_v11 = vmax.f32 %v1518_v7, 0.0  ;;  %v2338_v12 = vmax.f32 %v2083_v9, 0.0 }
 0x284   :  { %v1522_v13 = vpop.f32.mrb[210].mxu0  ;;  %v2087_v14 = vpop.f32.mrb[210].mxu1 }
 0x285   :  { %2451 = vst.msk [vmem:[%s6268_s3 + $0x340] sm:$0xff] %vm2346_vm3, %v2225_v11  ;;  %2564 = vst.msk [vmem:[%s6268_s3 + $0x6c8] sm:$0xff] %vm2346_vm3, %v2338_v12  ;;  %v1523_v15 = vadd.f32 %v5809_v27, %v1522_v13  ;;  %v3360_v16 = vpop.f32.mrb[211].mxu0  ;;  %v2088_v17 = vadd.f32 %v5809_v27, %v2087_v14  ;;  %v3699_v18 = vpop.f32.mrb[211].mxu1 }
 0x287   :  { %v2226_v19 = vmax.f32 %v1523_v15, 0.0  ;;  %v2339_v20 = vmax.f32 %v2088_v17, 0.0 }
 0x288   :  { %v1527_v21 = vpop.f32.mrb[212].mxu0  ;;  %v2092_v22 = vpop.f32.mrb[212].mxu1 }
 0x289   :  { %2452 = vst.msk [vmem:[%s6268_s3 + $0x348] sm:$0xff] %vm2346_vm3, %v2226_v19  ;;  %2565 = vst.msk [vmem:[%s6268_s3 + $0x6d0] sm:$0xff] %vm2346_vm3, %v2339_v20  ;;  %v1528_v23 = vadd.f32 %v5809_v27, %v1527_v21  ;;  %v3363_v24 = vpop.f32.mrb[213].mxu0  ;;  %v2093_v6 = vadd.f32 %v5809_v27, %v2092_v22  ;;  %v3702_v25 = vpop.f32.mrb[213].mxu1 }
 0x28b   :  { %v2227_v26 = vmax.f32 %v1528_v23, 0.0  ;;  %v2340_v28 = vmax.f32 %v2093_v6, 0.0 }
 0x28c   :  { %v1532_v29 = vpop.f32.mrb[214].mxu0  ;;  %v2097_v30 = vpop.f32.mrb[214].mxu1 }
 0x28d   :  { %2453 = vst.msk [vmem:[%s6268_s3 + $0x350] sm:$0xff] %vm2346_vm3, %v2227_v26  ;;  %2566 = vst.msk [vmem:[%s6268_s3 + $0x6d8] sm:$0xff] %vm2346_vm3, %v2340_v28  ;;  %v1533_v31 = vadd.f32 %v5809_v27, %v1532_v29  ;;  %v3366_v32 = vpop.f32.mrb[215].mxu0  ;;  %v2098_v33 = vadd.f32 %v5809_v27, %v2097_v30  ;;  %v3705_v2 = vpop.f32.mrb[215].mxu1 }
 0x28f   :  { %v2228_v34 = vmax.f32 %v1533_v31, 0.0  ;;  %v2341_v35 = vmax.f32 %v2098_v33, 0.0 }
 0x290   :  { %v1537_v36 = vpop.f32.mrb[216].mxu0  ;;  %v2102_v37 = vpop.f32.mrb[216].mxu1 }
 0x291   :  { %2454 = vst.msk [vmem:[%s6268_s3 + $0x358] sm:$0xff] %vm2346_vm3, %v2228_v34  ;;  %2567 = vst.msk [vmem:[%s6268_s3 + $0x6e0] sm:$0xff] %vm2346_vm3, %v2341_v35  ;;  %v1538_v38 = vadd.f32 %v5809_v27, %v1537_v36  ;;  %v3369_v39 = vpop.f32.mrb[217].mxu0  ;;  %v2103_v40 = vadd.f32 %v5809_v27, %v2102_v37  ;;  %v3708_v41 = vpop.f32.mrb[217].mxu1 }
 0x293   :  { %v2229_v42 = vmax.f32 %v1538_v38, 0.0  ;;  %v2342_v43 = vmax.f32 %v2103_v40, 0.0 }
 0x294   :  { %v1542_v44 = vpop.f32.mrb[218].mxu0  ;;  %v2107_v45 = vpop.f32.mrb[218].mxu1 }
 0x295   :  { %2455 = vst.msk [vmem:[%s6268_s3 + $0x360] sm:$0xff] %vm2346_vm3, %v2229_v42  ;;  %2568 = vst.msk [vmem:[%s6268_s3 + $0x6e8] sm:$0xff] %vm2346_vm3, %v2342_v43  ;;  %v1543_v46 = vadd.f32 %v5809_v27, %v1542_v44  ;;  %v3372_v47 = vpop.f32.mrb[219].mxu0  ;;  %v2108_v48 = vadd.f32 %v5809_v27, %v2107_v45  ;;  %v3711_v49 = vpop.f32.mrb[219].mxu1 }
 0x297   :  { %v2230_v50 = vmax.f32 %v1543_v46, 0.0  ;;  %v2343_v51 = vmax.f32 %v2108_v48, 0.0 }
 0x298   :  { %v1547_v53 = vpop.f32.mrb[220].mxu0  ;;  %v2112_v54 = vpop.f32.mrb[220].mxu1 }
 0x299   :  { %2456 = vst.msk [vmem:[%s6268_s3 + $0x368] sm:$0xff] %vm2346_vm3, %v2230_v50  ;;  %2569 = vst.msk [vmem:[%s6268_s3 + $0x6f0] sm:$0xff] %vm2346_vm3, %v2343_v51  ;;  %v1548_v55 = vadd.f32 %v5809_v27, %v1547_v53  ;;  %v3375_v56 = vpop.f32.mrb[221].mxu0  ;;  %v2113_v57 = vadd.f32 %v5809_v27, %v2112_v54  ;;  %v3714_v58 = vpop.f32.mrb[221].mxu1 }
 0x29b   :  { %v2231_v59 = vmax.f32 %v1548_v55, 0.0  ;;  %v2344_v60 = vmax.f32 %v2113_v57, 0.0 }
 0x29c   :  { %v1552_v61 = vpop.f32.mrb[222].mxu0  ;;  %v2117_v62 = vpop.f32.mrb[222].mxu1 }
 0x29d   :  { %2457 = vst.msk [vmem:[%s6268_s3 + $0x370] sm:$0xff] %vm2346_vm3, %v2231_v59  ;;  %2570 = vst.msk [vmem:[%s6268_s3 + $0x6f8] sm:$0xff] %vm2346_vm3, %v2344_v60  ;;  %v1553_v63 = vadd.f32 %v5809_v27, %v1552_v61  ;;  %v3378_v0 = vpop.f32.mrb[223].mxu0  ;;  %v2118_v52 = vadd.f32 %v5809_v27, %v2117_v62  ;;  %v3717_v1 = vpop.f32.mrb[223].mxu1 }
 0x29f   :  { %v2232_v3 = vmax.f32 %v1553_v63, 0.0  ;;  %v2345_v4 = vmax.f32 %v2118_v52, 0.0 }
 0x2a0   :  { %v1557_v5 = vpop.f32.mrb[224].mxu0 }
 0x2a1   :  { %2458 = vst.msk [vmem:[%s6268_s3 + $0x378] sm:$0xff] %vm2346_vm3, %v2232_v3  ;;  %2571 = vst.msk [vmem:[%s6268_s3 + $0x700] sm:$0xff] %vm2346_vm3, %v2345_v4  ;;  %v1558_v7 = vadd.f32 %v5809_v27, %v1557_v5  ;;  %v3381_v8 = vpop.f32.mrb[225].mxu0 }
 0x2a3   :  { %v2233_v9 = vmax.f32 %v1558_v7, 0.0 }
 0x2a5   :  { %2459 = vst.msk [vmem:[%s6268_s3 + $0x380] sm:$0xff] %vm2346_vm3, %v2233_v9 }

</bundles_post_ra>
